<compile_context>
chip_gen: v7x
topology: tpu7x:2x2x1
jax: 0.10.0
libtpu: 0.0.40
codegen_flags: <defaults>
</compile_context>

<pallas_src>
import math

import jax
import jax.numpy as jnp
from jax.experimental import pallas as pl
from jax.experimental.pallas import tpu as pltpu

KH = KW = 3
K2 = KH * KW
STRIDE = 1
PAD = 1
DIL = 1
LANE = 128


# ----------------------------- Pallas kernels --------------------------------

def _conv_im2col_kernel(cols_ref, w_ref, b_ref, o_ref):
    # cols_ref: [Cin*9, NLt] bf16   w_ref: [Coff, Cin*9] bf16   b_ref: [Coff, 1] f32
    acc = jnp.dot(w_ref[...], cols_ref[...], preferred_element_type=jnp.float32)
    o_ref[...] = (acc + b_ref[...]).astype(o_ref.dtype)


def _dcn_kernel(v_ref, w_ref, wt_ref, b_ref, o_ref):
    # v_ref:  [4, Cin*9, NLt] bf16 gathered neighbour values, row = k*Cin + c (tap-major)
    # w_ref:  [4, 9, NLt] f32 per-corner tap weights with sigmoid(mask), the
    #         "inside" predicate and corner validity already folded in.
    # wt_ref: [Cout, Cin*9] f32 conv weight with tap-major columns
    # b_ref:  [Cout, 1] f32
    k2 = w_ref.shape[1]
    cin = v_ref.shape[1] // k2
    wt = wt_ref[...]
    acc = jnp.zeros(o_ref.shape, jnp.float32)
    for corner in range(4):
        # aligned sublane broadcast of the 9 tap-weight rows across Cin
        # (never materialised in HBM; replaces the old misaligned concatenate)
        w_full = jnp.repeat(w_ref[corner], cin, axis=0)          # [Cin*9, NLt]
        mod = v_ref[corner].astype(jnp.float32) * w_full         # f32 VPU (v5e-safe)
        # let the MXU absorb the corner sum: 4 small dots + tiny [Cout, NLt] adds
        acc = acc + jnp.dot(wt, mod, preferred_element_type=jnp.float32)
    o_ref[...] = (acc + b_ref[...]).astype(o_ref.dtype)


# ------------------------------ Pallas wrappers --------------------------------

def conv_offset_mask_pallas(cols, w_off, b_off, *, nl_tile):
    K2C, NLp = cols.shape
    Coff = w_off.shape[0]
    w2d = w_off.reshape(Coff, K2C).astype(jnp.bfloat16)
    b2d = b_off.reshape(Coff, 1).astype(jnp.float32)
    flops = 2 * Coff * K2C * NLp
    bytes_acc = K2C * NLp * 2 + Coff * K2C * 2 + Coff * 4 + Coff * NLp * 4
    return pl.pallas_call(
        _conv_im2col_kernel,
        out_shape=jax.ShapeDtypeStruct((Coff, NLp), jnp.float32),
        grid=(NLp // nl_tile,),
        in_specs=[
            pl.BlockSpec((K2C, nl_tile), lambda i: (0, i)),
            pl.BlockSpec((Coff, K2C), lambda i: (0, 0)),
            pl.BlockSpec((Coff, 1), lambda i: (0, 0)),
        ],
        out_specs=pl.BlockSpec((Coff, nl_tile), lambda i: (0, i)),
        compiler_params=pltpu.CompilerParams(dimension_semantics=("parallel",)),
        cost_estimate=pl.CostEstimate(flops=flops, transcendentals=0,
                                      bytes_accessed=bytes_acc),
    )(cols, w2d, b2d)


def dcn_matmul_pallas(v_all, w_taps, weight, bias, *, nl_tile):
    _, K2C, NLp = v_all.shape
    Cout = weight.shape[0]
    # permute conv-weight columns to tap-major (k*Cin + c) to match v_all rows
    wt = weight.transpose(0, 2, 3, 1).reshape(Cout, K2C).astype(jnp.float32)
    b2 = bias.reshape(Cout, 1).astype(jnp.float32)
    flops = 4 * 2 * Cout * K2C * NLp + 4 * K2C * NLp
    bytes_acc = (4 * K2C * NLp * 2          # bf16 value slabs
                 + 4 * K2 * NLp * 4         # tap weights (9-wide, not Cin*9-wide)
                 + (Cout * K2C + Cout + Cout * NLp) * 4)
    return pl.pallas_call(
        _dcn_kernel,
        out_shape=jax.ShapeDtypeStruct((Cout, NLp), jnp.float32),
        grid=(NLp // nl_tile,),
        in_specs=[
            pl.BlockSpec((4, K2C, nl_tile), lambda i: (0, 0, i)),
            pl.BlockSpec((4, K2, nl_tile), lambda i: (0, 0, i)),
            pl.BlockSpec((Cout, K2C), lambda i: (0, 0)),
            pl.BlockSpec((Cout, 1), lambda i: (0, 0)),
        ],
        out_specs=pl.BlockSpec((Cout, nl_tile), lambda i: (0, i)),
        compiler_params=pltpu.CompilerParams(dimension_semantics=("parallel",)),
        cost_estimate=pl.CostEstimate(flops=flops, transcendentals=0,
                                      bytes_accessed=bytes_acc),
    )(v_all, w_taps, wt, b2)


# ------------------------------ JAX glue --------------------------------------

def im2col_folded(x):
    """[B, C, H, W] -> [C*9, B*H*W], row = c*9 + (ky*KW + kx) (stride=1, pad=1).

    TODO(synk): im2col stays in XLA glue; building the 9 taps with in-kernel
    shifted reads is possible but the batch-folded lane layout makes the shift
    batch-dependent, so it is left out for robustness.
    """
    B, C, H, W = x.shape
    xp = jnp.pad(x, ((0, 0), (0, 0), (PAD, PAD), (PAD, PAD)))
    taps = [xp[:, :, ky:ky + H, kx:kx + W] for ky in range(KH) for kx in range(KW)]
    cols = jnp.stack(taps, axis=2)            # [B, C, 9, H, W]
    cols = cols.transpose(1, 2, 0, 3, 4)      # [C, 9, B, H, W]
    return cols.reshape(C * K2, B * H * W)


def resize_bilinear(x, out_h, out_w, align_corners=True):
    """PyTorch-style F.interpolate(..., mode='bilinear')."""
    B, C, H, W = x.shape
    if align_corners:
        ys = jnp.linspace(0.0, H - 1.0, out_h)
        xs = jnp.linspace(0.0, W - 1.0, out_w)
    else:
        ys = jnp.maximum((jnp.arange(out_h, dtype=jnp.float32) + 0.5) * (H / out_h) - 0.5, 0.0)
        xs = jnp.maximum((jnp.arange(out_w, dtype=jnp.float32) + 0.5) * (W / out_w) - 0.5, 0.0)
    y0 = jnp.clip(jnp.floor(ys).astype(jnp.int32), 0, H - 1)
    x0 = jnp.clip(jnp.floor(xs).astype(jnp.int32), 0, W - 1)
    y1 = jnp.clip(y0 + 1, 0, H - 1)
    x1 = jnp.clip(x0 + 1, 0, W - 1)
    wy = (ys - y0.astype(jnp.float32))[None, None, :, None]
    wx = (xs - x0.astype(jnp.float32))[None, None, None, :]
    tl = x[:, :, y0][:, :, :, x0]
    tr = x[:, :, y0][:, :, :, x1]
    bl = x[:, :, y1][:, :, :, x0]
    br = x[:, :, y1][:, :, :, x1]
    top = tl * (1.0 - wx) + tr * wx
    bot = bl * (1.0 - wx) + br * wx
    return top * (1.0 - wy) + bot * wy


def dcn_layer_illu_forward(params, input_feat, inter, illu_map,
                           scale_factor=0.5, align_corners=True):
    """Mirrors DCN_layer_illu.forward (NCHW in/out)."""
    B, Cin, H, W = input_feat.shape
    # forward hard-codes a (16, 44) rescale of illu_map; the feature maps must
    # match for the offset * scale broadcast to be valid (as in the reference).
    assert (H, W) == (16, 44), (H, W)
    HW = H * W
    NL = B * HW
    K2C = Cin * K2
    Cout = params['weight'].shape[0]

    # pad the lane axis to an even number of 128-lane tiles and split in two
    n_tiles = 2
    NLp = -(-NL // (n_tiles * LANE)) * (n_tiles * LANE)
    nl_tile = NLp // n_tiles
    lane_pad = NLp - NL

    # ---- stage 1: conv_offset_mask as a lane-dense im2col matmul (bf16 in) ---
    cols = im2col_folded(inter).astype(jnp.bfloat16)                     # [K2C, NL]
    cols = jnp.pad(cols, ((0, 0), (0, lane_pad)))
    off_mask = conv_offset_mask_pallas(cols, params['w_off'], params['b_off'],
                                       nl_tile=nl_tile)[:, :NL]          # [27, NL]

    o1 = off_mask[:K2]                                                   # [9, NL]
    o2 = off_mask[K2:2 * K2]
    mask_raw = off_mask[2 * K2:3 * K2]                                   # [9, NL]
    # DCNv2 channel convention: channel 2k -> dy_k, 2k+1 -> dx_k after cat(o1,o2)
    off = jnp.concatenate([o1, o2], axis=0).reshape(K2, 2, NL)

    # ---- illumination scale (tiny; applied where the offsets are consumed) --
    illu_rs = resize_bilinear(illu_map, 16, 44, align_corners)           # [B,1,16,44]
    eps = 1e-6
    illum_inv = 1.0 / (illu_rs + eps)
    illum_inv_norm = (illum_inv - illum_inv.min()) / (illum_inv.max() - illum_inv.min())
    scale = (1.0 + scale_factor * illum_inv_norm).reshape(NL)            # per-lane

    dy = off[:, 0] * scale[None, :]                                      # [9, NL]
    dx = off[:, 1] * scale[None, :]

    # ---- sampling positions + bilinear tap weights (all [9, NL], plain JAX) --
    ky_idx = jnp.repeat(jnp.arange(KH, dtype=jnp.float32), KW)           # [9]
    kx_idx = jnp.tile(jnp.arange(KW, dtype=jnp.float32), KH)             # [9]
    hh = jnp.arange(H, dtype=jnp.float32) * STRIDE - PAD
    ww = jnp.arange(W, dtype=jnp.float32) * STRIDE - PAD
    base_y = jnp.broadcast_to(ky_idx[:, None, None] * DIL + hh[None, :, None], (K2, H, W))
    base_x = jnp.broadcast_to(kx_idx[:, None, None] * DIL + ww[None, None, :], (K2, H, W))
    base_y = jnp.tile(base_y.reshape(K2, HW), (1, B))                    # [9, NL]
    base_x = jnp.tile(base_x.reshape(K2, HW), (1, B))

    py = base_y + dy
    px = base_x + dx

    inside = ((py > -1.0) & (px > -1.0) & (py < H) & (px < W)).astype(jnp.float32)

    y0f = jnp.floor(py)
    x0f = jnp.floor(px)
    ly = py - y0f
    lx = px - x0f
    hy = 1.0 - ly
    hx = 1.0 - lx
    y0 = y0f.astype(jnp.int32)
    x0 = x0f.astype(jnp.int32)
    y1 = y0 + 1
    x1 = x0 + 1

    m00 = ((y0 >= 0) & (x0 >= 0)).astype(jnp.float32)
    m01 = ((y0 >= 0) & (x1 <= W - 1)).astype(jnp.float32)
    m10 = ((y1 <= H - 1) & (x0 >= 0)).astype(jnp.float32)
    m11 = ((y1 <= H - 1) & (x1 <= W - 1)).astype(jnp.float32)

    # sigmoid(mask) + validity folded into the 9-wide tap weights (no Cin*9 HBM
    # broadcast, 8x fewer transcendentals than a full-width in-kernel sigmoid)
    mod_w = jax.nn.sigmoid(mask_raw) * inside                            # [9, NL]
    w_taps = jnp.stack([hy * hx * m00 * mod_w,
                        hy * lx * m01 * mod_w,
                        ly * hx * m10 * mod_w,
                        ly * lx * m11 * mod_w], axis=0)                  # [4, 9, NL]

    # ---- data-dependent 4-neighbour gather as ONE jnp.take, tap-major bf16 ---
    # TODO(synk): the gather has no clean rectangular-DMA Pallas equivalent, so
    # it stays in JAX; the bilinear combine + modulation + conv matmul run in
    # the Pallas kernel.
    x_t = input_feat.reshape(B, Cin, HW).transpose(1, 0, 2).reshape(Cin, NL)
    batch_off = jnp.repeat(jnp.arange(B, dtype=jnp.int32) * HW, HW)[None, :]  # [1, NL]

    def flat_idx(yi, xi):
        return jnp.clip(yi, 0, H - 1) * W + jnp.clip(xi, 0, W - 1) + batch_off

    idx_all = jnp.stack([flat_idx(y0, x0), flat_idx(y0, x1),
                         flat_idx(y1, x0), flat_idx(y1, x1)], axis=0)    # [4, 9, NL]
    g = jnp.take(x_t, idx_all.reshape(-1), axis=1)                       # [Cin, 4*9*NL]
    g = g.reshape(Cin, 4, K2, NL).transpose(1, 2, 0, 3)                  # [4, 9, Cin, NL]
    v_all = g.reshape(4, K2C, NL).astype(jnp.bfloat16)                   # row = k*Cin + c

    v_all = jnp.pad(v_all, ((0, 0), (0, 0), (0, lane_pad)))
    w_taps = jnp.pad(w_taps, ((0, 0), (0, 0), (0, lane_pad)))

    out = dcn_matmul_pallas(v_all, w_taps, params['weight'], params['bias'],
                            nl_tile=nl_tile)[:, :NL]                     # [Cout, NL]
    return out.reshape(Cout, B, H, W).transpose(1, 0, 2, 3)


# --------------------------------- main ---------------------------------------

if __name__ == "__main__":
    key = jax.random.PRNGKey(0)
    B, Cin, Cout = 2, 8, 8
    # forward hard-codes a (16, 44) rescale of illu_map, so the feature maps
    # must be 16x44 for the offset * scale broadcast to be valid.
    H, W = 16, 44
    k1, k2, k3, k4, k5, k6, k7 = jax.random.split(key, 7)

    stdv = 1.0 / math.sqrt(Cin * KH * KW)
    params = {
        'weight': jax.random.uniform(k1, (Cout, Cin, KH, KW), jnp.float32, -stdv, stdv),
        'bias': 0.1 * jax.random.normal(k2, (Cout,), jnp.float32),
        # note: the module zero-inits conv_offset_mask; we use small random
        # values so the deformable sampling path is actually exercised.
        'w_off': 0.1 * jax.random.normal(k3, (3 * KH * KW, Cin, KH, KW), jnp.float32),
        'b_off': 0.05 * jax.random.normal(k4, (3 * KH * KW,), jnp.float32),
    }

    input_feat = jax.random.normal(k5, (B, Cin, H, W), jnp.float32)
    inter = jax.random.normal(k6, (B, Cin, H, W), jnp.float32)
    illu_map = jax.random.uniform(k7, (B, 1, 8, 22), jnp.float32, minval=0.1, maxval=1.0)

    fwd = jax.jit(dcn_layer_illu_forward)
    out = fwd(params, input_feat, inter, illu_map)
    out = jax.block_until_ready(out)
    assert out.shape == (B, Cout, H, W), out.shape
    assert bool(jnp.all(jnp.isfinite(out)))
    print("KERNEL_OK")
</pallas_src>

<mosaic_0001>
module attributes {stable_mosaic.version = 11 : i64} {
  func.func @_conv_im2col_kernel(%arg0: i32, %arg1: memref<72x768xbf16, #tpu.memory_space<vmem>>, %arg2: memref<27x72xbf16, #tpu.memory_space<vmem>>, %arg3: memref<27x1xf32, #tpu.memory_space<vmem>>, %arg4: memref<27x768xf32, #tpu.memory_space<vmem>>) attributes {dimension_semantics = [#tpu.dimension_semantics<parallel>], iteration_bounds = array<i64: 2>, scalar_prefetch = 0 : i64, scratch_operands = 0 : i64, tpu.core_type = #tpu.core_type<tc>, window_params = [{transform_indices = @transform_0, window_bounds = array<i64: 72, 768>}, {pipeline_mode = #tpu.pipeline_mode<synchronous>, transform_indices = @transform_1, window_bounds = array<i64: 27, 72>}, {pipeline_mode = #tpu.pipeline_mode<synchronous>, transform_indices = @transform_2, window_bounds = array<i64: 27, 1>}, {transform_indices = @transform_3, window_bounds = array<i64: 27, 768>}]} {
    %c0 = arith.constant 0 : index
    %c0_0 = arith.constant 0 : index
    %0 = vector.load %arg2[%c0, %c0_0] : memref<27x72xbf16, #tpu.memory_space<vmem>>, vector<27x72xbf16>
    %c0_1 = arith.constant 0 : index
    %c0_2 = arith.constant 0 : index
    %1 = vector.load %arg1[%c0_1, %c0_2] : memref<72x768xbf16, #tpu.memory_space<vmem>>, vector<72x768xbf16>
    %cst = arith.constant dense<0.000000e+00> : vector<27x768xf32>
    %2 = tpu.matmul %0, %1, %cst {dimension_numbers = #tpu.dot_dimension_numbers<[1], [0], [0], [1], [0, 0, 1, 1], [], []>} : vector<27x72xbf16>, vector<72x768xbf16>, vector<27x768xf32> -> vector<27x768xf32>
    %c0_3 = arith.constant 0 : index
    %c0_4 = arith.constant 0 : index
    %3 = vector.load %arg3[%c0_3, %c0_4] : memref<27x1xf32, #tpu.memory_space<vmem>>, vector<27x1xf32>
    %4 = vector.broadcast %3 : vector<27x1xf32> to vector<27x768xf32>
    %5 = arith.addf %2, %4 : vector<27x768xf32>
    %c0_5 = arith.constant 0 : index
    %c0_6 = arith.constant 0 : index
    %6 = vector.load %arg4[%c0_5, %c0_6] : memref<27x768xf32, #tpu.memory_space<vmem>>, vector<27x768xf32>
    tpu.vector_store %arg4[%c0_5, %c0_6], %5 {strides = array<i32>} : memref<27x768xf32, #tpu.memory_space<vmem>>, vector<27x768xf32>,
    return
  }
  func.func @transform_0(%arg0: i32) -> (i32, i32) {
    %c0_i32 = arith.constant 0 : i32
    %c0_i32_0 = arith.constant 0 : i32
    return %c0_i32, %arg0 : i32, i32
  }
  func.func @transform_1(%arg0: i32) -> (i32, i32) {
    %c0_i32 = arith.constant 0 : i32
    %c0_i32_0 = arith.constant 0 : i32
    %c0_i32_1 = arith.constant 0 : i32
    return %c0_i32, %c0_i32_0 : i32, i32
  }
  func.func @transform_2(%arg0: i32) -> (i32, i32) {
    %c0_i32 = arith.constant 0 : i32
    %c0_i32_0 = arith.constant 0 : i32
    %c0_i32_1 = arith.constant 0 : i32
    return %c0_i32, %c0_i32_0 : i32, i32
  }
  func.func @transform_3(%arg0: i32) -> (i32, i32) {
    %c0_i32 = arith.constant 0 : i32
    %c0_i32_0 = arith.constant 0 : i32
    return %c0_i32, %arg0 : i32, i32
  }
}

module attributes {stable_mosaic.version = 11 : i64} {
  func.func @_dcn_kernel(%arg0: i32, %arg1: memref<4x72x768xbf16, #tpu.memory_space<vmem>>, %arg2: memref<4x9x768xf32, #tpu.memory_space<vmem>>, %arg3: memref<8x72xf32, #tpu.memory_space<vmem>>, %arg4: memref<8x1xf32, #tpu.memory_space<vmem>>, %arg5: memref<8x768xf32, #tpu.memory_space<vmem>>) attributes {dimension_semantics = [#tpu.dimension_semantics<parallel>], iteration_bounds = array<i64: 2>, scalar_prefetch = 0 : i64, scratch_operands = 0 : i64, tpu.core_type = #tpu.core_type<tc>, window_params = [{transform_indices = @transform_0, window_bounds = array<i64: 4, 72, 768>}, {transform_indices = @transform_1, window_bounds = array<i64: 4, 9, 768>}, {pipeline_mode = #tpu.pipeline_mode<synchronous>, transform_indices = @transform_2, window_bounds = array<i64: 8, 72>}, {pipeline_mode = #tpu.pipeline_mode<synchronous>, transform_indices = @transform_3, window_bounds = array<i64: 8, 1>}, {transform_indices = @transform_4, window_bounds = array<i64: 8, 768>}]} {
    %c0 = arith.constant 0 : index
    %c0_0 = arith.constant 0 : index
    %0 = vector.load %arg3[%c0, %c0_0] : memref<8x72xf32, #tpu.memory_space<vmem>>, vector<8x72xf32>
    %cst = arith.constant 0.000000e+00 : f32
    %1 = vector.broadcast %cst : f32 to vector<8x768xf32>
    %c0_1 = arith.constant 0 : index
    %c0_2 = arith.constant 0 : index
    %c0_3 = arith.constant 0 : index
    %2 = vector.load %arg2[%c0_1, %c0_2, %c0_3] : memref<4x9x768xf32, #tpu.memory_space<vmem>>, vector<1x9x768xf32>
    %3 = vector.shape_cast %2 : vector<1x9x768xf32> to vector<9x768xf32>
    %4 = vector.shape_cast %3 : vector<9x768xf32> to vector<9x1x768xf32>
    %5 = vector.broadcast %4 : vector<9x1x768xf32> to vector<9x8x768xf32>
    %6 = vector.shape_cast %5 : vector<9x8x768xf32> to vector<72x768xf32>
    %c0_4 = arith.constant 0 : index
    %c0_5 = arith.constant 0 : index
    %c0_6 = arith.constant 0 : index
    %7 = vector.load %arg1[%c0_4, %c0_5, %c0_6] : memref<4x72x768xbf16, #tpu.memory_space<vmem>>, vector<1x72x768xbf16>
    %8 = vector.shape_cast %7 : vector<1x72x768xbf16> to vector<72x768xbf16>
    %9 = arith.extf %8 : vector<72x768xbf16> to vector<72x768xf32>
    %10 = arith.mulf %9, %6 : vector<72x768xf32>
    %cst_7 = arith.constant dense<0.000000e+00> : vector<8x768xf32>
    %11 = tpu.matmul %0, %10, %cst_7 {dimension_numbers = #tpu.dot_dimension_numbers<[1], [0], [0], [1], [0, 0, 1, 1], [], []>} : vector<8x72xf32>, vector<72x768xf32>, vector<8x768xf32> -> vector<8x768xf32>
    %12 = arith.addf %1, %11 : vector<8x768xf32>
    %c1 = arith.constant 1 : index
    %c0_8 = arith.constant 0 : index
    %c0_9 = arith.constant 0 : index
    %13 = vector.load %arg2[%c1, %c0_8, %c0_9] : memref<4x9x768xf32, #tpu.memory_space<vmem>>, vector<1x9x768xf32>
    %14 = vector.shape_cast %13 : vector<1x9x768xf32> to vector<9x768xf32>
    %15 = vector.shape_cast %14 : vector<9x768xf32> to vector<9x1x768xf32>
    %16 = vector.broadcast %15 : vector<9x1x768xf32> to vector<9x8x768xf32>
    %17 = vector.shape_cast %16 : vector<9x8x768xf32> to vector<72x768xf32>
    %c1_10 = arith.constant 1 : index
    %c0_11 = arith.constant 0 : index
    %c0_12 = arith.constant 0 : index
    %18 = vector.load %arg1[%c1_10, %c0_11, %c0_12] : memref<4x72x768xbf16, #tpu.memory_space<vmem>>, vector<1x72x768xbf16>
    %19 = vector.shape_cast %18 : vector<1x72x768xbf16> to vector<72x768xbf16>
    %20 = arith.extf %19 : vector<72x768xbf16> to vector<72x768xf32>
    %21 = arith.mulf %20, %17 : vector<72x768xf32>
    %cst_13 = arith.constant dense<0.000000e+00> : vector<8x768xf32>
    %22 = tpu.matmul %0, %21, %cst_13 {dimension_numbers = #tpu.dot_dimension_numbers<[1], [0], [0], [1], [0, 0, 1, 1], [], []>} : vector<8x72xf32>, vector<72x768xf32>, vector<8x768xf32> -> vector<8x768xf32>
    %23 = arith.addf %12, %22 : vector<8x768xf32>
    %c2 = arith.constant 2 : index
    %c0_14 = arith.constant 0 : index
    %c0_15 = arith.constant 0 : index
    %24 = vector.load %arg2[%c2, %c0_14, %c0_15] : memref<4x9x768xf32, #tpu.memory_space<vmem>>, vector<1x9x768xf32>
    %25 = vector.shape_cast %24 : vector<1x9x768xf32> to vector<9x768xf32>
    %26 = vector.shape_cast %25 : vector<9x768xf32> to vector<9x1x768xf32>
    %27 = vector.broadcast %26 : vector<9x1x768xf32> to vector<9x8x768xf32>
    %28 = vector.shape_cast %27 : vector<9x8x768xf32> to vector<72x768xf32>
    %c2_16 = arith.constant 2 : index
    %c0_17 = arith.constant 0 : index
    %c0_18 = arith.constant 0 : index
    %29 = vector.load %arg1[%c2_16, %c0_17, %c0_18] : memref<4x72x768xbf16, #tpu.memory_space<vmem>>, vector<1x72x768xbf16>
    %30 = vector.shape_cast %29 : vector<1x72x768xbf16> to vector<72x768xbf16>
    %31 = arith.extf %30 : vector<72x768xbf16> to vector<72x768xf32>
    %32 = arith.mulf %31, %28 : vector<72x768xf32>
    %cst_19 = arith.constant dense<0.000000e+00> : vector<8x768xf32>
    %33 = tpu.matmul %0, %32, %cst_19 {dimension_numbers = #tpu.dot_dimension_numbers<[1], [0], [0], [1], [0, 0, 1, 1], [], []>} : vector<8x72xf32>, vector<72x768xf32>, vector<8x768xf32> -> vector<8x768xf32>
    %34 = arith.addf %23, %33 : vector<8x768xf32>
    %c3 = arith.constant 3 : index
    %c0_20 = arith.constant 0 : index
    %c0_21 = arith.constant 0 : index
    %35 = vector.load %arg2[%c3, %c0_20, %c0_21] : memref<4x9x768xf32, #tpu.memory_space<vmem>>, vector<1x9x768xf32>
    %36 = vector.shape_cast %35 : vector<1x9x768xf32> to vector<9x768xf32>
    %37 = vector.shape_cast %36 : vector<9x768xf32> to vector<9x1x768xf32>
    %38 = vector.broadcast %37 : vector<9x1x768xf32> to vector<9x8x768xf32>
    %39 = vector.shape_cast %38 : vector<9x8x768xf32> to vector<72x768xf32>
    %c3_22 = arith.constant 3 : index
    %c0_23 = arith.constant 0 : index
    %c0_24 = arith.constant 0 : index
    %40 = vector.load %arg1[%c3_22, %c0_23, %c0_24] : memref<4x72x768xbf16, #tpu.memory_space<vmem>>, vector<1x72x768xbf16>
    %41 = vector.shape_cast %40 : vector<1x72x768xbf16> to vector<72x768xbf16>
    %42 = arith.extf %41 : vector<72x768xbf16> to vector<72x768xf32>
    %43 = arith.mulf %42, %39 : vector<72x768xf32>
    %cst_25 = arith.constant dense<0.000000e+00> : vector<8x768xf32>
    %44 = tpu.matmul %0, %43, %cst_25 {dimension_numbers = #tpu.dot_dimension_numbers<[1], [0], [0], [1], [0, 0, 1, 1], [], []>} : vector<8x72xf32>, vector<72x768xf32>, vector<8x768xf32> -> vector<8x768xf32>
    %45 = arith.addf %34, %44 : vector<8x768xf32>
    %c0_26 = arith.constant 0 : index
    %c0_27 = arith.constant 0 : index
    %46 = vector.load %arg4[%c0_26, %c0_27] : memref<8x1xf32, #tpu.memory_space<vmem>>, vector<8x1xf32>
    %47 = vector.broadcast %46 : vector<8x1xf32> to vector<8x768xf32>
    %48 = arith.addf %45, %47 : vector<8x768xf32>
    %c0_28 = arith.constant 0 : index
    %c0_29 = arith.constant 0 : index
    %49 = vector.load %arg5[%c0_28, %c0_29] : memref<8x768xf32, #tpu.memory_space<vmem>>, vector<8x768xf32>
    tpu.vector_store %arg5[%c0_28, %c0_29], %48 {strides = array<i32>} : memref<8x768xf32, #tpu.memory_space<vmem>>, vector<8x768xf32>,
    return
  }
  func.func @transform_0(%arg0: i32) -> (i32, i32, i32) {
    %c0_i32 = arith.constant 0 : i32
    %c0_i32_0 = arith.constant 0 : i32
    %c0_i32_1 = arith.constant 0 : i32
    return %c0_i32, %c0_i32_0, %arg0 : i32, i32, i32
  }
  func.func @transform_1(%arg0: i32) -> (i32, i32, i32) {
    %c0_i32 = arith.constant 0 : i32
    %c0_i32_0 = arith.constant 0 : i32
    %c0_i32_1 = arith.constant 0 : i32
    return %c0_i32, %c0_i32_0, %arg0 : i32, i32, i32
  }
  func.func @transform_2(%arg0: i32) -> (i32, i32) {
    %c0_i32 = arith.constant 0 : i32
    %c0_i32_0 = arith.constant 0 : i32
    %c0_i32_1 = arith.constant 0 : i32
    return %c0_i32, %c0_i32_0 : i32, i32
  }
  func.func @transform_3(%arg0: i32) -> (i32, i32) {
    %c0_i32 = arith.constant 0 : i32
    %c0_i32_0 = arith.constant 0 : i32
    %c0_i32_1 = arith.constant 0 : i32
    return %c0_i32, %c0_i32_0 : i32, i32
  }
  func.func @transform_4(%arg0: i32) -> (i32, i32) {
    %c0_i32 = arith.constant 0 : i32
    %c0_i32_0 = arith.constant 0 : i32
    return %c0_i32, %arg0 : i32, i32
  }
}

</mosaic_0001>

<bundles_post_ra>
// kernel: tile.21
= control target key start
LH: loop header
LB: loop body
LE: loop exit
PB: predicated region body
PF: predicated region fallthrough
CT: control target
= control target key end

     0   :  { %vm276_vm0 = vcmask 1043458   ;;  %vm281_vm1 = vcmask 1045508   ;;  %vm286_vm2 = vcmask 1047558   ;;  %vm288_vm3 = vcmask 523264   ;;  %s920_s9 = smov 3  ;;  %s928_s14 = smov 12  ;;  %s1314_s0 = inlined_call_operand.vmem [shape: f32[9,2,704], index: 0, kind: input, shape index: {}]   ;;  %s1315_s1 = inlined_call_operand.vmem [shape: f32[9,1408], index: 1, kind: output, shape index: {}]  }
   0x1   :  { %v770_v0 = vld [vmem:[%s1314_s0 + $0x5a] sm:$0x3]  ;;  %v771_v1 = vld [vmem:[%s1314_s0 + $0x58] sm:$0x3]  ;;  %v776_v2 = vld [vmem:[%s1314_s0 + $0x4e] sm:$0x3] }
   0x2   :  { %48 = vst [vmem:[#allocation0 + $0x168] sm:$0x3] %v770_v0  ;;  %53 = vst [vmem:[#allocation0 + $0x160] sm:$0x3] %v771_v1  ;;  %v777_v3 = vld [vmem:[%s1314_s0 + $0x4c] sm:$0x3] }
   0x3   :  { %78 = vst [vmem:[#allocation0 + $0x138] sm:$0x3] %v776_v2  ;;  %v782_v4 = vld [vmem:[%s1314_s0 + $0x42] sm:$0x3]  ;;  %v783_v5 = vld [vmem:[%s1314_s0 + $0x40] sm:$0x3] }
   0x4   :  { %83 = vst [vmem:[#allocation0 + $0x130] sm:$0x3] %v777_v3  ;;  %108 = vst [vmem:[#allocation0 + $0x108] sm:$0x3] %v782_v4  ;;  %v788_v6 = vld [vmem:[%s1314_s0 + $0x36] sm:$0x3] }
   0x5   :  { %113 = vst [vmem:[#allocation0 + $0x100] sm:$0x3] %v783_v5  ;;  %v789_v7 = vld [vmem:[%s1314_s0 + $0x34] sm:$0x3]  ;;  %v794_v8 = vld [vmem:[%s1314_s0 + $0x2a] sm:$0x3] }
   0x6   :  { %138 = vst [vmem:[#allocation0 + $0xd8] sm:$0x3] %v788_v6  ;;  %143 = vst [vmem:[#allocation0 + $0xd0] sm:$0x3] %v789_v7  ;;  %v795_v9 = vld [vmem:[%s1314_s0 + $0x28] sm:$0x3] }
   0x7   :  { %168 = vst [vmem:[#allocation0 + $0xa8] sm:$0x3] %v794_v8  ;;  %v800_v10 = vld [vmem:[%s1314_s0 + $0x1e] sm:$0x3]  ;;  %v801_v11 = vld [vmem:[%s1314_s0 + $0x1c] sm:$0x3] }
   0x8   :  { %173 = vst [vmem:[#allocation0 + $0xa0] sm:$0x3] %v795_v9  ;;  %198 = vst [vmem:[#allocation0 + $0x78] sm:$0x3] %v800_v10  ;;  %v806_v12 = vld [vmem:[%s1314_s0 + $0x12] sm:$0x3] }
   0x9   :  { %203 = vst [vmem:[#allocation0 + $0x70] sm:$0x3] %v801_v11  ;;  %v807_v13 = vld [vmem:[%s1314_s0 + $0x10] sm:$0x3]  ;;  %v812_v14 = vld [vmem:[%s1314_s0 + $0x6] sm:$0x3] }
   0xa   :  { %228 = vst [vmem:[#allocation0 + $0x48] sm:$0x3] %v806_v12  ;;  %233 = vst [vmem:[#allocation0 + $0x40] sm:$0x3] %v807_v13  ;;  %v813_v15 = vld [vmem:[%s1314_s0 + $0x4] sm:$0x3] }
   0xb   :  { %258 = vst [vmem:[#allocation0 + $0x18] sm:$0x3] %v812_v14  ;;  %263 = vst [vmem:[#allocation0 + $0x10] sm:$0x3] %v813_v15  ;;  %v763_v16 = vld [vmem:[%s1314_s0 + $0x68] sm:$0x3] }
   0xc   :  { %v764_v17 = vld [vmem:[%s1314_s0 + $0x66] sm:$0x3]  ;;  %s930_s15 = smov 48  ;;  %13 = vst [vmem:[#allocation0 + $0x1a0] sm:$0x3] %v763_v16  ;;  %s938_s20 = smov 192 }
   0xd   :  { %18 = vst [vmem:[#allocation0 + $0x198] sm:$0x3] %v764_v17  ;;  %v765_v18 = vld [vmem:[%s1314_s0 + $0x64] sm:$0x3]  ;;  %v766_v19 = vld [vmem:[%s1314_s0 + $0x62] sm:$0x3] }
   0xe   :  { %s403_s21 = smov 3  ;;  %23 = vst [vmem:[#allocation0 + $0x190] sm:$0x3] %v765_v18  ;;  %28 = vst [vmem:[#allocation0 + $0x188] sm:$0x3] %v766_v19  ;;  %s406_s26 = smov 12 }
   0xf   :  { %v767_v20 = vld [vmem:[%s1314_s0 + $0x60] sm:$0x3]  ;;  %v773_v21 = vld [vmem:[%s1314_s0 + $0x54] sm:$0x3]  ;;  %s411_s27 = smov 48  ;;  %s416_s3 = smov 192 }
  0x10   :  { %33 = vst [vmem:[#allocation0 + $0x180] sm:$0x3] %v767_v20  ;;  %63 = vst [vmem:[#allocation0 + $0x150] sm:$0x3] %v773_v21  ;;  %v775_v22 = vld [vmem:[%s1314_s0 + $0x50] sm:$0x3] }
  0x11   :  { %v779_v23 = vld [vmem:[%s1314_s0 + $0x48] sm:$0x3]  ;;  %73 = vst [vmem:[#allocation0 + $0x140] sm:$0x3] %v775_v22  ;;  %v781_v24 = vld [vmem:[%s1314_s0 + $0x44] sm:$0x3] }
  0x12   :  { %93 = vst [vmem:[#allocation0 + $0x120] sm:$0x3] %v779_v23  ;;  %v785_v25 = vld [vmem:[%s1314_s0 + $0x3c] sm:$0x3]  ;;  %103 = vst [vmem:[#allocation0 + $0x110] sm:$0x3] %v781_v24 }
  0x13   :  { %123 = vst [vmem:[#allocation0 + $0xf0] sm:$0x3] %v785_v25  ;;  %v787_v26 = vld [vmem:[%s1314_s0 + $0x38] sm:$0x3]  ;;  %v791_v27 = vld [vmem:[%s1314_s0 + $0x30] sm:$0x3] }
  0x14   :  { %v793_v28 = vld [vmem:[%s1314_s0 + $0x2c] sm:$0x3]  ;;  %v404_v29 = vld [vmem:[#allocation0 + $0x19] ss:$48 sm:%s403_s21]   ;;  %133 = vst [vmem:[#allocation0 + $0xe0] sm:$0x3] %v787_v26 }
  0x15   :  { %v407_v30 = vld [vmem:[#allocation0 + $0x19] ss:$48 sm:%s406_s26]   ;;  %153 = vst [vmem:[#allocation0 + $0xc0] sm:$0x3] %v791_v27  ;;  %163 = vst [vmem:[#allocation0 + $0xb0] sm:$0x3] %v793_v28 }
  0x16   :  { %v412_v31 = vld [vmem:[#allocation0 + $0x19] ss:$48 sm:%s411_s27]   ;;  %v386_v32 = vld [vmem:[#allocation0 + $0x11] ss:$48 sm:%s920_s9]   ;;  %v409_v35 = vsel %vm276_vm0, %v407_v30, %v404_v29  ;;  %v797_v40 = vld [vmem:[%s1314_s0 + $0x24] sm:$0x3] }
  0x17   :  { %v389_v33 = vld [vmem:[#allocation0 + $0x11] ss:$48 sm:%s928_s14]   ;;  %v414_v38 = vsel %vm281_vm1, %v412_v31, %v409_v35  ;;  %v417_v39 = vld [vmem:[#allocation0 + $0x19] ss:$48 sm:%s416_s3]   ;;  %183 = vst [vmem:[#allocation0 + $0x90] sm:$0x3] %v797_v40 }
  0x18   :  { %v394_v34 = vld [vmem:[#allocation0 + $0x11] ss:$48 sm:%s930_s15]   ;;  %v391_v36 = vsel %vm276_vm0, %v389_v33, %v386_v32  ;;  %v419_v42 = vsel %vm286_vm2, %v417_v39, %v414_v38  ;;  %v803_v44 = vld [vmem:[%s1314_s0 + $0x18] sm:$0x3]  ;;  %v805_v45 = vld [vmem:[%s1314_s0 + $0x14] sm:$0x3] }
  0x19   :  { %v399_v37 = vld [vmem:[#allocation0 + $0x11] ss:$48 sm:%s938_s20]   ;;  %v396_v41 = vsel %vm281_vm1, %v394_v34, %v391_v36  ;;  %213 = vst [vmem:[#allocation0 + $0x60] sm:$0x3] %v803_v44  ;;  %223 = vst [vmem:[#allocation0 + $0x50] sm:$0x3] %v805_v45 }
  0x1a   :  { %v799_v43 = vld [vmem:[%s1314_s0 + $0x20] sm:$0x3]  ;;  %v401_v46 = vsel %vm286_vm2, %v399_v37, %v396_v41  ;;  %v809_v47 = vld [vmem:[%s1314_s0 + $0xc] sm:$0x3]  ;;  %v811_v48 = vld [vmem:[%s1314_s0 + $0x8] sm:$0x3] }
  0x1b   :  { %193 = vst [vmem:[#allocation0 + $0x80] sm:$0x3] %v799_v43  ;;  %v268_v49 = vld [vmem:[%s1314_s0] sm:$0x3]  ;;  %v421_v50 = vsel %vm288_vm3, %v419_v42, %v401_v46  ;;  %243 = vst [vmem:[#allocation0 + $0x30] sm:$0x3] %v809_v47 }
  0x1c   :  { %253 = vst [vmem:[#allocation0 + $0x20] sm:$0x3] %v811_v48  ;;  %269 = vst [vmem:[#allocation0] sm:$0x3] %v268_v49  ;;  %s861_s28 = smov 64   ;;  %vm299_vm4 = vcmask 1044484  }
  0x1d   :  { %422 = vrot.lane.b32.xlu0 %v421_v50, %s861_s28  ;;  %v375_v51 = vld [vmem:[#allocation0 + $0x180] ss:$8 sm:$0xf]   ;;  %s487_s29 = smov 3  ;;  %s1000_s30 = smov 12  ;;  %vm435_vm5 = vcmask 1042433  }
  0x1e   :  { %vm440_vm6 = vcmask 1044483   ;;  %vm445_vm7 = vcmask 1046533   ;;  %vm449_vm8 = vcmask 1047559   ;;  %s495_s2 = smov 48  ;;  %s500_s3 = smov 192  ;;  %vm427_vm9 = vcmask 1048064  }
  0x1f   :  { %v488_v52 = vld [vmem:[#allocation0 + $0x181] ss:$-24 sm:%s487_s29]   ;;  %s1002_s4 = smov 6  ;;  %s1004_s5 = smov 24  ;;  %v377_v53 = vld [vmem:[#allocation0 + $0x19c] sm:$0x10]  }
  0x20   :  { %v762_v54 = vld [vmem:[%s1314_s0 + $0x6a] sm:$0x3]  ;;  %v505_v55 = vld [vmem:[#allocation0 + $0x1a1] sm:$0x1]   ;;  %s517_s8 = smov 96  ;;  %v379_v56 = vsel %vm299_vm4, %v377_v53, %v375_v51  ;;  %s1016_s16 = smov 3 }
  0x21   :  { %8 = vst [vmem:[#allocation0 + $0x1a8] sm:$0x3] %v762_v54  ;;  %v769_v57 = vld [vmem:[%s1314_s0 + $0x5c] sm:$0x3]  ;;  %v780_v58 = vld [vmem:[%s1314_s0 + $0x46] sm:$0x3] }
  0x22   :  { %832 = vst [vmem:[%s1315_s1 + $0x58] ss:$8 sm:$0xf] %v379_v56   ;;  %833 = vst [vmem:[%s1315_s1 + $0x74] sm:$0x10] %v379_v56   ;;  %s1065_s13 = smov 12 }
  0x23   :  { %43 = vst [vmem:[#allocation0 + $0x170] sm:$0x3] %v769_v57  ;;  %98 = vst [vmem:[#allocation0 + $0x118] sm:$0x3] %v780_v58  ;;  %v784_v59 = vld [vmem:[%s1314_s0 + $0x3e] sm:$0x3] }
  0x24   :  { %v786_v60 = vld [vmem:[%s1314_s0 + $0x3a] sm:$0x3]  ;;  %v790_v61 = vld [vmem:[%s1314_s0 + $0x32] sm:$0x3]  ;;  %118 = vst [vmem:[#allocation0 + $0xf8] sm:$0x3] %v784_v59 }
  0x25   :  { %128 = vst [vmem:[#allocation0 + $0xe8] sm:$0x3] %v786_v60  ;;  %148 = vst [vmem:[#allocation0 + $0xc8] sm:$0x3] %v790_v61  ;;  %v792_v62 = vld [vmem:[%s1314_s0 + $0x2e] sm:$0x3] }
  0x26   :  { %v796_v63 = vld [vmem:[%s1314_s0 + $0x26] sm:$0x3]  ;;  %v798_v0 = vld [vmem:[%s1314_s0 + $0x22] sm:$0x3]  ;;  %v491_v1 = vld [vmem:[#allocation0 - $0x5f] ss:$48 sm:%s1000_s30]  }
  0x27   :  { %v496_v2 = vld [vmem:[#allocation0 - $0x5f] ss:$48 sm:%s495_s2]   ;;  %158 = vst [vmem:[#allocation0 + $0xb8] sm:$0x3] %v792_v62  ;;  %178 = vst [vmem:[#allocation0 + $0x98] sm:$0x3] %v796_v63  ;;  %v493_v5 = vsel %vm276_vm0, %v491_v1, %v488_v52 }
  0x28   :  { %v501_v3 = vld [vmem:[#allocation0 - $0x5f] ss:$48 sm:%s500_s3]   ;;  %188 = vst [vmem:[#allocation0 + $0x88] sm:$0x3] %v798_v0  ;;  %v498_v9 = vsel %vm281_vm1, %v496_v2, %v493_v5  ;;  %v802_v11 = vld [vmem:[%s1314_s0 + $0x1a] sm:$0x3] }
  0x29   :  { %v522_v4 = vld [vmem:[#allocation0 + $0x13a] sm:$0x80]   ;;  %v804_v12 = vld [vmem:[%s1314_s0 + $0x16] sm:$0x3]  ;;  %v808_v13 = vld [vmem:[%s1314_s0 + $0xe] sm:$0x3]  ;;  %v503_v14 = vsel %vm286_vm2, %v501_v3, %v498_v9 }
  0x2a   :  { %v508_v6 = vld [vmem:[#allocation0 - $0xf] ss:$48 sm:%s1002_s4]   ;;  %208 = vst [vmem:[#allocation0 + $0x68] sm:$0x3] %v802_v11  ;;  %218 = vst [vmem:[#allocation0 + $0x58] sm:$0x3] %v804_v12 }
  0x2b   :  { %v513_v7 = vld [vmem:[#allocation0 - $0xf] ss:$48 sm:%s1004_s5]   ;;  %v510_v10 = vsel %vm435_vm5, %v508_v6, %v505_v55  ;;  %238 = vst [vmem:[#allocation0 + $0x38] sm:$0x3] %v808_v13  ;;  %v810_v16 = vld [vmem:[%s1314_s0 + $0xa] sm:$0x3] }
  0x2c   :  { %v518_v8 = vld [vmem:[#allocation0 - $0xf] ss:$48 sm:%s517_s8]   ;;  %v515_v15 = vsel %vm440_vm6, %v513_v7, %v510_v10  ;;  %v814_v17 = vld [vmem:[%s1314_s0 + $0x2] sm:$0x3]  ;;  %s1067_s9 = smov 48  ;;  %s1070_s14 = smov 192 }
  0x2d   :  { %v520_v18 = vsel %vm445_vm7, %v518_v8, %v515_v15  ;;  %248 = vst [vmem:[#allocation0 + $0x28] sm:$0x3] %v810_v16  ;;  %267 = vst [vmem:[#allocation0 + $0x8] sm:$0x3] %v814_v17  ;;  %s613_s15 = smov 3  ;;  %s1073_s17 = smov 12 }
  0x2e   :  { %v524_v19 = vsel %vm449_vm8, %v522_v4, %v520_v18  ;;  %s1075_s18 = smov 48  ;;  %v540_v20 = vld [vmem:[#allocation0 + $0x1a1] sm:$0x1]   ;;  %s1078_s19 = smov 192  ;;  %v772_v23 = vld [vmem:[%s1314_s0 + $0x56] sm:$0x3] }
  0x2f   :  { %v526_v21 = vsel %vm288_vm3, %v524_v19, %v503_v14  ;;  %s542_s20 = smov 6  ;;  %s547_s21 = smov 24  ;;  %58 = vst [vmem:[#allocation0 + $0x158] sm:$0x3] %v772_v23  ;;  %v557_v28 = vld [vmem:[#allocation0 + $0x11a] sm:$0x80]  }
  0x30   :  { %527 = vrot.lane.b32.xlu1 %v526_v21, %s861_s28  ;;  %v543_v22 = vld [vmem:[#allocation0 - $0xf] ss:$48 sm:%s542_s20]   ;;  %s552_s22 = smov 96  ;;  %s561_s25 = smov 3  ;;  %v778_v29 = vld [vmem:[%s1314_s0 + $0x4a] sm:$0x3] }
  0x31   :  { %v545_v24 = vsel %vm435_vm5, %v543_v22, %v540_v20  ;;  %v548_v25 = vld [vmem:[#allocation0 - $0xf] ss:$48 sm:%s547_s21]   ;;  %s564_s26 = smov 12  ;;  %s569_s27 = smov 48  ;;  %88 = vst [vmem:[#allocation0 + $0x128] sm:$0x3] %v778_v29 }
  0x32   :  { %v553_v26 = vld [vmem:[#allocation0 - $0xf] ss:$48 sm:%s552_s22]   ;;  %v550_v27 = vsel %vm440_vm6, %v548_v25, %v545_v24  ;;  %s574_s29 = smov 192  ;;  %v298_v33 = vld [vmem:[#allocation0 + $0x1c] sm:$0x10]   ;;  %s438_s2 = smov 24 }
  0x33   :  { %v596_v30 = vld [vmem:[#allocation0 + $0x189] ss:$-72 sm:%s1016_s16]   ;;  %v555_v37 = vsel %vm445_vm7, %v553_v26, %v550_v27  ;;  %s433_s16 = smov 6  ;;  %s443_s3 = smov 96  ;;  %v307_v7 = vld [vmem:[#allocation0 + $0x4c] sm:$0x10]  }
  0x34   :  { %v614_v31 = vld [vmem:[#allocation0 + $0x1a9] ss:$-56 sm:%s613_s15]   ;;  %v559_v51 = vsel %vm449_vm8, %v557_v28, %v555_v37  ;;  %v296_v54 = vld [vmem:[#allocation0] ss:$8 sm:$0xf]   ;;  %s454_s4 = smov 6 }
  0x35   :  { %v562_v32 = vld [vmem:[#allocation0 + $0x189] ss:$-56 sm:%s561_s25]   ;;  %v300_v60 = vsel %vm299_vm4, %v298_v33, %v296_v54  ;;  %s459_s5 = smov 24  ;;  %s464_s7 = smov 96  ;;  %v317_v15 = vld [vmem:[#allocation0 + $0x7c] sm:$0x10]  }
  0x36   :  { %v599_v34 = vld [vmem:[#allocation0 + $0x3e1] ss:$-328 sm:%s1065_s13]   ;;  %301 = vst [vmem:[%s1315_s1] ss:$8 sm:$0xf] %v300_v60   ;;  %817 = vst [vmem:[%s1315_s1 + $0x1c] sm:$0x10] %v300_v60  }
  0x37   :  { %v604_v35 = vld [vmem:[#allocation0 - $0x87] ss:$48 sm:%s1067_s9]   ;;  %v601_v39 = vsel %vm276_vm0, %v599_v34, %v596_v30  ;;  %v452_v43 = vld [vmem:[#allocation0 + $0x181] sm:$0x1]   ;;  %s1126_s13 = smov 6  ;;  %s657_s23 = smov 3 }
  0x38   :  { %v609_v36 = vld [vmem:[#allocation0 - $0x87] ss:$48 sm:%s1070_s14]   ;;  %v606_v44 = vsel %vm281_vm1, %v604_v35, %v601_v39  ;;  %v469_v59 = vld [vmem:[#allocation0 + $0x11a] sm:$0x80]   ;;  %v327_v19 = vld [vmem:[#allocation0 + $0xac] sm:$0x10]  }
  0x39   :  { %v431_v38 = vld [vmem:[#allocation0 + $0x199] sm:$0x1]   ;;  %v611_v49 = vsel %vm286_vm2, %v609_v36, %v606_v44  ;;  %v455_v1 = vld [vmem:[#allocation0 - $0x2f] ss:$48 sm:%s454_s4]   ;;  %v337_v23 = vld [vmem:[#allocation0 + $0xdc] sm:$0x10]  }
  0x3a   :  { %v617_v40 = vld [vmem:[#allocation0 - $0x37] ss:$48 sm:%s1073_s17]   ;;  %v457_v4 = vsel %vm435_vm5, %v455_v1, %v452_v43  ;;  %v460_v5 = vld [vmem:[#allocation0 - $0x2f] ss:$48 sm:%s459_s5]   ;;  %v347_v26 = vld [vmem:[#allocation0 + $0x10c] sm:$0x10]  }
  0x3b   :  { %v622_v41 = vld [vmem:[#allocation0 - $0x37] ss:$48 sm:%s1075_s18]   ;;  %v619_v45 = vsel %vm276_vm0, %v617_v40, %v614_v31  ;;  %v465_v6 = vld [vmem:[#allocation0 - $0x2f] ss:$48 sm:%s464_s7]   ;;  %v462_v9 = vsel %vm440_vm6, %v460_v5, %v457_v4  ;;  %s1136_s18 = smov 24  ;;  %s689_s25 = smov 3 }
  0x3c   :  { %v627_v42 = vld [vmem:[#allocation0 - $0x37] ss:$48 sm:%s1078_s19]   ;;  %v624_v50 = vsel %vm281_vm1, %v622_v41, %v619_v45  ;;  %v305_v10 = vld [vmem:[#allocation0 + $0x30] ss:$8 sm:$0xf]   ;;  %v467_v13 = vsel %vm445_vm7, %v465_v6, %v462_v9  ;;  %s279_s6 = smov 48 }
  0x3d   :  { %v565_v46 = vld [vmem:[#allocation0 - $0x57] ss:$48 sm:%s564_s26]   ;;  %v629_v55 = vsel %vm286_vm2, %v627_v42, %v624_v50  ;;  %v315_v11 = vld [vmem:[#allocation0 + $0x60] ss:$8 sm:$0xf]   ;;  %v309_v14 = vsel %vm299_vm4, %v307_v7, %v305_v10  ;;  %v471_v17 = vsel %vm449_vm8, %v469_v59, %v467_v13  ;;  %s697_s26 = smov 48 }
  0x3e   :  { %v570_v47 = vld [vmem:[#allocation0 - $0x57] ss:$48 sm:%s569_s27]   ;;  %v567_v52 = vsel %vm276_vm0, %v565_v46, %v562_v32  ;;  %v631_v61 = vsel %vm288_vm3, %v629_v55, %v611_v49  ;;  %v325_v16 = vld [vmem:[#allocation0 + $0x90] ss:$8 sm:$0xf]   ;;  %v319_v18 = vsel %vm299_vm4, %v317_v15, %v315_v11  ;;  %s271_s27 = smov 3 }
  0x3f   :  { %v575_v48 = vld [vmem:[#allocation0 - $0x57] ss:$48 sm:%s574_s29]   ;;  %v572_v56 = vsel %vm281_vm1, %v570_v47, %v567_v52  ;;  %632 = vrot.lane.b32.xlu0 %v631_v61, %s861_s28  ;;  %818 = vst [vmem:[%s1315_s1 + $0x1] ss:$8 sm:$0xf] %v309_v14   ;;  %v329_v22 = vsel %vm299_vm4, %v327_v19, %v325_v16  ;;  %s660_s29 = smov 12 }
  0x40   :  { %v448_v53 = vld [vmem:[#allocation0 + $0x132] sm:$0x80]   ;;  %v577_v62 = vsel %vm286_vm2, %v575_v48, %v572_v56  ;;  %819 = vst [vmem:[%s1315_s1 + $0x1d] sm:$0x10] %v309_v14   ;;  %821 = vst [vmem:[%s1315_s1 + $0x1e] sm:$0x10] %v319_v18  }
  0x41   :  { %v434_v57 = vld [vmem:[#allocation0 - $0x17] ss:$48 sm:%s433_s16]   ;;  %v579_v2 = vsel %vm288_vm3, %v577_v62, %v559_v51  ;;  %v335_v20 = vld [vmem:[#allocation0 + $0xc0] ss:$8 sm:$0xf]   ;;  %s284_s30 = smov 192 }
  0x42   :  { %v439_v58 = vld [vmem:[#allocation0 - $0x17] ss:$48 sm:%s438_s2]   ;;  %v436_v63 = vsel %vm435_vm5, %v434_v57, %v431_v38  ;;  %580 = vrot.lane.b32.xlu1 %v579_v2, %s861_s28  ;;  %820 = vst [vmem:[%s1315_s1 + $0x2] ss:$8 sm:$0xf] %v319_v18   ;;  %v339_v25 = vsel %vm299_vm4, %v337_v23, %v335_v20 }
  0x43   :  { %v444_v0 = vld [vmem:[#allocation0 - $0x17] ss:$48 sm:%s443_s3]   ;;  %v441_v3 = vsel %vm440_vm6, %v439_v58, %v436_v63  ;;  %v345_v24 = vld [vmem:[#allocation0 + $0xf0] ss:$8 sm:$0xf]   ;;  %s665_s3 = smov 48 }
  0x44   :  { %v446_v8 = vsel %vm445_vm7, %v444_v0, %v441_v3  ;;  %822 = vst [vmem:[%s1315_s1 + $0x3] ss:$8 sm:$0xf] %v329_v22   ;;  %823 = vst [vmem:[%s1315_s1 + $0x1f] sm:$0x10] %v329_v22   ;;  %v349_v28 = vsel %vm299_vm4, %v347_v26, %v345_v24 }
  0x45   :  { %v450_v12 = vsel %vm449_vm8, %v448_v53, %v446_v8  ;;  %v355_v27 = vld [vmem:[#allocation0 + $0x120] ss:$8 sm:$0xf]   ;;  %824 = vst [vmem:[%s1315_s1 + $0x4] ss:$8 sm:$0xf] %v339_v25  }
  0x46   :  { %v473_v21 = vsel %vm288_vm3, %v471_v17, %v450_v12  ;;  %825 = vst [vmem:[%s1315_s1 + $0x20] sm:$0x10] %v339_v25   ;;  %v357_v29 = vld [vmem:[#allocation0 + $0x13c] sm:$0x10]   ;;  %827 = vst [vmem:[%s1315_s1 + $0x21] sm:$0x10] %v349_v28  }
  0x47   :  { %474 = vrot.lane.b32.xlu0 %v473_v21, %s861_s28  ;;  %v365_v30 = vld [vmem:[#allocation0 + $0x150] ss:$8 sm:$0xf]   ;;  %826 = vst [vmem:[%s1315_s1 + $0x5] ss:$8 sm:$0xf] %v349_v28   ;;  %v359_v31 = vsel %vm299_vm4, %v357_v29, %v355_v27 }
  0x48   :  { %v367_v32 = vld [vmem:[#allocation0 + $0x16c] sm:$0x10]   ;;  %v645_v33 = vld [vmem:[#allocation0 + $0x171] sm:$0x1]   ;;  %829 = vst [vmem:[%s1315_s1 + $0x22] sm:$0x10] %v359_v31  }
  0x49   :  { %v648_v34 = vld [vmem:[#allocation0 + $0x229] ss:$-152 sm:%s1126_s13]   ;;  %828 = vst [vmem:[%s1315_s1 + $0x6] ss:$8 sm:$0xf] %v359_v31   ;;  %v369_v35 = vsel %vm299_vm4, %v367_v32, %v365_v30 }
  0x4a   :  { %v650_v36 = vsel %vm435_vm5, %v648_v34, %v645_v33  ;;  %v653_v37 = vld [vmem:[#allocation0 + $0x99] ss:$48 sm:%s1136_s18]   ;;  %830 = vst [vmem:[%s1315_s1 + $0x7] ss:$8 sm:$0xf] %v369_v35   ;;  %s670_s18 = smov 192 }
  0x4b   :  { %v658_v38 = vld [vmem:[#allocation0 + $0x191] ss:$-104 sm:%s657_s23]   ;;  %831 = vst [vmem:[%s1315_s1 + $0x23] sm:$0x10] %v369_v35   ;;  %v655_v40 = vsel %vm440_vm6, %v653_v37, %v650_v36  ;;  %v768_v43 = vld [vmem:[%s1314_s0 + $0x5e] sm:$0x3] }
  0x4c   :  { %v661_v39 = vld [vmem:[#allocation0 + $0x3e9] ss:$-328 sm:%s660_s29]   ;;  %38 = vst [vmem:[#allocation0 + $0x178] sm:$0x3] %v768_v43  ;;  %v774_v46 = vld [vmem:[%s1314_s0 + $0x52] sm:$0x3] }
  0x4d   :  { %v663_v41 = vsel %vm276_vm0, %v661_v39, %v658_v38  ;;  %v666_v42 = vld [vmem:[#allocation0 - $0x7f] ss:$48 sm:%s665_s3]   ;;  %68 = vst [vmem:[#allocation0 + $0x148] sm:$0x3] %v774_v46  ;;  %v292_v49 = vld [vmem:[#allocation0 + $0x1a8] sm:$0x1]  }
  0x4e   :  { %v668_v44 = vsel %vm281_vm1, %v666_v42, %v663_v41  ;;  %v671_v45 = vld [vmem:[#allocation0 - $0x7f] ss:$48 sm:%s670_s18]   ;;  %s692_s0 = smov 12  ;;  %816 = vst.msk [vmem:[%s1315_s1 + $0x80] sm:$0x1] %vm288_vm3, %v292_v49   ;;  %s274_s29 = smov 12 }
  0x4f   :  { %v673_v47 = vsel %vm286_vm2, %v671_v45, %v668_v44  ;;  %v693_v50 = vld [vmem:[#allocation0 + $0x2c9] ss:$-152 sm:%s692_s0]  }
  0x50   :  { %v675_v48 = vsel %vm288_vm3, %v673_v47, %v655_v40  ;;  %v698_v51 = vld [vmem:[#allocation0 + $0x71] ss:$48 sm:%s697_s26]  }
  0x51   :  { %676 = vrot.lane.b32.xlu1 %v675_v48, %s861_s28 }
  0x54   :  { %v690_v52 = vld [vmem:[#allocation0 + $0x149] ss:$48 sm:%s689_s25]   ;;  %v272_v53 = vld [vmem:[#allocation0 + $0x28] ss:$48 sm:%s271_s27]  }
  0x55   :  { %v275_v54 = vld [vmem:[#allocation0 + $0x28] ss:$48 sm:%s274_s29]   ;;  %v695_v55 = vsel %vm276_vm0, %v693_v50, %v690_v52 }
  0x56   :  { %v277_v56 = vsel %vm276_vm0, %v275_v54, %v272_v53  ;;  %v280_v57 = vld [vmem:[#allocation0 + $0x28] ss:$48 sm:%s279_s6]   ;;  %v700_v59 = vsel %vm281_vm1, %v698_v51, %v695_v55 }
  0x57   :  { %v285_v58 = vld [vmem:[#allocation0 + $0x28] ss:$48 sm:%s284_s30]   ;;  %v282_v60 = vsel %vm281_vm1, %v280_v57, %v277_v56  ;;  %701 = vrot.lane.b32.xlu0 %v700_v59, %s861_s28 }
  0x58   :  { %v287_v61 = vsel %vm286_vm2, %v285_v58, %v282_v60 }
  0x59   :  { %815 = vst.msk [vmem:[%s1315_s1 + $0x28] sm:$0xff] %vm288_vm3, %v287_v61  }
  0x8f   :  { %v423_v62 = vpop.permute.xlu0 %422  }
  0x90   :  { %834 = vst.msk [vmem:[%s1315_s1 + $0x40] sm:$0xff] %vm288_vm3, %v423_v62  }
  0x91   :  { %835 = vst.msk [vmem:[%s1315_s1 + $0x40] sm:$0xff] %vm427_vm9, %v423_v62  }
  0xa2   :  { %v528_v63 = vpop.permute.xlu1 %527  }
  0xa3   :  { %840 = vst.msk [vmem:[%s1315_s1 + $0x88] ss:$-57 sm:$0x3] %vm288_vm3, %v528_v63   ;;  %841 = vst.msk [vmem:[%s1315_s1 + $0x2e] sm:$0xfc] %vm288_vm3, %v528_v63  }
  0xb1   :  { %v633_v0 = vpop.permute.xlu0 %632  }
  0xb2   :  { %849 = vst.msk [vmem:[%s1315_s1 + $0x90] ss:$-58 sm:$0x3] %vm288_vm3, %v633_v0   ;;  %850 = vst.msk [vmem:[%s1315_s1 + $0x35] sm:$0xfc] %vm288_vm3, %v633_v0  }
  0xb4   :  { %v581_v1 = vpop.permute.xlu1 %580  }
  0xb5   :  { %844 = vst.msk [vmem:[%s1315_s1 + $0xa8] ss:$-88 sm:$0x3] %vm288_vm3, %v581_v1   ;;  %845 = vst.msk [vmem:[%s1315_s1 + $0x4f] sm:$0x7c] %vm288_vm3, %v581_v1  }
  0xb6   :  { %847 = vst.msk [vmem:[%s1315_s1 + $0x88] ss:$-89 sm:$0x3] %vm427_vm9, %v581_v1   ;;  %848 = vst.msk [vmem:[%s1315_s1 + $0x2e] sm:$0xfc] %vm427_vm9, %v581_v1  }
  0xb7   :  { %846 = vst.msk [vmem:[%s1315_s1 + $0x2f] sm:$0x80] %vm288_vm3, %v581_v1  }
  0xb8   :  { %851 = vst.msk [vmem:[%s1315_s1 + $0xa8] ss:$-89 sm:$0x3] %vm427_vm9, %v633_v0   ;;  %852 = vst.msk [vmem:[%s1315_s1 + $0x4e] sm:$0xfc] %vm427_vm9, %v633_v0  }
  0xb9   :  { %v475_v2 = vpop.permute.xlu0 %474  }
  0xba   :  { %836 = vst.msk [vmem:[%s1315_s1 + $0xa0] ss:$-88 sm:$0x3] %vm288_vm3, %v475_v2   ;;  %837 = vst.msk [vmem:[%s1315_s1 + $0x47] sm:$0xfc] %vm288_vm3, %v475_v2  }
  0xbb   :  { %838 = vst.msk [vmem:[%s1315_s1 + $0x80] ss:$-88 sm:$0x3] %vm427_vm9, %v475_v2   ;;  %839 = vst.msk [vmem:[%s1315_s1 + $0x27] sm:$0xfc] %vm427_vm9, %v475_v2  }
  0xbc   :  { %842 = vst.msk [vmem:[%s1315_s1 + $0xa0] ss:$-88 sm:$0x3] %vm427_vm9, %v528_v63   ;;  %843 = vst.msk [vmem:[%s1315_s1 + $0x47] sm:$0xfc] %vm427_vm9, %v528_v63  }
  0xc3   :  { %v677_v3 = vpop.permute.xlu1 %676  }
  0xc4   :  { %853 = vst.msk [vmem:[%s1315_s1 + $0x57] ss:$65 sm:$0x3] %vm288_vm3, %v677_v3   ;;  %854 = vst.msk [vmem:[%s1315_s1 + $0x3b] sm:$0x1c] %vm288_vm3, %v677_v3  }
  0xc5   :  { %855 = vst.msk [vmem:[%s1315_s1 + $0x90] ss:$-90 sm:$0x3] %vm427_vm9, %v677_v3   ;;  %856 = vst.msk [vmem:[%s1315_s1 + $0x35] sm:$0xfc] %vm427_vm9, %v677_v3  }
  0xc9   :  { %v702_v4 = vpop.permute.xlu0 %701  }
  0xca   :  { %857 = vst.msk [vmem:[%s1315_s1 + $0x56] sm:$0x3] %vm427_vm9, %v702_v4   ;;  %858 = vst.msk [vmem:[%s1315_s1 + $0x14e] ss:$-91 sm:$0xc] %vm427_vm9, %v702_v4  }
  0xcb   :  { %859 = vst.msk [vmem:[%s1315_s1 + $0x3a] sm:$0x30] %vm427_vm9, %v702_v4  }

// kernel: dcn_layer_illu_forward.2
= control target key start
LH: loop header
LB: loop body
LE: loop exit
PB: predicated region body
PF: predicated region fallthrough
CT: control target
= control target key end

     0   :  { %s959_s12 = smov 0   ;;  %s961_s13 = smov 0   ;;  %s1233_s0 = inlined_call_operand.vmem [shape: bf16[72,1536], index: 0, kind: input, shape index: {}]   ;;  %s1234_s1 = inlined_call_operand.vmem [shape: bf16[27,72], index: 1, kind: input, shape index: {}]   ;;  %s1235_s2 = inlined_call_operand.vmem [shape: f32[27,1], index: 2, kind: input, shape index: {}]   ;;  %s1236_s3 = inlined_call_operand.vmem [shape: f32[27,1536], index: 3, kind: output, shape index: {}]  }
   0x1   :  { %s963_s14 = smov 0  }
   0x2 LB: > { %s778_s15 = sadd.s32 4294967295, %s936_s14   ;;  %s976_s16 = sadd.s32 1, %s936_s14   ;;  %s936_s14 = sphi %s963_s14, %s1240_s14   ;;  %s932_s13 = sphi %s961_s13, %s1239_s13   ;;  %s928_s12 = sphi %s959_s12, %s1238_s12  }
   0x3   : > { %s17_s17 = ssub.s32 %s936_s14, %s976_s16  ;;  %s20_s18 = sadd.s32 1, %s932_s13 }
   0x4   : > { %p18_p0 = scmp.eq.s32.totalorder %s17_s17, 0  ;;  %p27_p1 = scmp.ne.s32.totalorder %s932_s13, %s928_s12 }
   0x5   : > { %p28_p2 = scmp.eq.s32.totalorder %s936_s14, 0  ;;  %p99_p3 = scmp.eq.s32.totalorder %s778_s15, 1 }
   0x6   : > { %s987_s19 = scalar_select %p18_p0, %s932_s13, %s20_s18  }
   0x7   : > { %p29_p4 = por %p28_p2, %p27_p1  ;;  %p989_p5 = por %p99_p3, %p27_p1 }
   0x8   : > { %p781_p6 = scmp.ge.s32.totalorder %s936_s14, 2 }
   0xa   : > { %127 = sbr.rel (%p781_p6) target bundleno = 36 (0x24), region = 24 }
  0x11   : > { %130 = sbr.rel (!%p29_p4) target bundleno = 36 (0x24), region = 28  ;;  %s132_s21 = sand.u32 (%p29_p4), 1, %s932_s13  }
  0x12   : > { %s828_s22 = smul.u32 (%p29_p4), 24, %s936_s14 }
  0x13   : > { %s840_s23 = smul.u32 (%p29_p4), 216, %s132_s21 }
  0x14   : > { %s999_s26 = scalar_lea.vmem (%p29_p4), %s1233_s0, %s828_s22 }
  0x15   : > { %v150_v0 = vld [vmem:[%s999_s26] sm:$0xff] (%p29_p4)  ;;  %v152_v1 = vld [vmem:[%s999_s26 + $0x8] sm:$0xff] (%p29_p4)  ;;  %v154_v2 = vld [vmem:[%s999_s26 + $0x10] sm:$0xff] (%p29_p4)  ;;  %s1004_s27 = scalar_lea.vmem (%p29_p4), [#allocation2], %s840_s23 }
  0x16   : > { %151 = vst [vmem:[%s1004_s27] sm:$0xff] (%p29_p4), %v150_v0  ;;  %153 = vst [vmem:[%s1004_s27 + $0x8] sm:$0xff] (%p29_p4), %v152_v1  ;;  %v156_v3 = vld [vmem:[%s999_s26 + $0x30] sm:$0xff] (%p29_p4)  ;;  %v158_v4 = vld [vmem:[%s999_s26 + $0x38] sm:$0xff] (%p29_p4) }
  0x17   : > { %155 = vst [vmem:[%s1004_s27 + $0x10] sm:$0xff] (%p29_p4), %v154_v2  ;;  %v160_v5 = vld [vmem:[%s999_s26 + $0x40] sm:$0xff] (%p29_p4)  ;;  %157 = vst [vmem:[%s1004_s27 + $0x18] sm:$0xff] (%p29_p4), %v156_v3  ;;  %v164_v7 = vld [vmem:[%s999_s26 + $0x68] sm:$0xff] (%p29_p4) }
  0x18   : > { %159 = vst [vmem:[%s1004_s27 + $0x20] sm:$0xff] %v158_v4  ;;  %161 = vst [vmem:[%s1004_s27 + $0x28] sm:$0xff] %v160_v5  ;;  %v162_v6 = vld [vmem:[%s999_s26 + $0x60] sm:$0xff]  ;;  %v166_v8 = vld [vmem:[%s999_s26 + $0x70] sm:$0xff] }
  0x19   : > { %163 = vst [vmem:[%s1004_s27 + $0x30] sm:$0xff] %v162_v6  ;;  %165 = vst [vmem:[%s1004_s27 + $0x38] sm:$0xff] %v164_v7  ;;  %v168_v9 = vld [vmem:[%s999_s26 + $0x90] sm:$0xff]  ;;  %v170_v10 = vld [vmem:[%s999_s26 + $0x98] sm:$0xff] }
  0x1a   : > { %167 = vst [vmem:[%s1004_s27 + $0x40] sm:$0xff] %v166_v8  ;;  %v172_v11 = vld [vmem:[%s999_s26 + $0xa0] sm:$0xff]  ;;  %169 = vst [vmem:[%s1004_s27 + $0x48] sm:$0xff] %v168_v9  ;;  %v176_v13 = vld [vmem:[%s999_s26 + $0xc8] sm:$0xff] }
  0x1b   : > { %171 = vst [vmem:[%s1004_s27 + $0x50] sm:$0xff] %v170_v10  ;;  %173 = vst [vmem:[%s1004_s27 + $0x58] sm:$0xff] %v172_v11  ;;  %v174_v12 = vld [vmem:[%s999_s26 + $0xc0] sm:$0xff]  ;;  %v178_v14 = vld [vmem:[%s999_s26 + $0xd0] sm:$0xff] }
  0x1c   : > { %175 = vst [vmem:[%s1004_s27 + $0x60] sm:$0xff] %v174_v12  ;;  %177 = vst [vmem:[%s1004_s27 + $0x68] sm:$0xff] %v176_v13  ;;  %v180_v15 = vld [vmem:[%s999_s26 + $0xf0] sm:$0xff]  ;;  %v182_v16 = vld [vmem:[%s999_s26 + $0xf8] sm:$0xff] }
  0x1d   : > { %179 = vst [vmem:[%s1004_s27 + $0x70] sm:$0xff] %v178_v14  ;;  %v184_v17 = vld [vmem:[%s999_s26 + $0x100] sm:$0xff]  ;;  %181 = vst [vmem:[%s1004_s27 + $0x78] sm:$0xff] %v180_v15  ;;  %v188_v19 = vld [vmem:[%s999_s26 + $0x128] sm:$0xff] }
  0x1e   : > { %183 = vst [vmem:[%s1004_s27 + $0x80] sm:$0xff] %v182_v16  ;;  %185 = vst [vmem:[%s1004_s27 + $0x88] sm:$0xff] %v184_v17  ;;  %v186_v18 = vld [vmem:[%s999_s26 + $0x120] sm:$0xff]  ;;  %v190_v20 = vld [vmem:[%s999_s26 + $0x130] sm:$0xff] }
  0x1f   : > { %187 = vst [vmem:[%s1004_s27 + $0x90] sm:$0xff] %v186_v18  ;;  %189 = vst [vmem:[%s1004_s27 + $0x98] sm:$0xff] %v188_v19  ;;  %v192_v21 = vld [vmem:[%s999_s26 + $0x150] sm:$0xff]  ;;  %v194_v22 = vld [vmem:[%s999_s26 + $0x158] sm:$0xff] }
  0x20   : > { %191 = vst [vmem:[%s1004_s27 + $0xa0] sm:$0xff] %v190_v20  ;;  %v196_v23 = vld [vmem:[%s999_s26 + $0x160] sm:$0xff]  ;;  %193 = vst [vmem:[%s1004_s27 + $0xa8] sm:$0xff] %v192_v21  ;;  %v200_v25 = vld [vmem:[%s999_s26 + $0x188] sm:$0xff] }
  0x21   : > { %195 = vst [vmem:[%s1004_s27 + $0xb0] sm:$0xff] %v194_v22  ;;  %197 = vst [vmem:[%s1004_s27 + $0xb8] sm:$0xff] %v196_v23  ;;  %v198_v24 = vld [vmem:[%s999_s26 + $0x180] sm:$0xff]  ;;  %v202_v26 = vld [vmem:[%s999_s26 + $0x190] sm:$0xff] }
  0x22   : > { %199 = vst [vmem:[%s1004_s27 + $0xc0] sm:$0xff] %v198_v24  ;;  %201 = vst [vmem:[%s1004_s27 + $0xc8] sm:$0xff] %v200_v25 }
  0x23   : > { %203 = vst [vmem:[%s1004_s27 + $0xd0] sm:$0xff] %v202_v26 }
  0x24 PF: > { %p783_p7 = scmp.ge.s32.totalorder %s936_s14, 1  ;;  %p208_p8 = scmp.lt.s32.totalorder %s936_s14, 3 }
  0x26   : > { %p209_p9 = pnand %p783_p7, %p208_p8 }
  0x27   : > { %s215_s28 = sand.u32 (!%p209_p9), 1, %s928_s12   ;;  %v938_v27 = vmov (!%p209_p9), 0   ;;  %v271_v28 = vld [vmem:[%s1235_s2] sm:$0xff] (!%p209_p9)  ;;  %v272_v29 = vld [vmem:[%s1235_s2 + $0x8] sm:$0xff] (!%p209_p9)  ;;  %v273_v30 = vld [vmem:[%s1235_s2 + $0x10] sm:$0xff] (!%p209_p9)  ;;  %vm447_vm0 = vcmask (!%p209_p9), 1043456  }
  0x28   : > { %212 = sbr.rel (%p209_p9) target bundleno = 313 (0x139), region = 51  ;;  %498 = vmatprep.mubr.bf16.mxu0 (!%p209_p9), %v938_v27  ;;  %551 = vmatprep.mubr.bf16.mxu1 (!%p209_p9), %v938_v27  ;;  %v274_v32 = vld [vmem:[%s1235_s2 + $0x18] sm:$0x7] (!%p209_p9)  ;;  %v898_v57 = vld [vmem:[%s1234_s1] sm:$0xff] (!%p209_p9)   ;;  %vm440_vm1 = vcmask (!%p209_p9), 588800  }
  0x29   : > { %s841_s29 = smul.u32 (!%p209_p9), 216, %s215_s28  ;;  %868 = vset.pattern.permute.xlu0 (!%p209_p9), %v938_v27  ;;  %869 = vset.pattern.permute.xlu1 (!%p209_p9), %v938_v27  ;;  %v908_v62 = vld [vmem:[%s1234_s1 + $0x8] sm:$0x3f] (!%p209_p9)  }
  0x2a   : > { %277 = vperm.xlu0 (!%p209_p9), %868, %v271_v28   ;;  %287 = vperm.xlu1 (!%p209_p9), %869, %v273_v30   ;;  %s842_s23 = smul.u32 (!%p209_p9), 192, %s215_s28 }
  0x2b   : > { %s1075_s9 = scalar_lea.vmem (!%p209_p9), [#allocation2], %s841_s29 }
  0x2c   : > { %v870_v31 = vld [vmem:[%s1075_s9 + $0x4] ss:$24 sps:$4 sm:$0xff] (!%p209_p9)   ;;  %v874_v34 = vld [vmem:[%s1075_s9] ss:$24 sps:$4 sm:$0xff] (!%p209_p9)   ;;  %v876_v36 = vld [vmem:[%s1075_s9 + $0x34] ss:$24 sps:$4 sm:$0xff] (!%p209_p9)  }
  0x2d   : > { %v872_v33 = vld [vmem:[%s1075_s9 + $0xc] ss:$24 sps:$4 sm:$0xff] (!%p209_p9)   ;;  %466 = vmatprep.subr.bf16.mxu0 (!%p209_p9), %v870_v31  ;;  %v875_v35 = vld [vmem:[%s1075_s9 + $0x8] ss:$24 sps:$4 sm:$0xff] (!%p209_p9)   ;;  %v878_v37 = vld [vmem:[%s1075_s9 + $0x3c] ss:$24 sps:$4 sm:$0xff] (!%p209_p9)  }
  0x2e   : > { %519 = vmatprep.subr.bf16.mxu1 (!%p209_p9), %v872_v33  ;;  %282 = vperm.xlu0 (!%p209_p9), %868, %v272_v29   ;;  %v880_v38 = vld [vmem:[%s1075_s9 + $0x30] ss:$24 sps:$4 sm:$0xff] (!%p209_p9)   ;;  %v882_v40 = vld [vmem:[%s1075_s9 + $0x64] ss:$24 sps:$4 sm:$0xff] (!%p209_p9)   ;;  %v886_v42 = vld [vmem:[%s1075_s9 + $0x60] ss:$24 sps:$4 sm:$0xff] (!%p209_p9)  }
  0x2f   : > { %467 = vmatpush1.bf16.msra.mxu0 %v874_v34  ;;  %520 = vmatpush1.bf16.msra.mxu1 %v875_v35  ;;  %v881_v39 = vld [vmem:[%s1075_s9 + $0x38] ss:$24 sps:$4 sm:$0xff]   ;;  %v884_v41 = vld [vmem:[%s1075_s9 + $0x6c] ss:$24 sps:$4 sm:$0xff]   ;;  %v887_v43 = vld [vmem:[%s1075_s9 + $0x68] ss:$24 sps:$4 sm:$0xff]  }
  0x30   : > { %468 = vmatprep.subr.bf16.mxu0 %v876_v36  ;;  %292 = vperm.xlu1 %869, %v274_v32   ;;  %v888_v44 = vld [vmem:[%s1075_s9 + $0x94] ss:$24 sps:$4 sm:$0xff]   ;;  %v268_v46 = vld [vmem:[%s1075_s9 + $0xc0] sm:$0xff]  ;;  %v892_v48 = vld [vmem:[%s1075_s9 + $0x90] ss:$24 sps:$4 sm:$0xff]   ;;  %s1134_s24 = scalar_lea.vmem [#allocation3], %s842_s23 }
  0x31   : > { %521 = vmatprep.subr.bf16.mxu1 %v878_v37  ;;  %v890_v45 = vld [vmem:[%s1075_s9 + $0x9c] ss:$24 sps:$4 sm:$0xff]   ;;  %v269_v47 = vld [vmem:[%s1075_s9 + $0xc8] sm:$0xff]  ;;  %v893_v49 = vld [vmem:[%s1075_s9 + $0x98] ss:$24 sps:$4 sm:$0xff]   ;;  %v811_v50 = vcombine.high %v268_v46, %v268_v46  ;;  %v810_v52 = vcombine.low %v268_v46, %v268_v46  ;;  %s829_s12 = smul.u32 (%p989_p5), 48, %s778_s15 }
  0x32   : > { %v813_v51 = vcombine.high %v269_v47, %v269_v47  ;;  %v812_v53 = vcombine.low %v269_v47, %v269_v47  ;;  %v901_v56 = vld [vmem:[%s1075_s9 + $0x14] ss:$24 sps:$4 sm:$0xff]   ;;  %v899_v58 = vld [vmem:[%s1075_s9 + $0x10] ss:$24 sps:$4 sm:$0xff]   ;;  %v904_v59 = vld [vmem:[%s1075_s9 + $0x44] ss:$24 sps:$4 sm:$0xff]  }
  0x33   : > { %469 = vmatpush1.bf16.msra.mxu0 %v880_v38  ;;  %522 = vmatpush1.bf16.msra.mxu1 %v881_v39  ;;  %v449_v54 = vsel %vm447_vm0, %v810_v52, 0  ;;  %v902_v60 = vld [vmem:[%s1075_s9 + $0x40] ss:$24 sps:$4 sm:$0xff]   ;;  %v907_v61 = vld [vmem:[%s1075_s9 + $0x74] ss:$24 sps:$4 sm:$0xff]   ;;  %s1179_s25 = scalar_lea.vmem (%p989_p5), %s1236_s3, %s829_s12 }
  0x34   : > { %470 = vmatprep.subr.bf16.mxu0 %v882_v40  ;;  %523 = vmatprep.subr.bf16.mxu1 %v884_v41  ;;  %v455_v55 = vsel %vm447_vm0, %v812_v53, 0  ;;  %v905_v63 = vld [vmem:[%s1075_s9 + $0x70] ss:$24 sps:$4 sm:$0xff]   ;;  %v911_v0 = vld [vmem:[%s1075_s9 + $0xa4] ss:$24 sps:$4 sm:$0xff]  }
  0x35   : > { %v270_v1 = vld [vmem:[%s1075_s9 + $0xd0] sm:$0xff]  ;;  %v909_v2 = vld [vmem:[%s1075_s9 + $0xa0] ss:$24 sps:$4 sm:$0xff]  }
  0x36   : > { %v815_v3 = vcombine.high %v270_v1, %v270_v1  ;;  %v814_v4 = vcombine.low %v270_v1, %v270_v1 }
  0x37   : > { %471 = vmatpush1.bf16.msra.mxu0 %v886_v42  ;;  %524 = vmatpush1.bf16.msra.mxu1 %v887_v43 }
  0x38   : > { %472 = vmatprep.subr.bf16.mxu0 %v888_v44  ;;  %525 = vmatprep.subr.bf16.mxu1 %v890_v45  ;;  %v461_v5 = vsel %vm447_vm0, %v814_v4, 0 }
  0x3b   : > { %473 = vmatpush1.bf16.msra.mxu0 %v892_v48  ;;  %526 = vmatpush1.bf16.msra.mxu1 %v893_v49 }
  0x3c   : > { %816 = vmatprep.subr.msk.bf16.mxu0 %vm447_vm0, %v811_v50  ;;  %819 = vmatprep.subr.msk.bf16.mxu1 %vm447_vm0, %v813_v51 }
  0x3f   : > { %475 = vmatpush1.bf16.msra.mxu0 %v449_v54  ;;  %528 = vmatpush1.bf16.msra.mxu1 %v455_v55 }
  0x40   : > { %572 = vmatprep.subr.bf16.mxu0 %v901_v56  ;;  %830 = vmatprep.subr.bf16.mxu1 %v901_v56 }
  0x42   : > { %817 = vmatmul.mubr.msk.bf16.vlgmr.msra.gmra.mrb[0].mxu0 %vm440_vm1, %v898_v57  ;;  %820 = vmatmul.mubr.msk.bf16.vlgmr.msra.gmra.mrb[0].mxu1 %vm440_vm1, %v898_v57 }
  0x43   : > { %573 = vmatpush1.bf16.msra.mxu0 %v899_v58  ;;  %835 = vmatpush1.bf16.msra.mxu1 %v899_v58 }
  0x44   : > { %574 = vmatprep.subr.bf16.mxu0 %v904_v59  ;;  %831 = vmatprep.subr.bf16.mxu1 %v904_v59 }
  0x45   : > { %508 = vmatprep.mubr.bf16.mxu0 %v938_v27  ;;  %561 = vmatprep.mubr.bf16.mxu1 %v938_v27 }
  0x47   : > { %575 = vmatpush1.bf16.msra.mxu0 %v902_v60  ;;  %836 = vmatpush1.bf16.msra.mxu1 %v902_v60 }
  0x48   : > { %576 = vmatprep.subr.bf16.mxu0 %v907_v61  ;;  %832 = vmatprep.subr.bf16.mxu1 %v907_v61 }
  0x4a   : > { %818 = vmatmul.mubr.msk.bf16.gmra.mrb[4].mxu0 %vm440_vm1, %v908_v62  ;;  %821 = vmatmul.mubr.msk.bf16.gmra.mrb[4].mxu1 %vm440_vm1, %v908_v62 }
  0x4b   : > { %577 = vmatpush1.bf16.msra.mxu0 %v905_v63  ;;  %837 = vmatpush1.bf16.msra.mxu1 %v905_v63 }
  0x4c   : > { %578 = vmatprep.subr.bf16.mxu0 %v911_v0  ;;  %833 = vmatprep.subr.bf16.mxu1 %v911_v0 }
  0x4d   : > { %604 = vmatprep.mubr.bf16.mxu0 %v938_v27  ;;  %614 = vmatprep.mubr.bf16.mxu1 %v938_v27 }
  0x4f   : > { %579 = vmatpush1.bf16.msra.mxu0 %v909_v2  ;;  %838 = vmatpush1.bf16.msra.mxu1 %v909_v2 }
  0x50   : > { %822 = vmatprep.subr.msk.bf16.mxu0 %vm447_vm0, %v815_v3  ;;  %834 = vmatprep.subr.msk.bf16.mxu1 %vm447_vm0, %v815_v3 }
  0x53   : > { %581 = vmatpush1.bf16.msra.mxu0 %v461_v5  ;;  %839 = vmatpush1.bf16.msra.mxu1 %v461_v5 }
  0x56   : > { %823 = vmatmul.mubr.msk.bf16.vlgmr.msra.gmra.mrb[8].mxu0 %vm440_vm1, %v898_v57  ;;  %824 = vmatmul.mubr.msk.bf16.vlgmr.msra.gmra.mrb[8].mxu1 %vm440_vm1, %v908_v62 }
  0xa9   : > { %v278_v6 = vpop.permute.xlu0 %277  ;;  %v288_v8 = vpop.permute.xlu1 %287 }
  0xad   : > { %v1132_v7 = vpop.permute.xlu0 %282 }
  0xaf   : > { %v293_v25 = vpop.permute.xlu1 %292 }
 0x115   : > { %v500_v9 = vpop.f32.mrb[0].mxu0  ;;  %v553_v10 = vpop.f32.mrb[0].mxu1 }
 0x116   : > { %v501_v11 = vadd.f32 %v500_v9, %v278_v6  ;;  %v554_v12 = vadd.f32 %v553_v10, %v278_v6  ;;  %v502_v13 = vpop.f32.mrb[1].mxu0  ;;  %v555_v14 = vpop.f32.mrb[1].mxu1 }
 0x117   : > { %v503_v15 = vadd.f32 %v502_v13, %v278_v6  ;;  %v556_v16 = vadd.f32 %v555_v14, %v278_v6  ;;  %v504_v17 = vpop.f32.mrb[2].mxu0  ;;  %v557_v18 = vpop.f32.mrb[2].mxu1 }
 0x118   : > { %625 = vst [vmem:[%s1134_s24] sm:$0xff] %v501_v11  ;;  %627 = vst [vmem:[%s1134_s24 + $0x10] sm:$0xff] %v554_v12  ;;  %v505_v19 = vadd.f32 %v504_v17, %v1132_v7  ;;  %v558_v20 = vadd.f32 %v557_v18, %v1132_v7  ;;  %v506_v21 = vpop.f32.mrb[3].mxu0  ;;  %v559_v22 = vpop.f32.mrb[3].mxu1 }
 0x119   : > { %626 = vst [vmem:[%s1134_s24 + $0x8] sm:$0xff] %v503_v15  ;;  %628 = vst [vmem:[%s1134_s24 + $0x18] sm:$0xff] %v556_v16  ;;  %v507_v23 = vadd.f32 %v506_v21, %v1132_v7  ;;  %v560_v24 = vadd.f32 %v559_v22, %v1132_v7 }
 0x11a   : > { %631 = vst [vmem:[%s1134_s24 + $0x30] sm:$0xff] %v505_v19  ;;  %633 = vst [vmem:[%s1134_s24 + $0x40] sm:$0xff] %v558_v20 }
 0x11b   : > { %632 = vst [vmem:[%s1134_s24 + $0x38] sm:$0xff] %v507_v23  ;;  %634 = vst [vmem:[%s1134_s24 + $0x48] sm:$0xff] %v560_v24 }
 0x11d   : > { %v510_v26 = vpop.f32.mrb[4].mxu0  ;;  %v563_v27 = vpop.f32.mrb[4].mxu1 }
 0x11e   : > { %v511_v28 = vadd.f32 %v510_v26, %v288_v8  ;;  %v564_v29 = vadd.f32 %v563_v27, %v288_v8  ;;  %v512_v30 = vpop.f32.mrb[5].mxu0  ;;  %v565_v31 = vpop.f32.mrb[5].mxu1 }
 0x11f   : > { %v513_v32 = vadd.f32 %v512_v30, %v288_v8  ;;  %v566_v33 = vadd.f32 %v565_v31, %v288_v8  ;;  %v514_v34 = vpop.f32.mrb[6].mxu0  ;;  %v567_v35 = vpop.f32.mrb[6].mxu1  ;;  %v671_v58 = vld [vmem:[%s1134_s24] sm:$0xff] (%p989_p5)  ;;  %v675_v60 = vld [vmem:[%s1134_s24 + $0x10] sm:$0xff] (%p989_p5) }
 0x120   : > { %637 = vst [vmem:[%s1134_s24 + $0x60] sm:$0xff] %v511_v28  ;;  %639 = vst [vmem:[%s1134_s24 + $0x70] sm:$0xff] %v564_v29  ;;  %v515_v36 = vadd.f32 %v514_v34, %v293_v25  ;;  %v568_v37 = vadd.f32 %v567_v35, %v293_v25  ;;  %v516_v38 = vpop.f32.mrb[7].mxu0  ;;  %v569_v39 = vpop.f32.mrb[7].mxu1  ;;  %v673_v59 = vld [vmem:[%s1134_s24 + $0x8] sm:$0xff] (%p989_p5)  ;;  %v677_v61 = vld [vmem:[%s1134_s24 + $0x18] sm:$0xff] (%p989_p5) }
 0x121   : > { %638 = vst [vmem:[%s1134_s24 + $0x68] sm:$0xff] %v513_v32  ;;  %640 = vst [vmem:[%s1134_s24 + $0x78] sm:$0xff] %v566_v33  ;;  %v517_v40 = vadd.f32 %v516_v38, %v293_v25  ;;  %v570_v41 = vadd.f32 %v569_v39, %v293_v25  ;;  %v683_v0 = vld [vmem:[%s1134_s24 + $0x30] sm:$0xff] (%p989_p5)  ;;  %v687_v2 = vld [vmem:[%s1134_s24 + $0x40] sm:$0xff] (%p989_p5) }
 0x122   : > { %643 = vst [vmem:[%s1134_s24 + $0x90] sm:$0x7] %v515_v36  ;;  %645 = vst [vmem:[%s1134_s24 + $0xa0] sm:$0x7] %v568_v37  ;;  %v685_v1 = vld [vmem:[%s1134_s24 + $0x38] sm:$0xff] (%p989_p5)  ;;  %v689_v3 = vld [vmem:[%s1134_s24 + $0x48] sm:$0xff] (%p989_p5) }
 0x123   : > { %644 = vst [vmem:[%s1134_s24 + $0x98] sm:$0x7] %v517_v40  ;;  %646 = vst [vmem:[%s1134_s24 + $0xa8] sm:$0x7] %v570_v41 }
 0x124   : > { %672 = vst [vmem:[%s1179_s25] sm:$0xff] (%p989_p5), %v671_v58  ;;  %674 = vst [vmem:[%s1179_s25 + $0x8] sm:$0xff] (%p989_p5), %v673_v59 }
 0x125   : > { %676 = vst [vmem:[%s1179_s25 + $0x10] sm:$0xff] (%p989_p5), %v675_v60  ;;  %678 = vst [vmem:[%s1179_s25 + $0x18] sm:$0xff] (%p989_p5), %v677_v61 }
 0x126   : > { %684 = vst [vmem:[%s1179_s25 + $0x60] sm:$0xff] (%p989_p5), %v683_v0  ;;  %686 = vst [vmem:[%s1179_s25 + $0x68] sm:$0xff] (%p989_p5), %v685_v1 }
 0x127   : > { %688 = vst [vmem:[%s1179_s25 + $0x70] sm:$0xff] (%p989_p5), %v687_v2  ;;  %690 = vst [vmem:[%s1179_s25 + $0x78] sm:$0xff] (%p989_p5), %v689_v3 }
 0x128   : > { %v701_v9 = vld [vmem:[%s1134_s24 + $0x78] sm:$0xff] (%p989_p5) }
 0x129   : > { %v606_v42 = vpop.f32.mrb[8].mxu0  ;;  %v616_v43 = vpop.f32.mrb[8].mxu1  ;;  %655 = sbr.rel (!%p989_p5) target bundleno = 313 (0x139), region = 59  ;;  %702 = vst [vmem:[%s1179_s25 + $0xd8] sm:$0xff] (%p989_p5), %v701_v9  ;;  %v707_v12 = vld [vmem:[%s1134_s24 + $0x90] sm:$0xff] (%p989_p5)  ;;  %v711_v14 = vld [vmem:[%s1134_s24 + $0xa0] sm:$0xff] (%p989_p5) }
 0x12a   : > { %v607_v44 = vadd.f32 %v606_v42, %v278_v6  ;;  %v617_v45 = vadd.f32 %v616_v43, %v288_v8  ;;  %v608_v46 = vpop.f32.mrb[9].mxu0  ;;  %v618_v47 = vpop.f32.mrb[9].mxu1  ;;  %v709_v13 = vld [vmem:[%s1134_s24 + $0x98] sm:$0xff] (%p989_p5)  ;;  %708 = vst [vmem:[%s1179_s25 + $0x120] sm:$0xff] (%p989_p5), %v707_v12  ;;  %712 = vst [vmem:[%s1179_s25 + $0x130] sm:$0xff] (%p989_p5), %v711_v14  ;;  %v713_v15 = vld [vmem:[%s1134_s24 + $0xa8] sm:$0xff] (%p989_p5) }
 0x12b   : > { %v609_v48 = vadd.f32 %v608_v46, %v278_v6  ;;  %v619_v49 = vadd.f32 %v618_v47, %v288_v8  ;;  %v610_v50 = vpop.f32.mrb[10].mxu0  ;;  %v620_v51 = vpop.f32.mrb[10].mxu1  ;;  %v695_v6 = vld [vmem:[%s1134_s24 + $0x60] sm:$0xff] (%p989_p5)  ;;  %v699_v8 = vld [vmem:[%s1134_s24 + $0x70] sm:$0xff] (%p989_p5)  ;;  %710 = vst [vmem:[%s1179_s25 + $0x128] sm:$0xff] (%p989_p5), %v709_v13  ;;  %714 = vst [vmem:[%s1179_s25 + $0x138] sm:$0xff] (%p989_p5), %v713_v15 }
 0x12c   : > { %629 = vst [vmem:[%s1134_s24 + $0x20] sm:$0xff] %v607_v44  ;;  %641 = vst [vmem:[%s1134_s24 + $0x80] sm:$0xff] %v617_v45  ;;  %v611_v52 = vadd.f32 %v610_v50, %v1132_v7  ;;  %v621_v53 = vadd.f32 %v620_v51, %v293_v25  ;;  %v612_v54 = vpop.f32.mrb[11].mxu0  ;;  %v622_v55 = vpop.f32.mrb[11].mxu1 }
 0x12d   : > { %630 = vst [vmem:[%s1134_s24 + $0x28] sm:$0xff] %v609_v48  ;;  %642 = vst [vmem:[%s1134_s24 + $0x88] sm:$0xff] %v619_v49  ;;  %v613_v56 = vadd.f32 %v612_v54, %v1132_v7  ;;  %v623_v57 = vadd.f32 %v622_v55, %v293_v25  ;;  %v697_v7 = vld [vmem:[%s1134_s24 + $0x68] sm:$0xff] (%p989_p5) }
 0x12e   : > { %635 = vst [vmem:[%s1134_s24 + $0x50] sm:$0xff] %v611_v52  ;;  %647 = vst [vmem:[%s1134_s24 + $0xb0] sm:$0x7] %v621_v53 }
 0x12f   : > { %636 = vst [vmem:[%s1134_s24 + $0x58] sm:$0xff] %v613_v56  ;;  %648 = vst [vmem:[%s1134_s24 + $0xb8] sm:$0x7] %v623_v57 }
 0x130   : > { %696 = vst [vmem:[%s1179_s25 + $0xc0] sm:$0xff] %v695_v6  ;;  %698 = vst [vmem:[%s1179_s25 + $0xc8] sm:$0xff] %v697_v7 }
 0x131   : > { %700 = vst [vmem:[%s1179_s25 + $0xd0] sm:$0xff] %v699_v8 }
 0x133   : > { %v679_v62 = vld [vmem:[%s1134_s24 + $0x20] sm:$0xff] }
 0x134   : > { %v681_v63 = vld [vmem:[%s1134_s24 + $0x28] sm:$0xff]  ;;  %680 = vst [vmem:[%s1179_s25 + $0x20] sm:$0xff] %v679_v62  ;;  %v703_v10 = vld [vmem:[%s1134_s24 + $0x80] sm:$0xff] }
 0x135   : > { %682 = vst [vmem:[%s1179_s25 + $0x28] sm:$0xff] %v681_v63  ;;  %v691_v4 = vld [vmem:[%s1134_s24 + $0x50] sm:$0xff]  ;;  %v705_v11 = vld [vmem:[%s1134_s24 + $0x88] sm:$0xff]  ;;  %704 = vst [vmem:[%s1179_s25 + $0xe0] sm:$0xff] %v703_v10 }
 0x136   : > { %v693_v5 = vld [vmem:[%s1134_s24 + $0x58] sm:$0xff]  ;;  %692 = vst [vmem:[%s1179_s25 + $0x80] sm:$0xff] %v691_v4  ;;  %706 = vst [vmem:[%s1179_s25 + $0xe8] sm:$0xff] %v705_v11  ;;  %v715_v16 = vld [vmem:[%s1134_s24 + $0xb0] sm:$0xff] }
 0x137   : > { %694 = vst [vmem:[%s1179_s25 + $0x88] sm:$0xff] %v693_v5  ;;  %v717_v17 = vld [vmem:[%s1134_s24 + $0xb8] sm:$0xff]  ;;  %716 = vst [vmem:[%s1179_s25 + $0x140] sm:$0xff] %v715_v16 }
 0x138   : > { %718 = vst [vmem:[%s1179_s25 + $0x148] sm:$0xff] %v717_v17 }
 0x139 PF: > { %p10_p10 = scmp.ge.s32.totalorder %s976_s16, 4   ;;  %s1238_s12 = smov %s932_s13 }
 0x13a   : > { %s1239_s13 = smov %s987_s19  ;;  %s1240_s14 = smov %s976_s16 }
 0x13b   :  { %12 = sbr.rel (!%p10_p10) target bundleno = 2 (0x2), region = 113 }

// kernel: dcn_layer_illu_forward.3
= control target key start
LH: loop header
LB: loop body
LE: loop exit
PB: predicated region body
PF: predicated region fallthrough
CT: control target
= control target key end

     0   :  { %s4374_s15 = smov 0   ;;  %s4376_s16 = smov 0   ;;  %s5614_s0 = inlined_call_operand.vmem [shape: bf16[4,72,1536], index: 0, kind: input, shape index: {}]   ;;  %s5615_s1 = inlined_call_operand.vmem [shape: f32[4,9,1536], index: 1, kind: input, shape index: {}]   ;;  %s5616_s2 = inlined_call_operand.vmem [shape: f32[8,72], index: 2, kind: input, shape index: {}]   ;;  %s5617_s3 = inlined_call_operand.vmem [shape: f32[8,1], index: 3, kind: input, shape index: {}]   ;;  %s5618_s4 = inlined_call_operand.vmem [shape: f32[8,1536], index: 4, kind: output, shape index: {}]  }
   0x1   :  { %s4378_s17 = smov 0  }
   0x2 LB: > { %s3890_s18 = sadd.s32 4294967295, %s4344_s17   ;;  %s4391_s19 = sadd.s32 1, %s4344_s17   ;;  %s4344_s17 = sphi %s4378_s17, %s5622_s17   ;;  %s4340_s16 = sphi %s4376_s16, %s5621_s16   ;;  %s4336_s15 = sphi %s4374_s15, %s5620_s15  }
   0x3   : > { %s18_s20 = ssub.s32 %s4344_s17, %s4391_s19  ;;  %s21_s21 = sadd.s32 1, %s4340_s16 }
   0x4   : > { %p19_p0 = scmp.eq.s32.totalorder %s18_s20, 0  ;;  %p28_p1 = scmp.ne.s32.totalorder %s4340_s16, %s4336_s15 }
   0x5   : > { %p29_p2 = scmp.eq.s32.totalorder %s4344_s17, 0  ;;  %p3893_p4 = scmp.ge.s32.totalorder %s4344_s17, 2 }
   0x6   : > { %s4400_s22 = scalar_select %p19_p0, %s4340_s16, %s21_s21  }
   0x7   : > { %p4402_p3 = por %p29_p2, %p28_p1  ;;  %154 = sbr.rel (%p3893_p4) target bundleno = 102 (0x66), region = 24 }
   0xe   : > { %157 = sbr.rel (!%p4402_p3) target bundleno = 73 (0x49), region = 28  ;;  %s159_s24 = sand.u32 (%p4402_p3), 1, %s4340_s16  }
   0xf   : > { %s4029_s25 = smul.u32 (%p4402_p3), 24, %s4344_s17 }
  0x10   : > { %s4241_s26 = smul.u32 (%p4402_p3), 864, %s159_s24 }
  0x11   : > { %s4414_s29 = scalar_lea.vmem (%p4402_p3), %s5614_s0, %s4029_s25 }
  0x12   : > { %v177_v0 = vld [vmem:[%s4414_s29] sm:$0xff] (%p4402_p3)  ;;  %v179_v1 = vld [vmem:[%s4414_s29 + $0x8] sm:$0xff] (%p4402_p3)  ;;  %v181_v2 = vld [vmem:[%s4414_s29 + $0x10] sm:$0xff] (%p4402_p3)  ;;  %s4419_s30 = scalar_lea.vmem (%p4402_p3), [#allocation2], %s4241_s26 }
  0x13   : > { %178 = vst [vmem:[%s4419_s30] sm:$0xff] (%p4402_p3), %v177_v0  ;;  %180 = vst [vmem:[%s4419_s30 + $0x8] sm:$0xff] (%p4402_p3), %v179_v1  ;;  %v183_v3 = vld [vmem:[%s4414_s29 + $0x30] sm:$0xff] (%p4402_p3)  ;;  %v185_v4 = vld [vmem:[%s4414_s29 + $0x38] sm:$0xff] (%p4402_p3) }
  0x14   : > { %182 = vst [vmem:[%s4419_s30 + $0x10] sm:$0xff] (%p4402_p3), %v181_v2  ;;  %v187_v5 = vld [vmem:[%s4414_s29 + $0x40] sm:$0xff] (%p4402_p3)  ;;  %184 = vst [vmem:[%s4419_s30 + $0x18] sm:$0xff] (%p4402_p3), %v183_v3  ;;  %v191_v7 = vld [vmem:[%s4414_s29 + $0x68] sm:$0xff] (%p4402_p3) }
  0x15   : > { %186 = vst [vmem:[%s4419_s30 + $0x20] sm:$0xff] %v185_v4  ;;  %188 = vst [vmem:[%s4419_s30 + $0x28] sm:$0xff] %v187_v5  ;;  %v189_v6 = vld [vmem:[%s4414_s29 + $0x60] sm:$0xff]  ;;  %v193_v8 = vld [vmem:[%s4414_s29 + $0x70] sm:$0xff] }
  0x16   : > { %190 = vst [vmem:[%s4419_s30 + $0x30] sm:$0xff] %v189_v6  ;;  %192 = vst [vmem:[%s4419_s30 + $0x38] sm:$0xff] %v191_v7  ;;  %v195_v9 = vld [vmem:[%s4414_s29 + $0x90] sm:$0xff]  ;;  %v197_v10 = vld [vmem:[%s4414_s29 + $0x98] sm:$0xff] }
  0x17   : > { %194 = vst [vmem:[%s4419_s30 + $0x40] sm:$0xff] %v193_v8  ;;  %v199_v11 = vld [vmem:[%s4414_s29 + $0xa0] sm:$0xff]  ;;  %196 = vst [vmem:[%s4419_s30 + $0x48] sm:$0xff] %v195_v9  ;;  %v203_v13 = vld [vmem:[%s4414_s29 + $0xc8] sm:$0xff] }
  0x18   : > { %198 = vst [vmem:[%s4419_s30 + $0x50] sm:$0xff] %v197_v10  ;;  %200 = vst [vmem:[%s4419_s30 + $0x58] sm:$0xff] %v199_v11  ;;  %v201_v12 = vld [vmem:[%s4414_s29 + $0xc0] sm:$0xff]  ;;  %v205_v14 = vld [vmem:[%s4414_s29 + $0xd0] sm:$0xff] }
  0x19   : > { %202 = vst [vmem:[%s4419_s30 + $0x60] sm:$0xff] %v201_v12  ;;  %204 = vst [vmem:[%s4419_s30 + $0x68] sm:$0xff] %v203_v13  ;;  %v207_v15 = vld [vmem:[%s4414_s29 + $0xf0] sm:$0xff]  ;;  %v209_v16 = vld [vmem:[%s4414_s29 + $0xf8] sm:$0xff] }
  0x1a   : > { %206 = vst [vmem:[%s4419_s30 + $0x70] sm:$0xff] %v205_v14  ;;  %v211_v17 = vld [vmem:[%s4414_s29 + $0x100] sm:$0xff]  ;;  %208 = vst [vmem:[%s4419_s30 + $0x78] sm:$0xff] %v207_v15  ;;  %v215_v19 = vld [vmem:[%s4414_s29 + $0x128] sm:$0xff] }
  0x1b   : > { %210 = vst [vmem:[%s4419_s30 + $0x80] sm:$0xff] %v209_v16  ;;  %212 = vst [vmem:[%s4419_s30 + $0x88] sm:$0xff] %v211_v17  ;;  %v213_v18 = vld [vmem:[%s4414_s29 + $0x120] sm:$0xff]  ;;  %v217_v20 = vld [vmem:[%s4414_s29 + $0x130] sm:$0xff] }
  0x1c   : > { %214 = vst [vmem:[%s4419_s30 + $0x90] sm:$0xff] %v213_v18  ;;  %216 = vst [vmem:[%s4419_s30 + $0x98] sm:$0xff] %v215_v19  ;;  %v219_v21 = vld [vmem:[%s4414_s29 + $0x150] sm:$0xff]  ;;  %v221_v22 = vld [vmem:[%s4414_s29 + $0x158] sm:$0xff] }
  0x1d   : > { %218 = vst [vmem:[%s4419_s30 + $0xa0] sm:$0xff] %v217_v20  ;;  %v223_v23 = vld [vmem:[%s4414_s29 + $0x160] sm:$0xff]  ;;  %220 = vst [vmem:[%s4419_s30 + $0xa8] sm:$0xff] %v219_v21  ;;  %v227_v25 = vld [vmem:[%s4414_s29 + $0x188] sm:$0xff] }
  0x1e   : > { %222 = vst [vmem:[%s4419_s30 + $0xb0] sm:$0xff] %v221_v22  ;;  %224 = vst [vmem:[%s4419_s30 + $0xb8] sm:$0xff] %v223_v23  ;;  %v225_v24 = vld [vmem:[%s4414_s29 + $0x180] sm:$0xff]  ;;  %v229_v26 = vld [vmem:[%s4414_s29 + $0x190] sm:$0xff] }
  0x1f   : > { %226 = vst [vmem:[%s4419_s30 + $0xc0] sm:$0xff] %v225_v24  ;;  %228 = vst [vmem:[%s4419_s30 + $0xc8] sm:$0xff] %v227_v25  ;;  %v231_v27 = vld [vmem:[%s4414_s29 + $0x1b0] sm:$0xff]  ;;  %v233_v28 = vld [vmem:[%s4414_s29 + $0x1b8] sm:$0xff] }
  0x20   : > { %230 = vst [vmem:[%s4419_s30 + $0xd0] sm:$0xff] %v229_v26  ;;  %v235_v29 = vld [vmem:[%s4414_s29 + $0x1c0] sm:$0xff]  ;;  %232 = vst [vmem:[%s4419_s30 + $0xd8] sm:$0xff] %v231_v27  ;;  %v239_v31 = vld [vmem:[%s4414_s29 + $0x1e8] sm:$0xff] }
  0x21   : > { %234 = vst [vmem:[%s4419_s30 + $0xe0] sm:$0xff] %v233_v28  ;;  %236 = vst [vmem:[%s4419_s30 + $0xe8] sm:$0xff] %v235_v29  ;;  %v237_v30 = vld [vmem:[%s4414_s29 + $0x1e0] sm:$0xff]  ;;  %v241_v32 = vld [vmem:[%s4414_s29 + $0x1f0] sm:$0xff] }
  0x22   : > { %238 = vst [vmem:[%s4419_s30 + $0xf0] sm:$0xff] %v237_v30  ;;  %240 = vst [vmem:[%s4419_s30 + $0xf8] sm:$0xff] %v239_v31  ;;  %v243_v33 = vld [vmem:[%s4414_s29 + $0x210] sm:$0xff]  ;;  %v245_v34 = vld [vmem:[%s4414_s29 + $0x218] sm:$0xff] }
  0x23   : > { %242 = vst [vmem:[%s4419_s30 + $0x100] sm:$0xff] %v241_v32  ;;  %v247_v35 = vld [vmem:[%s4414_s29 + $0x220] sm:$0xff]  ;;  %244 = vst [vmem:[%s4419_s30 + $0x108] sm:$0xff] %v243_v33  ;;  %v251_v37 = vld [vmem:[%s4414_s29 + $0x248] sm:$0xff] }
  0x24   : > { %246 = vst [vmem:[%s4419_s30 + $0x110] sm:$0xff] %v245_v34  ;;  %248 = vst [vmem:[%s4419_s30 + $0x118] sm:$0xff] %v247_v35  ;;  %v249_v36 = vld [vmem:[%s4414_s29 + $0x240] sm:$0xff]  ;;  %v253_v38 = vld [vmem:[%s4414_s29 + $0x250] sm:$0xff] }
  0x25   : > { %250 = vst [vmem:[%s4419_s30 + $0x120] sm:$0xff] %v249_v36  ;;  %252 = vst [vmem:[%s4419_s30 + $0x128] sm:$0xff] %v251_v37  ;;  %v255_v39 = vld [vmem:[%s4414_s29 + $0x270] sm:$0xff]  ;;  %v257_v40 = vld [vmem:[%s4414_s29 + $0x278] sm:$0xff] }
  0x26   : > { %254 = vst [vmem:[%s4419_s30 + $0x130] sm:$0xff] %v253_v38  ;;  %v259_v41 = vld [vmem:[%s4414_s29 + $0x280] sm:$0xff]  ;;  %256 = vst [vmem:[%s4419_s30 + $0x138] sm:$0xff] %v255_v39  ;;  %v263_v43 = vld [vmem:[%s4414_s29 + $0x2a8] sm:$0xff] }
  0x27   : > { %258 = vst [vmem:[%s4419_s30 + $0x140] sm:$0xff] %v257_v40  ;;  %260 = vst [vmem:[%s4419_s30 + $0x148] sm:$0xff] %v259_v41  ;;  %v261_v42 = vld [vmem:[%s4414_s29 + $0x2a0] sm:$0xff]  ;;  %v265_v44 = vld [vmem:[%s4414_s29 + $0x2b0] sm:$0xff] }
  0x28   : > { %262 = vst [vmem:[%s4419_s30 + $0x150] sm:$0xff] %v261_v42  ;;  %264 = vst [vmem:[%s4419_s30 + $0x158] sm:$0xff] %v263_v43  ;;  %v267_v45 = vld [vmem:[%s4414_s29 + $0x2d0] sm:$0xff]  ;;  %v269_v46 = vld [vmem:[%s4414_s29 + $0x2d8] sm:$0xff] }
  0x29   : > { %266 = vst [vmem:[%s4419_s30 + $0x160] sm:$0xff] %v265_v44  ;;  %v271_v47 = vld [vmem:[%s4414_s29 + $0x2e0] sm:$0xff]  ;;  %268 = vst [vmem:[%s4419_s30 + $0x168] sm:$0xff] %v267_v45  ;;  %v275_v49 = vld [vmem:[%s4414_s29 + $0x308] sm:$0xff] }
  0x2a   : > { %270 = vst [vmem:[%s4419_s30 + $0x170] sm:$0xff] %v269_v46  ;;  %272 = vst [vmem:[%s4419_s30 + $0x178] sm:$0xff] %v271_v47  ;;  %v273_v48 = vld [vmem:[%s4414_s29 + $0x300] sm:$0xff]  ;;  %v277_v50 = vld [vmem:[%s4414_s29 + $0x310] sm:$0xff] }
  0x2b   : > { %274 = vst [vmem:[%s4419_s30 + $0x180] sm:$0xff] %v273_v48  ;;  %276 = vst [vmem:[%s4419_s30 + $0x188] sm:$0xff] %v275_v49  ;;  %v279_v51 = vld [vmem:[%s4414_s29 + $0x330] sm:$0xff]  ;;  %v281_v52 = vld [vmem:[%s4414_s29 + $0x338] sm:$0xff] }
  0x2c   : > { %278 = vst [vmem:[%s4419_s30 + $0x190] sm:$0xff] %v277_v50  ;;  %v283_v53 = vld [vmem:[%s4414_s29 + $0x340] sm:$0xff]  ;;  %280 = vst [vmem:[%s4419_s30 + $0x198] sm:$0xff] %v279_v51  ;;  %v287_v55 = vld [vmem:[%s4414_s29 + $0x368] sm:$0xff] }
  0x2d   : > { %282 = vst [vmem:[%s4419_s30 + $0x1a0] sm:$0xff] %v281_v52  ;;  %284 = vst [vmem:[%s4419_s30 + $0x1a8] sm:$0xff] %v283_v53  ;;  %v285_v54 = vld [vmem:[%s4414_s29 + $0x360] sm:$0xff]  ;;  %v289_v56 = vld [vmem:[%s4414_s29 + $0x370] sm:$0xff] }
  0x2e   : > { %286 = vst [vmem:[%s4419_s30 + $0x1b0] sm:$0xff] %v285_v54  ;;  %288 = vst [vmem:[%s4419_s30 + $0x1b8] sm:$0xff] %v287_v55  ;;  %v291_v57 = vld [vmem:[%s4414_s29 + $0x390] sm:$0xff]  ;;  %v293_v58 = vld [vmem:[%s4414_s29 + $0x398] sm:$0xff] }
  0x2f   : > { %290 = vst [vmem:[%s4419_s30 + $0x1c0] sm:$0xff] %v289_v56  ;;  %v295_v59 = vld [vmem:[%s4414_s29 + $0x3a0] sm:$0xff]  ;;  %292 = vst [vmem:[%s4419_s30 + $0x1c8] sm:$0xff] %v291_v57  ;;  %v299_v61 = vld [vmem:[%s4414_s29 + $0x3c8] sm:$0xff] }
  0x30   : > { %294 = vst [vmem:[%s4419_s30 + $0x1d0] sm:$0xff] %v293_v58  ;;  %296 = vst [vmem:[%s4419_s30 + $0x1d8] sm:$0xff] %v295_v59  ;;  %v297_v60 = vld [vmem:[%s4414_s29 + $0x3c0] sm:$0xff]  ;;  %v301_v62 = vld [vmem:[%s4414_s29 + $0x3d0] sm:$0xff] }
  0x31   : > { %298 = vst [vmem:[%s4419_s30 + $0x1e0] sm:$0xff] %v297_v60  ;;  %300 = vst [vmem:[%s4419_s30 + $0x1e8] sm:$0xff] %v299_v61  ;;  %v303_v63 = vld [vmem:[%s4414_s29 + $0x3f0] sm:$0xff]  ;;  %v305_v0 = vld [vmem:[%s4414_s29 + $0x3f8] sm:$0xff] }
  0x32   : > { %302 = vst [vmem:[%s4419_s30 + $0x1f0] sm:$0xff] %v301_v62  ;;  %v307_v1 = vld [vmem:[%s4414_s29 + $0x400] sm:$0xff]  ;;  %304 = vst [vmem:[%s4419_s30 + $0x1f8] sm:$0xff] %v303_v63  ;;  %v311_v3 = vld [vmem:[%s4414_s29 + $0x428] sm:$0xff] }
  0x33   : > { %306 = vst [vmem:[%s4419_s30 + $0x200] sm:$0xff] %v305_v0  ;;  %308 = vst [vmem:[%s4419_s30 + $0x208] sm:$0xff] %v307_v1  ;;  %v309_v2 = vld [vmem:[%s4414_s29 + $0x420] sm:$0xff]  ;;  %v313_v4 = vld [vmem:[%s4414_s29 + $0x430] sm:$0xff] }
  0x34   : > { %310 = vst [vmem:[%s4419_s30 + $0x210] sm:$0xff] %v309_v2  ;;  %312 = vst [vmem:[%s4419_s30 + $0x218] sm:$0xff] %v311_v3  ;;  %v315_v5 = vld [vmem:[%s4414_s29 + $0x450] sm:$0xff]  ;;  %v317_v6 = vld [vmem:[%s4414_s29 + $0x458] sm:$0xff] }
  0x35   : > { %314 = vst [vmem:[%s4419_s30 + $0x220] sm:$0xff] %v313_v4  ;;  %v319_v7 = vld [vmem:[%s4414_s29 + $0x460] sm:$0xff]  ;;  %316 = vst [vmem:[%s4419_s30 + $0x228] sm:$0xff] %v315_v5  ;;  %v323_v9 = vld [vmem:[%s4414_s29 + $0x488] sm:$0xff] }
  0x36   : > { %318 = vst [vmem:[%s4419_s30 + $0x230] sm:$0xff] %v317_v6  ;;  %320 = vst [vmem:[%s4419_s30 + $0x238] sm:$0xff] %v319_v7  ;;  %v321_v8 = vld [vmem:[%s4414_s29 + $0x480] sm:$0xff]  ;;  %v325_v10 = vld [vmem:[%s4414_s29 + $0x490] sm:$0xff] }
  0x37   : > { %322 = vst [vmem:[%s4419_s30 + $0x240] sm:$0xff] %v321_v8  ;;  %324 = vst [vmem:[%s4419_s30 + $0x248] sm:$0xff] %v323_v9  ;;  %v327_v11 = vld [vmem:[%s4414_s29 + $0x4b0] sm:$0xff]  ;;  %v329_v12 = vld [vmem:[%s4414_s29 + $0x4b8] sm:$0xff] }
  0x38   : > { %326 = vst [vmem:[%s4419_s30 + $0x250] sm:$0xff] %v325_v10  ;;  %v331_v13 = vld [vmem:[%s4414_s29 + $0x4c0] sm:$0xff]  ;;  %328 = vst [vmem:[%s4419_s30 + $0x258] sm:$0xff] %v327_v11  ;;  %v335_v15 = vld [vmem:[%s4414_s29 + $0x4e8] sm:$0xff] }
  0x39   : > { %330 = vst [vmem:[%s4419_s30 + $0x260] sm:$0xff] %v329_v12  ;;  %332 = vst [vmem:[%s4419_s30 + $0x268] sm:$0xff] %v331_v13  ;;  %v333_v14 = vld [vmem:[%s4414_s29 + $0x4e0] sm:$0xff]  ;;  %v337_v16 = vld [vmem:[%s4414_s29 + $0x4f0] sm:$0xff] }
  0x3a   : > { %334 = vst [vmem:[%s4419_s30 + $0x270] sm:$0xff] %v333_v14  ;;  %336 = vst [vmem:[%s4419_s30 + $0x278] sm:$0xff] %v335_v15  ;;  %v339_v17 = vld [vmem:[%s4414_s29 + $0x510] sm:$0xff]  ;;  %v341_v18 = vld [vmem:[%s4414_s29 + $0x518] sm:$0xff] }
  0x3b   : > { %338 = vst [vmem:[%s4419_s30 + $0x280] sm:$0xff] %v337_v16  ;;  %v343_v19 = vld [vmem:[%s4414_s29 + $0x520] sm:$0xff]  ;;  %340 = vst [vmem:[%s4419_s30 + $0x288] sm:$0xff] %v339_v17  ;;  %v347_v21 = vld [vmem:[%s4414_s29 + $0x548] sm:$0xff] }
  0x3c   : > { %342 = vst [vmem:[%s4419_s30 + $0x290] sm:$0xff] %v341_v18  ;;  %344 = vst [vmem:[%s4419_s30 + $0x298] sm:$0xff] %v343_v19  ;;  %v345_v20 = vld [vmem:[%s4414_s29 + $0x540] sm:$0xff]  ;;  %v349_v22 = vld [vmem:[%s4414_s29 + $0x550] sm:$0xff] }
  0x3d   : > { %346 = vst [vmem:[%s4419_s30 + $0x2a0] sm:$0xff] %v345_v20  ;;  %348 = vst [vmem:[%s4419_s30 + $0x2a8] sm:$0xff] %v347_v21  ;;  %v351_v23 = vld [vmem:[%s4414_s29 + $0x570] sm:$0xff]  ;;  %v353_v24 = vld [vmem:[%s4414_s29 + $0x578] sm:$0xff] }
  0x3e   : > { %350 = vst [vmem:[%s4419_s30 + $0x2b0] sm:$0xff] %v349_v22  ;;  %v355_v25 = vld [vmem:[%s4414_s29 + $0x580] sm:$0xff]  ;;  %352 = vst [vmem:[%s4419_s30 + $0x2b8] sm:$0xff] %v351_v23  ;;  %v359_v27 = vld [vmem:[%s4414_s29 + $0x5a8] sm:$0xff] }
  0x3f   : > { %354 = vst [vmem:[%s4419_s30 + $0x2c0] sm:$0xff] %v353_v24  ;;  %356 = vst [vmem:[%s4419_s30 + $0x2c8] sm:$0xff] %v355_v25  ;;  %v357_v26 = vld [vmem:[%s4414_s29 + $0x5a0] sm:$0xff]  ;;  %v361_v28 = vld [vmem:[%s4414_s29 + $0x5b0] sm:$0xff] }
  0x40   : > { %358 = vst [vmem:[%s4419_s30 + $0x2d0] sm:$0xff] %v357_v26  ;;  %360 = vst [vmem:[%s4419_s30 + $0x2d8] sm:$0xff] %v359_v27  ;;  %v363_v29 = vld [vmem:[%s4414_s29 + $0x5d0] sm:$0xff]  ;;  %v365_v30 = vld [vmem:[%s4414_s29 + $0x5d8] sm:$0xff] }
  0x41   : > { %362 = vst [vmem:[%s4419_s30 + $0x2e0] sm:$0xff] %v361_v28  ;;  %v367_v31 = vld [vmem:[%s4414_s29 + $0x5e0] sm:$0xff]  ;;  %364 = vst [vmem:[%s4419_s30 + $0x2e8] sm:$0xff] %v363_v29  ;;  %v371_v33 = vld [vmem:[%s4414_s29 + $0x608] sm:$0xff] }
  0x42   : > { %366 = vst [vmem:[%s4419_s30 + $0x2f0] sm:$0xff] %v365_v30  ;;  %368 = vst [vmem:[%s4419_s30 + $0x2f8] sm:$0xff] %v367_v31  ;;  %v369_v32 = vld [vmem:[%s4414_s29 + $0x600] sm:$0xff]  ;;  %v373_v34 = vld [vmem:[%s4414_s29 + $0x610] sm:$0xff] }
  0x43   : > { %370 = vst [vmem:[%s4419_s30 + $0x300] sm:$0xff] %v369_v32  ;;  %372 = vst [vmem:[%s4419_s30 + $0x308] sm:$0xff] %v371_v33  ;;  %v375_v35 = vld [vmem:[%s4414_s29 + $0x630] sm:$0xff]  ;;  %v377_v36 = vld [vmem:[%s4414_s29 + $0x638] sm:$0xff] }
  0x44   : > { %374 = vst [vmem:[%s4419_s30 + $0x310] sm:$0xff] %v373_v34  ;;  %v379_v37 = vld [vmem:[%s4414_s29 + $0x640] sm:$0xff]  ;;  %376 = vst [vmem:[%s4419_s30 + $0x318] sm:$0xff] %v375_v35  ;;  %v383_v39 = vld [vmem:[%s4414_s29 + $0x668] sm:$0xff] }
  0x45   : > { %378 = vst [vmem:[%s4419_s30 + $0x320] sm:$0xff] %v377_v36  ;;  %380 = vst [vmem:[%s4419_s30 + $0x328] sm:$0xff] %v379_v37  ;;  %v381_v38 = vld [vmem:[%s4414_s29 + $0x660] sm:$0xff]  ;;  %v385_v40 = vld [vmem:[%s4414_s29 + $0x670] sm:$0xff] }
  0x46   : > { %382 = vst [vmem:[%s4419_s30 + $0x330] sm:$0xff] %v381_v38  ;;  %384 = vst [vmem:[%s4419_s30 + $0x338] sm:$0xff] %v383_v39  ;;  %v387_v41 = vld [vmem:[%s4414_s29 + $0x690] sm:$0xff]  ;;  %v389_v42 = vld [vmem:[%s4414_s29 + $0x698] sm:$0xff] }
  0x47   : > { %386 = vst [vmem:[%s4419_s30 + $0x340] sm:$0xff] %v385_v40  ;;  %v391_v43 = vld [vmem:[%s4414_s29 + $0x6a0] sm:$0xff]  ;;  %388 = vst [vmem:[%s4419_s30 + $0x348] sm:$0xff] %v387_v41 }
  0x48   : > { %390 = vst [vmem:[%s4419_s30 + $0x350] sm:$0xff] %v389_v42  ;;  %392 = vst [vmem:[%s4419_s30 + $0x358] sm:$0xff] %v391_v43 }
  0x49 PF: > { %398 = sbr.rel (!%p4402_p3) target bundleno = 102 (0x66), region = 51  ;;  %s400_s5 = sand.u32 (%p4402_p3), 1, %s4340_s16  }
  0x4a   : > { %s4030_s6 = smul.u32 (%p4402_p3), 48, %s4344_s17 }
  0x4b   : > { %s4242_s7 = smul.u32 (%p4402_p3), 384, %s400_s5 }
  0x4c   : > { %s4641_s10 = scalar_lea.vmem (%p4402_p3), %s5615_s1, %s4030_s6 }
  0x4d   : > { %v418_v44 = vld [vmem:[%s4641_s10] sm:$0xff] (%p4402_p3)  ;;  %v420_v45 = vld [vmem:[%s4641_s10 + $0x8] sm:$0xff] (%p4402_p3)  ;;  %v422_v46 = vld [vmem:[%s4641_s10 + $0x10] sm:$0xff] (%p4402_p3)  ;;  %s4646_s11 = scalar_lea.vmem (%p4402_p3), [#allocation3], %s4242_s7 }
  0x4e   : > { %419 = vst [vmem:[%s4646_s11] sm:$0xff] (%p4402_p3), %v418_v44  ;;  %421 = vst [vmem:[%s4646_s11 + $0x8] sm:$0xff] (%p4402_p3), %v420_v45  ;;  %v424_v47 = vld [vmem:[%s4641_s10 + $0x18] sm:$0xff] (%p4402_p3)  ;;  %v426_v48 = vld [vmem:[%s4641_s10 + $0x20] sm:$0xff] (%p4402_p3) }
  0x4f   : > { %423 = vst [vmem:[%s4646_s11 + $0x10] sm:$0xff] (%p4402_p3), %v422_v46  ;;  %v428_v49 = vld [vmem:[%s4641_s10 + $0x28] sm:$0xff] (%p4402_p3)  ;;  %425 = vst [vmem:[%s4646_s11 + $0x18] sm:$0xff] (%p4402_p3), %v424_v47  ;;  %v430_v50 = vld [vmem:[%s4641_s10 + $0x60] sm:$0xff] (%p4402_p3) }
  0x50   : > { %427 = vst [vmem:[%s4646_s11 + $0x20] sm:$0xff] %v426_v48  ;;  %429 = vst [vmem:[%s4646_s11 + $0x28] sm:$0xff] %v428_v49  ;;  %v432_v51 = vld [vmem:[%s4641_s10 + $0x68] sm:$0xff]  ;;  %v434_v52 = vld [vmem:[%s4641_s10 + $0x70] sm:$0xff] }
  0x51   : > { %431 = vst [vmem:[%s4646_s11 + $0x30] sm:$0xff] %v430_v50  ;;  %433 = vst [vmem:[%s4646_s11 + $0x38] sm:$0xff] %v432_v51  ;;  %v436_v53 = vld [vmem:[%s4641_s10 + $0x78] sm:$0xff]  ;;  %v438_v54 = vld [vmem:[%s4641_s10 + $0x80] sm:$0xff] }
  0x52   : > { %435 = vst [vmem:[%s4646_s11 + $0x40] sm:$0xff] %v434_v52  ;;  %v440_v55 = vld [vmem:[%s4641_s10 + $0x88] sm:$0xff]  ;;  %437 = vst [vmem:[%s4646_s11 + $0x48] sm:$0xff] %v436_v53  ;;  %v442_v56 = vld [vmem:[%s4641_s10 + $0xc0] sm:$0xff] }
  0x53   : > { %439 = vst [vmem:[%s4646_s11 + $0x50] sm:$0xff] %v438_v54  ;;  %441 = vst [vmem:[%s4646_s11 + $0x58] sm:$0xff] %v440_v55  ;;  %v444_v57 = vld [vmem:[%s4641_s10 + $0xc8] sm:$0xff]  ;;  %v446_v58 = vld [vmem:[%s4641_s10 + $0xd0] sm:$0xff] }
  0x54   : > { %443 = vst [vmem:[%s4646_s11 + $0x60] sm:$0xff] %v442_v56  ;;  %445 = vst [vmem:[%s4646_s11 + $0x68] sm:$0xff] %v444_v57  ;;  %v448_v59 = vld [vmem:[%s4641_s10 + $0xd8] sm:$0xff]  ;;  %v450_v60 = vld [vmem:[%s4641_s10 + $0xe0] sm:$0xff] }
  0x55   : > { %447 = vst [vmem:[%s4646_s11 + $0x70] sm:$0xff] %v446_v58  ;;  %v452_v61 = vld [vmem:[%s4641_s10 + $0xe8] sm:$0xff]  ;;  %449 = vst [vmem:[%s4646_s11 + $0x78] sm:$0xff] %v448_v59  ;;  %v454_v62 = vld [vmem:[%s4641_s10 + $0x120] sm:$0xff] }
  0x56   : > { %451 = vst [vmem:[%s4646_s11 + $0x80] sm:$0xff] %v450_v60  ;;  %453 = vst [vmem:[%s4646_s11 + $0x88] sm:$0xff] %v452_v61  ;;  %v456_v63 = vld [vmem:[%s4641_s10 + $0x128] sm:$0xff]  ;;  %v458_v0 = vld [vmem:[%s4641_s10 + $0x130] sm:$0xff] }
  0x57   : > { %455 = vst [vmem:[%s4646_s11 + $0x90] sm:$0xff] %v454_v62  ;;  %457 = vst [vmem:[%s4646_s11 + $0x98] sm:$0xff] %v456_v63  ;;  %v460_v1 = vld [vmem:[%s4641_s10 + $0x138] sm:$0xff]  ;;  %v462_v2 = vld [vmem:[%s4641_s10 + $0x140] sm:$0xff] }
  0x58   : > { %459 = vst [vmem:[%s4646_s11 + $0xa0] sm:$0xff] %v458_v0  ;;  %v464_v3 = vld [vmem:[%s4641_s10 + $0x148] sm:$0xff]  ;;  %461 = vst [vmem:[%s4646_s11 + $0xa8] sm:$0xff] %v460_v1  ;;  %v466_v4 = vld [vmem:[%s4641_s10 + $0x180] sm:$0xff] }
  0x59   : > { %463 = vst [vmem:[%s4646_s11 + $0xb0] sm:$0xff] %v462_v2  ;;  %465 = vst [vmem:[%s4646_s11 + $0xb8] sm:$0xff] %v464_v3  ;;  %v468_v5 = vld [vmem:[%s4641_s10 + $0x188] sm:$0xff]  ;;  %v470_v6 = vld [vmem:[%s4641_s10 + $0x190] sm:$0xff] }
  0x5a   : > { %467 = vst [vmem:[%s4646_s11 + $0xc0] sm:$0xff] %v466_v4  ;;  %469 = vst [vmem:[%s4646_s11 + $0xc8] sm:$0xff] %v468_v5  ;;  %v472_v7 = vld [vmem:[%s4641_s10 + $0x198] sm:$0xff]  ;;  %v474_v8 = vld [vmem:[%s4641_s10 + $0x1a0] sm:$0xff] }
  0x5b   : > { %471 = vst [vmem:[%s4646_s11 + $0xd0] sm:$0xff] %v470_v6  ;;  %v476_v9 = vld [vmem:[%s4641_s10 + $0x1a8] sm:$0xff]  ;;  %473 = vst [vmem:[%s4646_s11 + $0xd8] sm:$0xff] %v472_v7  ;;  %v478_v10 = vld [vmem:[%s4641_s10 + $0x1e0] sm:$0xff] }
  0x5c   : > { %475 = vst [vmem:[%s4646_s11 + $0xe0] sm:$0xff] %v474_v8  ;;  %477 = vst [vmem:[%s4646_s11 + $0xe8] sm:$0xff] %v476_v9  ;;  %v480_v11 = vld [vmem:[%s4641_s10 + $0x1e8] sm:$0xff]  ;;  %v482_v12 = vld [vmem:[%s4641_s10 + $0x1f0] sm:$0xff] }
  0x5d   : > { %479 = vst [vmem:[%s4646_s11 + $0xf0] sm:$0xff] %v478_v10  ;;  %481 = vst [vmem:[%s4646_s11 + $0xf8] sm:$0xff] %v480_v11  ;;  %v484_v13 = vld [vmem:[%s4641_s10 + $0x1f8] sm:$0xff]  ;;  %v486_v14 = vld [vmem:[%s4641_s10 + $0x200] sm:$0xff] }
  0x5e   : > { %483 = vst [vmem:[%s4646_s11 + $0x100] sm:$0xff] %v482_v12  ;;  %v488_v15 = vld [vmem:[%s4641_s10 + $0x208] sm:$0xff]  ;;  %485 = vst [vmem:[%s4646_s11 + $0x108] sm:$0xff] %v484_v13  ;;  %v490_v16 = vld [vmem:[%s4641_s10 + $0x240] sm:$0xff] }
  0x5f   : > { %487 = vst [vmem:[%s4646_s11 + $0x110] sm:$0xff] %v486_v14  ;;  %489 = vst [vmem:[%s4646_s11 + $0x118] sm:$0xff] %v488_v15  ;;  %v492_v17 = vld [vmem:[%s4641_s10 + $0x248] sm:$0xff]  ;;  %v494_v18 = vld [vmem:[%s4641_s10 + $0x250] sm:$0xff] }
  0x60   : > { %491 = vst [vmem:[%s4646_s11 + $0x120] sm:$0xff] %v490_v16  ;;  %493 = vst [vmem:[%s4646_s11 + $0x128] sm:$0xff] %v492_v17  ;;  %v496_v19 = vld [vmem:[%s4641_s10 + $0x258] sm:$0xff]  ;;  %v498_v20 = vld [vmem:[%s4641_s10 + $0x260] sm:$0xff] }
  0x61   : > { %495 = vst [vmem:[%s4646_s11 + $0x130] sm:$0xff] %v494_v18  ;;  %v500_v21 = vld [vmem:[%s4641_s10 + $0x268] sm:$0xff]  ;;  %497 = vst [vmem:[%s4646_s11 + $0x138] sm:$0xff] %v496_v19  ;;  %v502_v22 = vld [vmem:[%s4641_s10 + $0x2a0] sm:$0xff] }
  0x62   : > { %499 = vst [vmem:[%s4646_s11 + $0x140] sm:$0xff] %v498_v20  ;;  %501 = vst [vmem:[%s4646_s11 + $0x148] sm:$0xff] %v500_v21  ;;  %v504_v23 = vld [vmem:[%s4641_s10 + $0x2a8] sm:$0xff]  ;;  %v506_v24 = vld [vmem:[%s4641_s10 + $0x2b0] sm:$0xff] }
  0x63   : > { %503 = vst [vmem:[%s4646_s11 + $0x150] sm:$0xff] %v502_v22  ;;  %505 = vst [vmem:[%s4646_s11 + $0x158] sm:$0xff] %v504_v23  ;;  %v508_v25 = vld [vmem:[%s4641_s10 + $0x2b8] sm:$0xff]  ;;  %v510_v26 = vld [vmem:[%s4641_s10 + $0x2c0] sm:$0xff] }
  0x64   : > { %507 = vst [vmem:[%s4646_s11 + $0x160] sm:$0xff] %v506_v24  ;;  %v512_v27 = vld [vmem:[%s4641_s10 + $0x2c8] sm:$0xff]  ;;  %509 = vst [vmem:[%s4646_s11 + $0x168] sm:$0xff] %v508_v25 }
  0x65   : > { %511 = vst [vmem:[%s4646_s11 + $0x170] sm:$0xff] %v510_v26  ;;  %513 = vst [vmem:[%s4646_s11 + $0x178] sm:$0xff] %v512_v27 }
  0x66 PF: > { %p3896_p5 = scmp.ge.s32.totalorder %s4344_s17, 1  ;;  %p518_p6 = scmp.lt.s32.totalorder %s4344_s17, 3 }
  0x68   : > { %p519_p7 = pnand %p3896_p5, %p518_p6 }
  0x69   : > { %s525_s12 = sand.u32 (!%p519_p7), 1, %s4336_s15   ;;  %v603_v28 = vlaneseq (!%p519_p7)  ;;  %v4346_v29 = vmov (!%p519_p7), 1966171168   ;;  %v4347_v31 = vmov (!%p519_p7), 0.0   ;;  %vm1746_vm0 = vcmask (!%p519_p7), 588800   ;;  %s563_s28 = smul.u32 (!%p519_p7), 6, %s3890_s18 }
  0x6a   : > { %522 = sbr.rel (%p519_p7) target bundleno = 555 (0x22b), region = 74  ;;  %v601_v30 = vunpack.c.l.s4 (!%p519_p7), %v4346_v29  ;;  %1814 = vmatprep.mubr.f32.mxu1 (!%p519_p7), %v4347_v31  ;;  %2027 = vmatprep.mubr.f32.mxu0 (!%p519_p7), %v4347_v31 }
  0x6b   : > { %s4243_s13 = smul.u32 (!%p519_p7), 864, %s525_s12  ;;  %v4746_v32 = vshrl.u32 (!%p519_p7), %v603_v28, 7  ;;  %p564_p8 = scmp.lt.s32.totalorder (!%p519_p7), %s563_s28, 11 }
  0x6c   : > { %s4244_s14 = smul.u32 (!%p519_p7), 384, %s525_s12  ;;  %v602_v33 = vunpack.c.0.s8 (!%p519_p7), %v601_v30 }
  0x6d   : > { %s4748_s20 = scalar_lea.vmem (!%p519_p7), [#allocation2], %s4243_s13  ;;  %v4765_v38 = vsub.s32 (!%p519_p7), 1, %v4746_v32  ;;  %v4768_v39 = vsub.s32 (!%p519_p7), 0, %v4746_v32  ;;  %v4792_v57 = vsub.s32 (!%p519_p7), 3, %v4746_v32  ;;  %v4795_v58 = vsub.s32 (!%p519_p7), 5, %v4746_v32 }
  0x6e   : > { %v4751_v34 = vld [vmem:[%s4748_s20 + $0xd8] sm:$0xff] (!%p519_p7)  ;;  %v4754_v35 = vld [vmem:[%s4748_s20 + $0xf0] sm:$0xff] (!%p519_p7)  ;;  %v4757_v36 = vld [vmem:[%s4748_s20] sm:$0xff] (!%p519_p7)  ;;  %v4760_v37 = vsub.s32 (!%p519_p7), %v602_v33, %v4746_v32  ;;  %s4762_s15 = scalar_lea.vmem (!%p519_p7), [#allocation3], %s4244_s14  ;;  %v4803_v0 = vsub.s32 (!%p519_p7), 2, %v4746_v32 }
  0x6f   : > { %v4273_v40 = vld [vmem:[%s4762_s15 + $0x60] ss:$8 sps:$4 sm:$0xff] (!%p519_p7)   ;;  %v4275_v41 = vld [vmem:[%s4762_s15 + $0x64] ss:$8 sps:$4 sm:$0xff] (!%p519_p7)   ;;  %v4276_v42 = vld [vmem:[%s4762_s15 + $0x70] ss:$8 sps:$4 sm:$0xff] (!%p519_p7)   ;;  %v1639_v43 = vunpack.c.h.bf16 (!%p519_p7), %v4751_v34  ;;  %v1645_v47 = vunpack.c.h.bf16 (!%p519_p7), %v4754_v35  ;;  %v1050_v48 = vunpack.c.h.bf16 (!%p519_p7), %v4757_v36  ;;  %v1638_v49 = vunpack.c.l.bf16 (!%p519_p7), %v4751_v34 }
  0x70   : > { %v4278_v44 = vld [vmem:[%s4762_s15 + $0x74] ss:$8 sps:$4 sm:$0xff] (!%p519_p7)   ;;  %v4279_v45 = vld [vmem:[%s4762_s15 + $0x80] ss:$8 sps:$4 sm:$0xff] (!%p519_p7)   ;;  %v4281_v46 = vld [vmem:[%s4762_s15 + $0x84] ss:$8 sps:$4 sm:$0xff] (!%p519_p7)   ;;  %v1644_v50 = vunpack.c.l.bf16 (!%p519_p7), %v4754_v35  ;;  %v1194_v51 = vrot.slane (!%p519_p7), %v4273_v40, %v4760_v37  ;;  %v1208_v52 = vrot.slane (!%p519_p7), %v4276_v42, %v4760_v37  ;;  %v1049_v53 = vunpack.c.l.bf16 (!%p519_p7), %v4757_v36 }
  0x71   : > { %v4785_v54 = vrot.slane %v4275_v41, %v4760_v37  ;;  %v1222_v55 = vrot.slane %v4279_v45, %v4760_v37  ;;  %v4789_v56 = vrot.slane %v4278_v44, %v4760_v37  ;;  %v4282_v61 = vld [vmem:[%s4762_s15] ss:$8 sps:$4 sm:$0xff]   ;;  %v4285_v62 = vld [vmem:[%s4762_s15 + $0x10] ss:$8 sps:$4 sm:$0xff]   ;;  %v4800_v63 = vrot.slane %v4281_v46, %v4760_v37  ;;  %s5624_s28 = smov (!%p564_p8, %s563_s28), 11 }
  0x72   : > { %v1230_v59 = vcombine.low %v1194_v51, %v1208_v52  ;;  %v1231_v60 = vcombine.high %v1194_v51, %v1208_v52  ;;  %v4288_v3 = vld [vmem:[%s4762_s15 + $0x20] ss:$8 sps:$4 sm:$0xff]   ;;  %v606_v8 = vrot.slane %v4282_v61, %v4760_v37  ;;  %v620_v9 = vrot.slane %v4285_v62, %v4760_v37  ;;  %v1025_v10 = vld [vmem:[%s4748_s20 + $0x18] sm:$0xff]  ;;  %v1028_v52 = vld [vmem:[%s4748_s20 + $0x30] sm:$0xff]  ;;  %s3897_s29 = sshll.u32 %s5624_s28, 3 }
  0x73   : > { %v1234_v1 = vcombine.high %v1222_v55, %v1222_v55  ;;  %v1270_v2 = vrot.slane %v1222_v55, %v4760_v37  ;;  %v1232_v4 = vcombine.low %v4785_v54, %v4789_v56  ;;  %v1233_v5 = vcombine.high %v4785_v54, %v4789_v56  ;;  %v3916_v23 = vld [vmem:[%s4748_s20 + $0x108] sm:$0xff]  ;;  %v3919_v28 = vld [vmem:[%s4748_s20 + $0x120] sm:$0xff]  ;;  %s567_s6 = scalar_lea.vmem %s5618_s4, %s3897_s29 }
  0x74   : > { %v1242_v6 = vrot.slane %v1230_v59, %v4760_v37  ;;  %v1256_v7 = vrot.slane %v1231_v60, %v4760_v37  ;;  %v634_v12 = vrot.slane %v4288_v3, %v4760_v37  ;;  %v1056_v13 = vunpack.c.h.bf16 %v1025_v10  ;;  %v1031_v55 = vld [vmem:[%s4748_s20 + $0x48] sm:$0xff] }
  0x75   : > { %v1284_v11 = vrot.slane %v1234_v1, %v4760_v37  ;;  %v1055_v14 = vunpack.c.l.bf16 %v1025_v10  ;;  %v642_v16 = vcombine.low %v606_v8, %v620_v9  ;;  %v643_v17 = vcombine.high %v606_v8, %v620_v9 }
  0x76   : > { %v4818_v15 = vcombine.low %v1242_v6, %v1270_v2  ;;  %v4820_v18 = vcombine.high %v1242_v6, %v1270_v2  ;;  %v646_v20 = vcombine.high %v634_v12, %v634_v12  ;;  %v682_v21 = vrot.slane %v634_v12, %v4760_v37 }
  0x77   : > { %v4822_v19 = vcombine.low %v1256_v7, %v1284_v11  ;;  %v4825_v22 = vcombine.high %v1256_v7, %v1284_v11  ;;  %v654_v25 = vrot.slane %v642_v16, %v4760_v37  ;;  %v668_v26 = vrot.slane %v643_v17, %v4760_v37 }
  0x78   : > { %v1347_v24 = vrot.slane %v4818_v15, %v4765_v38  ;;  %v1343_v27 = vrot.slane %v4818_v15, %v4768_v39  ;;  %v696_v30 = vrot.slane %v646_v20, %v4760_v37  ;;  %v1395_v34 = vrot.slane %v4820_v18, %v4765_v38 }
  0x79   : > { %v1371_v29 = vrot.slane %v4822_v19, %v4765_v38  ;;  %v1367_v33 = vrot.slane %v4822_v19, %v4768_v39  ;;  %v4842_v40 = vcombine.low %v654_v25, %v682_v21  ;;  %v1419_v42 = vrot.slane %v4825_v22, %v4765_v38 }
  0x7a   : > { %v1693_v35 = vmul.f32 %v1639_v43, %v1347_v24  ;;  %v1692_v41 = vmul.f32 %v1638_v49, %v1343_v27  ;;  %v4846_v45 = vcombine.low %v668_v26, %v696_v30  ;;  %v1651_v51 = vunpack.c.h.bf16 %v3916_v23 }
  0x7b   : > { %v1699_v44 = vmul.f32 %v1645_v47, %v1371_v29  ;;  %v1698_v46 = vmul.f32 %v1644_v50, %v1367_v33  ;;  %v759_v59 = vrot.slane %v4842_v40, %v4765_v38  ;;  %v755_v60 = vrot.slane %v4842_v40, %v4768_v39 }
  0x7c   : > { %v1657_v43 = vunpack.c.h.bf16 %v3919_v28  ;;  %v4854_v61 = vcombine.high %v654_v25, %v682_v21  ;;  %v783_v62 = vrot.slane %v4846_v45, %v4765_v38  ;;  %v779_v50 = vrot.slane %v4846_v45, %v4768_v39  ;;  %v4284_v25 = vld [vmem:[%s4762_s15 + $0x4] ss:$8 sps:$4 sm:$0xff]  }
  0x7d   : > { %v4031_v49 = vpack.c.bf16 %v1699_v44, %v1693_v35  ;;  %v4033_v47 = vpack.c.bf16 %v1698_v46, %v1692_v41  ;;  %v1104_v1 = vmul.f32 %v1050_v48, %v759_v59  ;;  %v1103_v2 = vmul.f32 %v1049_v53, %v755_v60  ;;  %v4290_v35 = vld [vmem:[%s4762_s15 + $0x24] ss:$8 sps:$4 sm:$0xff]   ;;  %v3925_v44 = vld [vmem:[%s4748_s20 + $0x150] sm:$0xff] }
  0x7e   : > { %v1705_v3 = vmul.f32 %v1651_v51, %v1395_v34  ;;  %v1711_v6 = vmul.f32 %v1657_v43, %v1419_v42  ;;  %v1110_v7 = vmul.f32 %v1056_v13, %v783_v62  ;;  %v1109_v8 = vmul.f32 %v1055_v14, %v779_v50  ;;  %v3922_v34 = vld [vmem:[%s4748_s20 + $0x138] sm:$0xff] }
  0x7f   : > { %4032 = vmatprep.subr.bf16.mxu1 %v4031_v49  ;;  %v4864_v9 = vcombine.high %v668_v26, %v696_v30  ;;  %v807_v10 = vrot.slane %v4854_v61, %v4765_v38  ;;  %v1062_v12 = vunpack.c.h.bf16 %v1028_v52  ;;  %v1068_v16 = vunpack.c.h.bf16 %v1031_v55  ;;  %v4287_v26 = vld [vmem:[%s4762_s15 + $0x14] ss:$8 sps:$4 sm:$0xff]  }
  0x80   : > { %4034 = vmatpush1.bf16.msra.mxu1 %v4033_v47  ;;  %v4035_v11 = vpack.c.bf16 %v1711_v6, %v1705_v3  ;;  %v1391_v36 = vrot.slane %v4820_v18, %v4768_v39  ;;  %v4079_v48 = vpack.c.bf16 %v1110_v7, %v1104_v1  ;;  %v4081_v53 = vpack.c.bf16 %v1109_v8, %v1103_v2  ;;  %v1037_v47 = vld [vmem:[%s4748_s20 + $0x78] sm:$0xff] }
  0x81   : > { %v831_v13 = vrot.slane %v4864_v9, %v4765_v38  ;;  %v1415_v14 = vrot.slane %v4825_v22, %v4768_v39  ;;  %v1116_v17 = vmul.f32 %v1062_v12, %v807_v10  ;;  %v1650_v20 = vunpack.c.l.bf16 %v3916_v23 }
  0x82   : > { %4036 = vmatprep.subr.bf16.mxu1 %v4035_v11  ;;  %v1656_v21 = vunpack.c.l.bf16 %v3919_v28  ;;  %v803_v24 = vrot.slane %v4854_v61, %v4768_v39  ;;  %4080 = vmatprep.subr.bf16.mxu0 %v4079_v48  ;;  %v827_v29 = vrot.slane %v4864_v9, %v4768_v39  ;;  %v1061_v30 = vunpack.c.l.bf16 %v1028_v52 }
  0x83   : > { %v1122_v27 = vmul.f32 %v1068_v16, %v831_v13  ;;  %v1067_v33 = vunpack.c.l.bf16 %v1031_v55  ;;  %4082 = vmatpush1.bf16.msra.mxu0 %v4081_v53  ;;  %v1704_v23 = vmul.f32 %v1650_v20, %v1391_v36  ;;  %v1235_v41 = vcombine.high %v4800_v63, %v4800_v63  ;;  %v1034_v55 = vld [vmem:[%s4748_s20 + $0x60] sm:$0xff] }
  0x84   : > { %v1710_v28 = vmul.f32 %v1656_v21, %v1415_v14  ;;  %v1249_v42 = vrot.slane %v1232_v4, %v4760_v37  ;;  %v1115_v51 = vmul.f32 %v1061_v30, %v803_v24  ;;  %v1263_v52 = vrot.slane %v1233_v5, %v4760_v37  ;;  %v3928_v24 = vld [vmem:[%s4748_s20 + $0x168] sm:$0xff] }
  0x85   : > { %v4083_v46 = vpack.c.bf16 %v1122_v27, %v1116_v17  ;;  %v1121_v59 = vmul.f32 %v1067_v33, %v827_v29  ;;  %v1277_v43 = vrot.slane %v4800_v63, %v4760_v37  ;;  %v1291_v49 = vrot.slane %v1235_v41, %v4760_v37 }
  0x86   : > { %v4037_v60 = vpack.c.bf16 %v1710_v28, %v1704_v23  ;;  %v1663_v62 = vunpack.c.h.bf16 %v3922_v34  ;;  %v1669_v50 = vunpack.c.h.bf16 %v3925_v44  ;;  %v613_v1 = vrot.slane %v4284_v25, %v4760_v37  ;;  %v3931_v23 = vld [vmem:[%s4748_s20 + $0x180] sm:$0xff]  ;;  %v1040_v28 = vld [vmem:[%s4748_s20 + $0x90] sm:$0xff] }
  0x87   : > { %4084 = vmatprep.subr.bf16.mxu0 %v4083_v46  ;;  %v4085_v4 = vpack.c.bf16 %v1121_v59, %v1115_v51  ;;  %v627_v2 = vrot.slane %v4287_v26, %v4760_v37  ;;  %v4900_v3 = vcombine.low %v1249_v42, %v1277_v43  ;;  %v4902_v54 = vcombine.low %v1263_v52, %v1291_v49  ;;  %v1043_v59 = vld [vmem:[%s4748_s20 + $0xa8] sm:$0xff] }
  0x88   : > { %4038 = vmatpush1.bf16.msra.mxu1 %v4037_v60  ;;  %v641_v56 = vrot.slane %v4290_v35, %v4760_v37  ;;  %v1074_v5 = vunpack.c.h.bf16 %v1034_v55  ;;  %v1080_v7 = vunpack.c.h.bf16 %v1037_v47  ;;  %v1662_v8 = vunpack.c.l.bf16 %v3922_v34 }
  0x89   : > { %4086 = vmatpush1.bf16.msra.mxu0 %v4085_v4  ;;  %v644_v63 = vcombine.low %v613_v1, %v627_v2  ;;  %v645_v6 = vcombine.high %v613_v1, %v627_v2  ;;  %v1443_v10 = vrot.slane %v4900_v3, %v4765_v38  ;;  %v1467_v11 = vrot.slane %v4902_v54, %v4765_v38 }
  0x8a   : > { %v647_v12 = vcombine.high %v641_v56, %v641_v56  ;;  %v689_v16 = vrot.slane %v641_v56, %v4760_v37  ;;  %v1439_v53 = vrot.slane %v4900_v3, %v4768_v39  ;;  %v1463_v13 = vrot.slane %v4902_v54, %v4768_v39 }
  0x8b   : > { %v661_v36 = vrot.slane %v644_v63, %v4760_v37  ;;  %v675_v48 = vrot.slane %v645_v6, %v4760_v37  ;;  %v1717_v14 = vmul.f32 %v1663_v62, %v1443_v10  ;;  %v1723_v17 = vmul.f32 %v1669_v50, %v1467_v11  ;;  %v4291_v10 = vld [vmem:[%s4762_s15 + $0x90] ss:$8 sps:$4 sm:$0x11]  }
  0x8c   : > { %v703_v20 = vrot.slane %v647_v12, %v4760_v37  ;;  %v1668_v21 = vunpack.c.l.bf16 %v3925_v44  ;;  %v1716_v26 = vmul.f32 %v1662_v8, %v1439_v53  ;;  %v1073_v27 = vunpack.c.l.bf16 %v1034_v55  ;;  %v4292_v53 = vld [vmem:[%s4762_s15 + $0xa0] ss:$8 sps:$4 sm:$0x11]  }
  0x8d   : > { %v4918_v25 = vcombine.low %v661_v36, %v689_v16  ;;  %v1079_v29 = vunpack.c.l.bf16 %v1037_v47  ;;  %v4039_v30 = vpack.c.bf16 %v1723_v17, %v1717_v14  ;;  %v4922_v35 = vcombine.high %v1249_v42, %v1277_v43 }
  0x8e   : > { %v4920_v33 = vcombine.low %v675_v48, %v703_v20  ;;  %v1722_v34 = vmul.f32 %v1668_v21, %v1463_v13  ;;  %v4930_v46 = vcombine.high %v1263_v52, %v1291_v49  ;;  %v1675_v51 = vunpack.c.h.bf16 %v3928_v24  ;;  %v4293_v13 = vld [vmem:[%s4762_s15 + $0xb0] ss:$8 sps:$4 sm:$0x11]  }
  0x8f   : > { %v855_v41 = vrot.slane %v4918_v25, %v4765_v38  ;;  %v851_v44 = vrot.slane %v4918_v25, %v4768_v39  ;;  %4040 = vmatprep.subr.bf16.mxu1 %v4039_v30  ;;  %v1491_v43 = vrot.slane %v4922_v35, %v4765_v38  ;;  %v1681_v49 = vunpack.c.h.bf16 %v3931_v23 }
  0x90   : > { %v879_v55 = vrot.slane %v4920_v33, %v4765_v38  ;;  %v4041_v60 = vpack.c.bf16 %v1722_v34, %v1716_v26  ;;  %v875_v42 = vrot.slane %v4920_v33, %v4768_v39  ;;  %v1515_v52 = vrot.slane %v4930_v46, %v4765_v38 }
  0x91   : > { %v1128_v62 = vmul.f32 %v1074_v5, %v855_v41  ;;  %v1127_v47 = vmul.f32 %v1073_v27, %v851_v44  ;;  %v1729_v1 = vmul.f32 %v1675_v51, %v1491_v43  ;;  %v4941_v2 = vcombine.high %v661_v36, %v689_v16  ;;  %v3934_v27 = vld [vmem:[%s4748_s20 + $0x198] sm:$0xff]  ;;  %v4968_v43 = vld [vmem:[%s4748_s20 + $0xc0] sm:$0xff] }
  0x92   : > { %v1134_v4 = vmul.f32 %v1080_v7, %v879_v55  ;;  %4042 = vmatpush1.bf16.msra.mxu1 %v4041_v60  ;;  %v1133_v50 = vmul.f32 %v1079_v29, %v875_v42  ;;  %v1735_v56 = vmul.f32 %v1681_v49, %v1515_v52  ;;  %v4943_v63 = vcombine.high %v675_v48, %v703_v20  ;;  %v4294_v29 = vld [vmem:[%s4762_s15 + $0x30] ss:$8 sps:$4 sm:$0x11]  }
  0x93   : > { %v1086_v6 = vunpack.c.h.bf16 %v1040_v28  ;;  %v1092_v8 = vunpack.c.h.bf16 %v1043_v59  ;;  %v903_v12 = vrot.slane %v4941_v2, %v4765_v38  ;;  %v1487_v7 = vrot.slane %v4922_v35, %v4768_v39  ;;  %v4296_v51 = vld [vmem:[%s4762_s15 + $0x50] ss:$8 sps:$4 sm:$0x11]  }
  0x94   : > { %v4087_v5 = vpack.c.bf16 %v1134_v4, %v1128_v62  ;;  %v4089_v11 = vpack.c.bf16 %v1133_v50, %v1127_v47  ;;  %v4043_v16 = vpack.c.bf16 %v1735_v56, %v1729_v1  ;;  %v927_v36 = vrot.slane %v4943_v63, %v4765_v38  ;;  %v3911_v4 = vld [vmem:[%s4748_s20 + $0xe0] sm:$0xff] }
  0x95   : > { %v1511_v48 = vrot.slane %v4930_v46, %v4768_v39  ;;  %v1674_v14 = vunpack.c.l.bf16 %v3928_v24  ;;  %v1140_v17 = vmul.f32 %v1086_v6, %v903_v12  ;;  %v1680_v20 = vunpack.c.l.bf16 %v3931_v23  ;;  %v4295_v24 = vld [vmem:[%s4762_s15 + $0x40] ss:$8 sps:$4 sm:$0x11]  }
  0x96   : > { %4088 = vmatprep.subr.bf16.mxu0 %v4087_v5  ;;  %v899_v21 = vrot.slane %v4941_v2, %v4768_v39  ;;  %v923_v26 = vrot.slane %v4943_v63, %v4768_v39  ;;  %4044 = vmatprep.subr.bf16.mxu1 %v4043_v16  ;;  %v1146_v30 = vmul.f32 %v1092_v8, %v927_v36  ;;  %v1085_v41 = vunpack.c.l.bf16 %v1040_v28  ;;  %v3914_v5 = vld [vmem:[%s4748_s20 + $0xf8] sm:$0xff] }
  0x97   : > { %4090 = vmatpush1.bf16.msra.mxu0 %v4089_v11  ;;  %v1728_v34 = vmul.f32 %v1674_v14, %v1487_v7  ;;  %v1091_v44 = vunpack.c.l.bf16 %v1043_v59  ;;  %v1734_v55 = vmul.f32 %v1680_v20, %v1511_v48  ;;  %v1309_v23 = vrot.slane %v4291_v10, %v4760_v37 }
  0x98   : > { %v1316_v60 = vrot.slane %v4292_v53, %v4760_v37  ;;  %v1323_v42 = vrot.slane %v4293_v13, %v4760_v37  ;;  %v4091_v62 = vpack.c.bf16 %v1146_v30, %v1140_v17  ;;  %v1139_v47 = vmul.f32 %v1085_v41, %v899_v21  ;;  %v1024_v13 = vld [vmem:[%s4748_s20 + $0x10] sm:$0xff] }
  0x99   : > { %v1145_v52 = vmul.f32 %v1091_v44, %v923_v26  ;;  %v1687_v49 = vunpack.c.h.bf16 %v3934_v27  ;;  %v4045_v50 = vpack.c.bf16 %v1734_v55, %v1728_v34  ;;  %v721_v1 = vrot.slane %v4294_v29, %v4760_v37 }
  0x9a   : > { %v1324_v28 = vcombine.low %v1309_v23, %v1316_v60  ;;  %v1338_v59 = vrot.slane %v1323_v42, %v4760_v37  ;;  %4092 = vmatprep.subr.bf16.mxu0 %v4091_v62  ;;  %v728_v6 = vrot.slane %v4295_v24, %v4760_v37  ;;  %v735_v8 = vrot.slane %v4296_v51, %v4760_v37 }
  0x9b   : > { %v4093_v56 = vpack.c.bf16 %v1145_v52, %v1139_v47  ;;  %v1098_v10 = vunpack.c.h.bf16 %v4968_v43  ;;  %4046 = vmatpush1.bf16.msra.mxu1 %v4045_v50  ;;  %v1686_v12 = vunpack.c.l.bf16 %v3934_v27  ;;  %v1097_v7 = vunpack.c.l.bf16 %v4968_v43  ;;  %v1027_v27 = vld [vmem:[%s4748_s20 + $0x28] sm:$0xff] }
  0x9c   : > { %v1331_v11 = vrot.slane %v1324_v28, %v4760_v37  ;;  %v1355_v53 = vrot.slane %v4818_v15, %v4792_v57  ;;  %v736_v16 = vcombine.low %v721_v1, %v728_v6  ;;  %v750_v36 = vrot.slane %v735_v8, %v4760_v37  ;;  %v3917_v6 = vld [vmem:[%s4748_s20 + $0x110] sm:$0xff] }
  0x9d   : > { %4094 = vmatpush1.bf16.msra.mxu0 %v4093_v56  ;;  %v1379_v48 = vrot.slane %v4822_v19, %v4792_v57  ;;  %v1640_v14 = vunpack.c.l.bf16 %v3911_v4  ;;  %v1641_v20 = vunpack.c.h.bf16 %v3911_v4  ;;  %v1646_v21 = vunpack.c.l.bf16 %v3914_v5  ;;  %v5008_v56 = vld [vmem:[%s5616_s2] sm:$0xff] }
  0x9e   : > { %v4985_v17 = vcombine.low %v1331_v11, %v1338_v59  ;;  %v1647_v26 = vunpack.c.h.bf16 %v3914_v5  ;;  %v743_v29 = vrot.slane %v736_v16, %v4760_v37  ;;  %v775_v30 = vrot.slane %v4842_v40, %v4795_v58 }
  0x9f   : > { %v799_v34 = vrot.slane %v4846_v45, %v4795_v58  ;;  %v1053_v41 = vunpack.c.l.bf16 %v1024_v13  ;;  %v1695_v51 = vmul.f32 %v1641_v20, %v1355_v53  ;;  %v1054_v60 = vunpack.c.h.bf16 %v1024_v13 }
  0xa0   : > { %v1539_v44 = vrot.slane %v4985_v17, %v4765_v38  ;;  %v1535_v24 = vrot.slane %v4985_v17, %v4768_v39  ;;  %v1701_v55 = vmul.f32 %v1647_v26, %v1379_v48  ;;  %v4997_v23 = vcombine.low %v743_v29, %v750_v36 }
  0xa1   : > { %v1059_v42 = vunpack.c.l.bf16 %v1027_v27  ;;  %v1060_v43 = vunpack.c.h.bf16 %v1027_v27  ;;  %v1351_v4 = vrot.slane %v4818_v15, %v4803_v0  ;;  %v1108_v59 = vmul.f32 %v1054_v60, %v775_v30  ;;  %v1033_v30 = vld [vmem:[%s4748_s20 + $0x58] sm:$0xff] }
  0xa2   : > { %v1741_v62 = vmul.f32 %v1687_v49, %v1539_v44  ;;  %v1740_v47 = vmul.f32 %v1686_v12, %v1535_v24  ;;  %v4047_v52 = vpack.c.bf16 %v1701_v55, %v1695_v51  ;;  %v951_v50 = vrot.slane %v4997_v23, %v4765_v38  ;;  %v3920_v12 = vld [vmem:[%s4748_s20 + $0x128] sm:$0xff] }
  0xa3   : > { %v947_v28 = vrot.slane %v4997_v23, %v4768_v39  ;;  %v1114_v1 = vmul.f32 %v1060_v43, %v799_v34  ;;  %v1375_v49 = vrot.slane %v4822_v19, %v4803_v0  ;;  %v1694_v8 = vmul.f32 %v1640_v14, %v1351_v4 }
  0xa4   : > { %1766 = vmatprep.subr.mxu1 %v1741_v62  ;;  %v5014_v5 = vsub.s32 4, %v4746_v32  ;;  %v1403_v11 = vrot.slane %v4820_v18, %v4792_v57  ;;  %v1152_v53 = vmul.f32 %v1098_v10, %v951_v50  ;;  %v1427_v36 = vrot.slane %v4825_v22, %v4792_v57  ;;  %v1030_v10 = vld [vmem:[%s4748_s20 + $0x40] sm:$0xff] }
  0xa5   : > { %1767 = vmatpush1.msra.mxu1 %v1740_v47  ;;  %v1151_v13 = vmul.f32 %v1097_v7, %v947_v28  ;;  %v4111_v16 = vpack.c.bf16 %v1114_v1, %v1108_v59  ;;  %v1700_v48 = vmul.f32 %v1646_v21, %v1375_v49  ;;  %v1652_v20 = vunpack.c.l.bf16 %v3917_v6  ;;  %v3926_v1 = vld [vmem:[%s4748_s20 + $0x158] sm:$0xff] }
  0xa6   : > { %4048 = vmatprep.subr.bf16.mxu1 %v4047_v52  ;;  %3937 = vmatmul.mubr.msk.f32.vlgmr.msra.gmra.mrb[0].mxu1 %vm1746_vm0, %v5008_v56  ;;  %v771_v32 = vrot.slane %v4842_v40, %v5014_v5  ;;  %v795_v14 = vrot.slane %v4846_v45, %v5014_v5  ;;  %v1653_v26 = vunpack.c.h.bf16 %v3917_v6  ;;  %v1658_v7 = vunpack.c.l.bf16 %v3920_v12 }
  0xa7   : > { %1979 = vmatprep.subr.mxu0 %v1152_v53  ;;  %v1659_v27 = vunpack.c.h.bf16 %v3920_v12  ;;  %v823_v29 = vrot.slane %v4854_v61, %v4795_v58  ;;  %1885 = vmatprep.mubr.f32.mxu1 %v4347_v31  ;;  %v4049_v21 = vpack.c.bf16 %v1700_v48, %v1694_v8  ;;  %v847_v24 = vrot.slane %v4864_v9, %v4795_v58 }
  0xa8   : > { %1980 = vmatpush1.msra.mxu0 %v1151_v13  ;;  %v1107_v34 = vmul.f32 %v1053_v41, %v771_v32  ;;  %v1113_v44 = vmul.f32 %v1059_v42, %v795_v14  ;;  %v1707_v51 = vmul.f32 %v1653_v26, %v1403_v11  ;;  %v1065_v60 = vunpack.c.l.bf16 %v1030_v10  ;;  %v3923_v42 = vld [vmem:[%s4748_s20 + $0x140] sm:$0xff]  ;;  %v1039_v26 = vld [vmem:[%s4748_s20 + $0x88] sm:$0xff] }
  0xa9   : > { %4112 = vmatprep.subr.bf16.mxu0 %v4111_v16  ;;  %3940 = vmatmul.mubr.msk.f32.vlgmr.msra.gmra.mrb[0].mxu0 %vm1746_vm0, %v5008_v56  ;;  %v1713_v55 = vmul.f32 %v1659_v27, %v1427_v36  ;;  %v1066_v43 = vunpack.c.h.bf16 %v1030_v10  ;;  %v1071_v47 = vunpack.c.l.bf16 %v1033_v30  ;;  %v1072_v52 = vunpack.c.h.bf16 %v1033_v30  ;;  %v1036_v36 = vld [vmem:[%s4748_s20 + $0x70] sm:$0xff] }
  0xaa   : > { %4050 = vmatpush1.bf16.msra.mxu1 %v4049_v21  ;;  %v4113_v62 = vpack.c.bf16 %v1113_v44, %v1107_v34  ;;  %v1399_v41 = vrot.slane %v4820_v18, %v4803_v0  ;;  %2169 = vmatprep.mubr.f32.mxu0 %v4347_v31  ;;  %v1423_v28 = vrot.slane %v4825_v22, %v4803_v0  ;;  %v1664_v16 = vunpack.c.l.bf16 %v3923_v42 }
  0xab   : > { %v4051_v4 = vpack.c.bf16 %v1713_v55, %v1707_v51  ;;  %v1120_v50 = vmul.f32 %v1066_v43, %v823_v29  ;;  %v819_v59 = vrot.slane %v4854_v61, %v5014_v5  ;;  %v1126_v6 = vmul.f32 %v1072_v52, %v847_v24 }
  0xac   : > { %4114 = vmatpush1.bf16.msra.mxu0 %v4113_v62  ;;  %v1706_v49 = vmul.f32 %v1652_v20, %v1399_v41  ;;  %v843_v8 = vrot.slane %v4864_v9, %v5014_v5  ;;  %v1451_v11 = vrot.slane %v4900_v3, %v4792_v57  ;;  %v1712_v12 = vmul.f32 %v1658_v7, %v1423_v28  ;;  %v3929_v41 = vld [vmem:[%s4748_s20 + $0x170] sm:$0xff] }
  0xad   : > { %4052 = vmatprep.subr.bf16.mxu1 %v4051_v4  ;;  %v1119_v53 = vmul.f32 %v1065_v60, %v819_v59  ;;  %v1475_v13 = vrot.slane %v4902_v54, %v4792_v57  ;;  %v4115_v48 = vpack.c.bf16 %v1126_v6, %v1120_v50  ;;  %v1665_v14 = vunpack.c.h.bf16 %v3923_v42  ;;  %v3932_v42 = vld [vmem:[%s4748_s20 + $0x188] sm:$0xff] }
  0xae   : > { %v1125_v32 = vmul.f32 %v1071_v47, %v843_v8  ;;  %v1670_v10 = vunpack.c.l.bf16 %v3926_v1  ;;  %v4053_v20 = vpack.c.bf16 %v1712_v12, %v1706_v49  ;;  %v1671_v27 = vunpack.c.h.bf16 %v3926_v1 }
  0xaf   : > { %v871_v29 = vrot.slane %v4918_v25, %v4795_v58  ;;  %v895_v30 = vrot.slane %v4920_v33, %v4795_v58  ;;  %4116 = vmatprep.subr.bf16.mxu0 %v4115_v48  ;;  %v1719_v21 = vmul.f32 %v1665_v14, %v1451_v11  ;;  %v1077_v34 = vunpack.c.l.bf16 %v1036_v36  ;;  %v1042_v11 = vld [vmem:[%s4748_s20 + $0xa0] sm:$0xff]  ;;  %v1045_v48 = vld [vmem:[%s4748_s20 + $0xb8] sm:$0xff] }
  0xb0   : > { %v4117_v7 = vpack.c.bf16 %v1125_v32, %v1119_v53  ;;  %v1078_v44 = vunpack.c.h.bf16 %v1036_v36  ;;  %4054 = vmatpush1.bf16.msra.mxu1 %v4053_v20  ;;  %v1725_v24 = vmul.f32 %v1671_v27, %v1475_v13  ;;  %v1083_v51 = vunpack.c.l.bf16 %v1039_v26 }
  0xb1   : > { %v1084_v55 = vunpack.c.h.bf16 %v1039_v26  ;;  %v1447_v60 = vrot.slane %v4900_v3, %v4803_v0  ;;  %v1471_v62 = vrot.slane %v4902_v54, %v4803_v0  ;;  %v867_v47 = vrot.slane %v4918_v25, %v5014_v5 }
  0xb2   : > { %4118 = vmatpush1.bf16.msra.mxu0 %v4117_v7  ;;  %v1132_v43 = vmul.f32 %v1078_v44, %v871_v29  ;;  %v891_v52 = vrot.slane %v4920_v33, %v5014_v5  ;;  %v4055_v4 = vpack.c.bf16 %v1725_v24, %v1719_v21  ;;  %v1499_v59 = vrot.slane %v4922_v35, %v4792_v57  ;;  %v3935_v44 = vld [vmem:[%s4748_s20 + $0x1a0] sm:$0xff] }
  0xb3   : > { %v1138_v50 = vmul.f32 %v1084_v55, %v895_v30  ;;  %v1718_v28 = vmul.f32 %v1664_v16, %v1447_v60  ;;  %v1724_v1 = vmul.f32 %v1670_v10, %v1471_v62  ;;  %v1131_v6 = vmul.f32 %v1077_v34, %v867_v47 }
  0xb4   : > { %v1137_v49 = vmul.f32 %v1083_v51, %v891_v52  ;;  %v1523_v8 = vrot.slane %v4930_v46, %v4792_v57  ;;  %4056 = vmatprep.subr.bf16.mxu1 %v4055_v4  ;;  %v1676_v53 = vunpack.c.l.bf16 %v3929_v41  ;;  %v1677_v13 = vunpack.c.h.bf16 %v3929_v41 }
  0xb5   : > { %v4119_v12 = vpack.c.bf16 %v1138_v50, %v1132_v43  ;;  %v1682_v36 = vunpack.c.l.bf16 %v3932_v42  ;;  %v4057_v32 = vpack.c.bf16 %v1724_v1, %v1718_v28  ;;  %v1683_v16 = vunpack.c.h.bf16 %v3932_v42  ;;  %v1048_v43 = vld [vmem:[%s4748_s20 + $0xd0] sm:$0xff] }
  0xb6   : > { %v4121_v14 = vpack.c.bf16 %v1137_v49, %v1131_v6  ;;  %v919_v26 = vrot.slane %v4941_v2, %v4795_v58  ;;  %v1731_v10 = vmul.f32 %v1677_v13, %v1499_v59  ;;  %v943_v20 = vrot.slane %v4943_v63, %v4795_v58 }
  0xb7   : > { %4120 = vmatprep.subr.bf16.mxu0 %v4119_v12  ;;  %v1089_v27 = vunpack.c.l.bf16 %v1042_v11  ;;  %v1090_v29 = vunpack.c.h.bf16 %v1042_v11  ;;  %4058 = vmatpush1.bf16.msra.mxu1 %v4057_v32  ;;  %v1737_v30 = vmul.f32 %v1683_v16, %v1523_v8  ;;  %v1095_v7 = vunpack.c.l.bf16 %v1045_v48  ;;  %v3912_v8 = vld [vmem:[%s4748_s20 + $0xe8] sm:$0xff]  ;;  %v4299_v32 = vld [vmem:[%s4762_s15 + $0xd0] ss:$8 sps:$4 sm:$0xff]  }
  0xb8   : > { %4122 = vmatpush1.bf16.msra.mxu0 %v4121_v14  ;;  %v1096_v21 = vunpack.c.h.bf16 %v1045_v48  ;;  %v1495_v34 = vrot.slane %v4922_v35, %v4803_v0  ;;  %v1519_v51 = vrot.slane %v4930_v46, %v4803_v0  ;;  %v915_v55 = vrot.slane %v4941_v2, %v5014_v5  ;;  %v4297_v11 = vld [vmem:[%s4762_s15 + $0xc0] ss:$8 sps:$4 sm:$0xff]  }
  0xb9   : > { %v1144_v24 = vmul.f32 %v1090_v29, %v919_v26  ;;  %v939_v60 = vrot.slane %v4943_v63, %v5014_v5  ;;  %v4059_v62 = vpack.c.bf16 %v1737_v30, %v1731_v10  ;;  %v1547_v41 = vrot.slane %v4985_v17, %v4792_v57  ;;  %v3915_v48 = vld [vmem:[%s4748_s20 + $0x100] sm:$0xff] }
  0xba   : > { %v1150_v47 = vmul.f32 %v1096_v21, %v943_v20  ;;  %v1730_v52 = vmul.f32 %v1676_v53, %v1495_v34  ;;  %v1736_v42 = vmul.f32 %v1682_v36, %v1519_v51  ;;  %v1143_v4 = vmul.f32 %v1089_v27, %v915_v55  ;;  %v4301_v14 = vld [vmem:[%s4762_s15 + $0xe0] ss:$8 sps:$4 sm:$0xff]   ;;  %v5105_v27 = vld [vmem:[%s4748_s20 + $0x1b0] sm:$0xff] }
  0xbb   : > { %v1149_v50 = vmul.f32 %v1095_v7, %v939_v60  ;;  %v1688_v28 = vunpack.c.l.bf16 %v3935_v44  ;;  %4060 = vmatprep.subr.bf16.mxu1 %v4059_v62  ;;  %v1689_v1 = vunpack.c.h.bf16 %v3935_v44  ;;  %v967_v6 = vrot.slane %v4997_v23, %v4795_v58  ;;  %v5108_v34 = vld [vmem:[%s4748_s20 + $0x1c8] sm:$0xff]  ;;  %v5112_v60 = vld [vmem:[%s4748_s20 + $0x118] sm:$0xff] }
  0xbc   : > { %v4123_v59 = vpack.c.bf16 %v1150_v47, %v1144_v24  ;;  %v1101_v49 = vunpack.c.l.bf16 %v1048_v43  ;;  %v4061_v12 = vpack.c.bf16 %v1736_v42, %v1730_v52  ;;  %v1102_v13 = vunpack.c.h.bf16 %v1048_v43 }
  0xbd   : > { %v4125_v53 = vpack.c.bf16 %v1149_v50, %v1143_v4  ;;  %v1543_v36 = vrot.slane %v4985_v17, %v4803_v0  ;;  %v1743_v16 = vmul.f32 %v1689_v1, %v1547_v41  ;;  %v963_v26 = vrot.slane %v4997_v23, %v5014_v5 }
  0xbe   : > { %4124 = vmatprep.subr.bf16.mxu0 %v4123_v59  ;;  %v1363_v10 = vrot.slane %v4818_v15, %v4795_v58  ;;  %v1387_v20 = vrot.slane %v4822_v19, %v4795_v58  ;;  %4062 = vmatpush1.bf16.msra.mxu1 %v4061_v12  ;;  %v1156_v29 = vmul.f32 %v1102_v13, %v967_v6  ;;  %v1642_v7 = vunpack.c.l.bf16 %v3912_v8 }
  0xbf   : > { %4126 = vmatpush1.bf16.msra.mxu0 %v4125_v53  ;;  %v1742_v30 = vmul.f32 %v1688_v28, %v1543_v36  ;;  %v1643_v21 = vunpack.c.h.bf16 %v3912_v8  ;;  %1837 = vmatprep.subr.mxu1 %v1743_v16  ;;  %v1155_v44 = vmul.f32 %v1101_v49, %v963_v26  ;;  %v1648_v24 = vunpack.c.l.bf16 %v3915_v48  ;;  %v3921_v53 = vld [vmem:[%s4748_s20 + $0x130] sm:$0xff] }
  0xc0   : > { %v1649_v51 = vunpack.c.h.bf16 %v3915_v48  ;;  %v2213_v55 = vrot.slane %v4297_v11, %v4760_v37  ;;  %2121 = vmatprep.subr.mxu0 %v1156_v29  ;;  %v2227_v62 = vrot.slane %v4299_v32, %v4760_v37  ;;  %v2241_v47 = vrot.slane %v4301_v14, %v4760_v37  ;;  %v3961_v29 = vld [vmem:[%s4748_s20 + $0x1e0] sm:$0xff] }
  0xc1   : > { %v1697_v43 = vmul.f32 %v1643_v21, %v1363_v10  ;;  %v2657_v52 = vunpack.c.l.bf16 %v5105_v27  ;;  %v2658_v42 = vunpack.c.h.bf16 %v5105_v27  ;;  %v2663_v4 = vunpack.c.l.bf16 %v5108_v34 }
  0xc2   : > { %v1703_v41 = vmul.f32 %v1649_v51, %v1387_v20  ;;  %v2664_v50 = vunpack.c.h.bf16 %v5108_v34  ;;  %1838 = vmatpush1.msra.mxu1 %v1742_v30  ;;  %v2249_v28 = vcombine.low %v2213_v55, %v2227_v62  ;;  %v2250_v59 = vcombine.high %v2213_v55, %v2227_v62 }
  0xc3   : > { %2122 = vmatpush1.msra.mxu0 %v1155_v44  ;;  %v2253_v1 = vcombine.high %v2241_v47, %v2241_v47  ;;  %v1654_v6 = vunpack.c.l.bf16 %v5112_v60  ;;  %v2289_v8 = vrot.slane %v2241_v47, %v4760_v37  ;;  %3938 = vmatmul.mubr.msk.f32.vlgmr.msra.gmra.mrb[2].mxu1 %vm1746_vm0, %v5008_v56  ;;  %v1359_v11 = vrot.slane %v4818_v15, %v5014_v5 }
  0xc4   : > { %v4063_v49 = vpack.c.bf16 %v1703_v41, %v1697_v43  ;;  %v1383_v12 = vrot.slane %v4822_v19, %v5014_v5  ;;  %v2261_v13 = vrot.slane %v2249_v28, %v4760_v37  ;;  %v2275_v36 = vrot.slane %v2250_v59, %v4760_v37  ;;  %3942 = vmatmul.mubr.msk.f32.vlgmr.msra.gmra.mrb[2].mxu0 %vm1746_vm0, %v5008_v56 }
  0xc5   : > { %v2303_v48 = vrot.slane %v2253_v1, %v4760_v37  ;;  %v1411_v32 = vrot.slane %v4820_v18, %v4795_v58  ;;  %v1696_v14 = vmul.f32 %v1642_v7, %v1359_v11  ;;  %v1435_v19 = vrot.slane %v4825_v22, %v4795_v58  ;;  %1956 = vmatprep.mubr.f32.mxu1 %v4347_v31 }
  0xc6   : > { %4064 = vmatprep.subr.bf16.mxu1 %v4063_v49  ;;  %v1702_v15 = vmul.f32 %v1648_v24, %v1383_v12  ;;  %v1655_v16 = vunpack.c.h.bf16 %v5112_v60  ;;  %v5140_v26 = vcombine.low %v2261_v13, %v2289_v8  ;;  %v1660_v20 = vunpack.c.l.bf16 %v3921_v53  ;;  %2829 = vmatprep.mubr.f32.mxu0 %v4347_v31  ;;  %v3964_v60 = vld [vmem:[%s4748_s20 + $0x1f8] sm:$0xff] }
  0xc7   : > { %v5142_v10 = vcombine.low %v2275_v36, %v2303_v48  ;;  %v1661_v27 = vunpack.c.h.bf16 %v3921_v53  ;;  %v5146_v21 = vcombine.high %v2261_v13, %v2289_v8  ;;  %v5148_v34 = vcombine.high %v2275_v36, %v2303_v48 }
  0xc8   : > { %v4065_v30 = vpack.c.bf16 %v1702_v15, %v1696_v14  ;;  %v1709_v7 = vmul.f32 %v1655_v16, %v1411_v32  ;;  %v2366_v44 = vrot.slane %v5140_v26, %v4765_v38  ;;  %v2362_v51 = vrot.slane %v5140_v26, %v4768_v39  ;;  %v3924_v14 = vld [vmem:[%s4748_s20 + $0x148] sm:$0xff]  ;;  %v4304_v16 = vld [vmem:[%s4762_s15 + $0xd4] ss:$8 sps:$4 sm:$0xff]  }
  0xc9   : > { %v2390_v24 = vrot.slane %v5142_v10, %v4765_v38  ;;  %v2386_v55 = vrot.slane %v5142_v10, %v4768_v39  ;;  %v1715_v43 = vmul.f32 %v1661_v27, %v1435_v19  ;;  %v2414_v62 = vrot.slane %v5146_v21, %v4765_v38  ;;  %v4303_v19 = vld [vmem:[%s4762_s15 + $0xc4] ss:$8 sps:$4 sm:$0xff]  }
  0xca   : > { %4066 = vmatpush1.bf16.msra.mxu1 %v4065_v30  ;;  %v2438_v47 = vrot.slane %v5148_v34, %v4765_v38  ;;  %v2669_v41 = vunpack.c.l.bf16 %v3961_v29  ;;  %v2712_v28 = vmul.f32 %v2658_v42, %v2366_v44  ;;  %v2711_v1 = vmul.f32 %v2657_v52, %v2362_v51  ;;  %v3927_v42 = vld [vmem:[%s4748_s20 + $0x160] sm:$0xff] }
  0xcb   : > { %v2718_v59 = vmul.f32 %v2664_v50, %v2390_v24  ;;  %v2717_v49 = vmul.f32 %v2663_v4, %v2386_v55  ;;  %v4067_v8 = vpack.c.bf16 %v1715_v43, %v1709_v7  ;;  %v2670_v11 = vunpack.c.h.bf16 %v3961_v29  ;;  %v4305_v27 = vld [vmem:[%s4762_s15 + $0xe4] ss:$8 sps:$4 sm:$0xff]   ;;  %v3967_v55 = vld [vmem:[%s4748_s20 + $0x210] sm:$0xff] }
  0xcc   : > { %v2675_v12 = vunpack.c.l.bf16 %v3964_v60  ;;  %v2676_v53 = vunpack.c.h.bf16 %v3964_v60  ;;  %v1407_v48 = vrot.slane %v4820_v18, %v5014_v5  ;;  %v1431_v32 = vrot.slane %v4825_v22, %v5014_v5 }
  0xcd   : > { %v4127_v13 = vpack.c.bf16 %v2718_v59, %v2712_v28  ;;  %v4129_v36 = vpack.c.bf16 %v2717_v49, %v2711_v1  ;;  %4068 = vmatprep.subr.bf16.mxu1 %v4067_v8  ;;  %v2724_v52 = vmul.f32 %v2670_v11, %v2414_v62  ;;  %v2410_v50 = vrot.slane %v5146_v21, %v4768_v39  ;;  %v3970_v1 = vld [vmem:[%s4748_s20 + $0x228] sm:$0xff] }
  0xce   : > { %v2730_v4 = vmul.f32 %v2676_v53, %v2438_v47  ;;  %v2434_v15 = vrot.slane %v5148_v34, %v4768_v39  ;;  %v1708_v18 = vmul.f32 %v1654_v6, %v1407_v48  ;;  %v1714_v29 = vmul.f32 %v1660_v20, %v1431_v32  ;;  %v3930_v48 = vld [vmem:[%s4748_s20 + $0x178] sm:$0xff] }
  0xcf   : > { %4128 = vmatprep.subr.bf16.mxu0 %v4127_v13  ;;  %v1459_v22 = vrot.slane %v4900_v3, %v4795_v58  ;;  %v1483_v30 = vrot.slane %v4902_v54, %v4795_v58  ;;  %v2723_v44 = vmul.f32 %v2669_v41, %v2410_v50  ;;  %v1666_v51 = vunpack.c.l.bf16 %v3924_v14 }
  0xd0   : > { %4130 = vmatpush1.bf16.msra.mxu0 %v4129_v36  ;;  %v4131_v7 = vpack.c.bf16 %v2730_v4, %v2724_v52  ;;  %v2729_v24 = vmul.f32 %v2675_v12, %v2434_v15  ;;  %v4069_v60 = vpack.c.bf16 %v1714_v29, %v1708_v18  ;;  %v1667_v43 = vunpack.c.h.bf16 %v3924_v14 }
  0xd1   : > { %v1672_v62 = vunpack.c.l.bf16 %v3927_v42  ;;  %v1673_v47 = vunpack.c.h.bf16 %v3927_v42  ;;  %v2220_v20 = vrot.slane %v4303_v19, %v4760_v37  ;;  %v2234_v28 = vrot.slane %v4304_v16, %v4760_v37  ;;  %v3933_v16 = vld [vmem:[%s4748_s20 + $0x190] sm:$0xff] }
  0xd2   : > { %4132 = vmatprep.subr.bf16.mxu0 %v4131_v7  ;;  %v4133_v6 = vpack.c.bf16 %v2729_v24, %v2723_v44  ;;  %v2248_v59 = vrot.slane %v4305_v27, %v4760_v37  ;;  %4070 = vmatpush1.bf16.msra.mxu1 %v4069_v60  ;;  %v1721_v49 = vmul.f32 %v1667_v43, %v1459_v22  ;;  %v2681_v8 = vunpack.c.l.bf16 %v3967_v55 }
  0xd3   : > { %v1727_v41 = vmul.f32 %v1673_v47, %v1483_v30  ;;  %v2682_v11 = vunpack.c.h.bf16 %v3967_v55  ;;  %v2251_v12 = vcombine.low %v2220_v20, %v2234_v28  ;;  %v2252_v53 = vcombine.high %v2220_v20, %v2234_v28  ;;  %v3973_v20 = vld [vmem:[%s4748_s20 + $0x240] sm:$0xff] }
  0xd4   : > { %4134 = vmatpush1.bf16.msra.mxu0 %v4133_v6  ;;  %v2254_v13 = vcombine.high %v2248_v59, %v2248_v59  ;;  %v2296_v36 = vrot.slane %v2248_v59, %v4760_v37  ;;  %v2687_v14 = vunpack.c.l.bf16 %v3970_v1  ;;  %v2688_v42 = vunpack.c.h.bf16 %v3970_v1 }
  0xd5   : > { %v4071_v32 = vpack.c.bf16 %v1727_v41, %v1721_v49  ;;  %v1455_v52 = vrot.slane %v4900_v3, %v5014_v5  ;;  %v2268_v4 = vrot.slane %v2251_v12, %v4760_v37  ;;  %v2282_v50 = vrot.slane %v2252_v53, %v4760_v37  ;;  %v3976_v49 = vld [vmem:[%s4748_s20 + $0x258] sm:$0xff] }
  0xd6   : > { %v2310_v15 = vrot.slane %v2254_v13, %v4760_v37  ;;  %v1479_v19 = vrot.slane %v4902_v54, %v5014_v5  ;;  %v1507_v18 = vrot.slane %v4922_v35, %v4795_v58  ;;  %v1531_v29 = vrot.slane %v4930_v46, %v4795_v58 }
  0xd7   : > { %4072 = vmatprep.subr.bf16.mxu1 %v4071_v32  ;;  %v1720_v27 = vmul.f32 %v1666_v51, %v1455_v52  ;;  %v1678_v3 = vunpack.c.l.bf16 %v3930_v48  ;;  %v5199_v22 = vcombine.low %v2268_v4, %v2296_v36  ;;  %v1679_v44 = vunpack.c.h.bf16 %v3930_v48 }
  0xd8   : > { %v5201_v30 = vcombine.low %v2282_v50, %v2310_v15  ;;  %v1726_v7 = vmul.f32 %v1672_v62, %v1479_v19  ;;  %v1684_v24 = vunpack.c.l.bf16 %v3933_v16  ;;  %v1685_v54 = vunpack.c.h.bf16 %v3933_v16 }
  0xd9   : > { %v5203_v55 = vcombine.high %v2268_v4, %v2296_v36  ;;  %v5205_v51 = vcombine.high %v2282_v50, %v2310_v15  ;;  %v2462_v60 = vrot.slane %v5199_v22, %v4765_v38  ;;  %v2458_v6 = vrot.slane %v5199_v22, %v4768_v39  ;;  %v3936_v4 = vld [vmem:[%s4748_s20 + $0x1a8] sm:$0xff] }
  0xda   : > { %v2486_v43 = vrot.slane %v5201_v30, %v4765_v38  ;;  %v4073_v47 = vpack.c.bf16 %v1726_v7, %v1720_v27  ;;  %v2482_v62 = vrot.slane %v5201_v30, %v4768_v39  ;;  %v1733_v28 = vmul.f32 %v1679_v44, %v1507_v18 }
  0xdb   : > { %v1739_v59 = vmul.f32 %v1685_v54, %v1531_v29  ;;  %v2510_v1 = vrot.slane %v5203_v55, %v4765_v38  ;;  %v2736_v41 = vmul.f32 %v2682_v11, %v2462_v60  ;;  %v2735_v53 = vmul.f32 %v2681_v8, %v2458_v6  ;;  %v4306_v11 = vld [vmem:[%s4762_s15 + $0xf0] ss:$8 sps:$4 sm:$0x11]  }
  0xdc   : > { %v2742_v12 = vmul.f32 %v2688_v42, %v2486_v43  ;;  %4074 = vmatpush1.bf16.msra.mxu1 %v4073_v47  ;;  %v2534_v13 = vrot.slane %v5205_v51, %v4765_v38  ;;  %v2741_v36 = vmul.f32 %v2687_v14, %v2482_v62  ;;  %v2693_v32 = vunpack.c.l.bf16 %v3973_v20  ;;  %v4307_v42 = vld [vmem:[%s4762_s15 + $0x100] ss:$8 sps:$4 sm:$0x11]   ;;  %v4308_v29 = vld [vmem:[%s4762_s15 + $0x110] ss:$8 sps:$4 sm:$0x11]  }
  0xdd   : > { %v4075_v48 = vpack.c.bf16 %v1739_v59, %v1733_v28  ;;  %v2694_v52 = vunpack.c.h.bf16 %v3973_v20  ;;  %v2699_v15 = vunpack.c.l.bf16 %v3976_v49  ;;  %v2700_v19 = vunpack.c.h.bf16 %v3976_v49  ;;  %v3979_v60 = vld [vmem:[%s4748_s20 + $0x270] sm:$0xff]  ;;  %v1023_v59 = vld [vmem:[%s4748_s20 + $0x8] sm:$0xff] }
  0xde   : > { %v4135_v50 = vpack.c.bf16 %v2742_v12, %v2736_v41  ;;  %v1503_v16 = vrot.slane %v4922_v35, %v5014_v5  ;;  %v4137_v27 = vpack.c.bf16 %v2741_v36, %v2735_v53  ;;  %v1527_v14 = vrot.slane %v4930_v46, %v5014_v5  ;;  %v1026_v53 = vld [vmem:[%s4748_s20 + $0x20] sm:$0xff] }
  0xdf   : > { %4076 = vmatprep.subr.bf16.mxu1 %v4075_v48  ;;  %v2748_v8 = vmul.f32 %v2694_v52, %v2510_v1  ;;  %v2506_v18 = vrot.slane %v5203_v55, %v4768_v39  ;;  %v2754_v7 = vmul.f32 %v2700_v19, %v2534_v13  ;;  %v2530_v54 = vrot.slane %v5205_v51, %v4768_v39  ;;  %v3960_v19 = vld [vmem:[%s4748_s20 + $0x1d8] sm:$0xff] }
  0xe0   : > { %4136 = vmatprep.subr.bf16.mxu0 %v4135_v50  ;;  %v1732_v44 = vmul.f32 %v1678_v3, %v1503_v16  ;;  %v1555_v35 = vrot.slane %v4985_v17, %v4795_v58  ;;  %v1738_v43 = vmul.f32 %v1684_v24, %v1527_v14  ;;  %v1690_v46 = vunpack.c.l.bf16 %v3936_v4 }
  0xe1   : > { %4138 = vmatpush1.bf16.msra.mxu0 %v4137_v27  ;;  %v2747_v47 = vmul.f32 %v2693_v32, %v2506_v18  ;;  %v1691_v6 = vunpack.c.h.bf16 %v3936_v4  ;;  %v4139_v20 = vpack.c.bf16 %v2754_v7, %v2748_v8  ;;  %v2753_v62 = vmul.f32 %v2699_v15, %v2530_v54  ;;  %v3957_v32 = vld [vmem:[%s4748_s20 + $0x1c0] sm:$0xff] }
  0xe2   : > { %v2328_v28 = vrot.slane %v4306_v11, %v4760_v37  ;;  %v2335_v3 = vrot.slane %v4307_v42, %v4760_v37  ;;  %v4077_v1 = vpack.c.bf16 %v1738_v43, %v1732_v44  ;;  %v2342_v41 = vrot.slane %v4308_v29, %v4760_v37 }
  0xe3   : > { %v1745_v49 = vmul.f32 %v1691_v6, %v1555_v35  ;;  %v2705_v12 = vunpack.c.l.bf16 %v3979_v60  ;;  %4140 = vmatprep.subr.bf16.mxu0 %v4139_v20  ;;  %v4141_v24 = vpack.c.bf16 %v2753_v62, %v2747_v47  ;;  %v2706_v36 = vunpack.c.h.bf16 %v3979_v60 }
  0xe4   : > { %v2343_v13 = vcombine.low %v2328_v28, %v2335_v3  ;;  %v1551_v48 = vrot.slane %v4985_v17, %v5014_v5  ;;  %4078 = vmatpush1.bf16.msra.mxu1 %v4077_v1  ;;  %v2357_v52 = vrot.slane %v2342_v41, %v4760_v37  ;;  %v767_v4 = vrot.slane %v4842_v40, %v4792_v57  ;;  %v1032_v1 = vld [vmem:[%s4748_s20 + $0x50] sm:$0xff] }
  0xe5   : > { %v791_v50 = vrot.slane %v4846_v45, %v4792_v57  ;;  %v1051_v15 = vunpack.c.l.bf16 %v1023_v59  ;;  %4142 = vmatpush1.bf16.msra.mxu0 %v4141_v24  ;;  %1908 = vmatprep.subr.mxu1 %v1745_v49  ;;  %v1052_v42 = vunpack.c.h.bf16 %v1023_v59  ;;  %v1057_v27 = vunpack.c.l.bf16 %v1026_v53 }
  0xe6   : > { %v2350_v16 = vrot.slane %v2343_v13, %v4760_v37  ;;  %v1744_v11 = vmul.f32 %v1690_v46, %v1551_v48  ;;  %v1058_v17 = vunpack.c.h.bf16 %v1026_v53  ;;  %v2382_v8 = vrot.slane %v5140_v26, %v4795_v58  ;;  %v3963_v13 = vld [vmem:[%s4748_s20 + $0x1f0] sm:$0xff] }
  0xe7   : > { %v2406_v14 = vrot.slane %v5142_v10, %v4795_v58  ;;  %v2661_v18 = vunpack.c.l.bf16 %v3957_v32  ;;  %v1106_v7 = vmul.f32 %v1052_v42, %v767_v4  ;;  %v2662_v44 = vunpack.c.h.bf16 %v3957_v32 }
  0xe8   : > { %v5255_v29 = vcombine.low %v2350_v16, %v2357_v52  ;;  %v2667_v54 = vunpack.c.l.bf16 %v3960_v19  ;;  %1909 = vmatpush1.msra.mxu1 %v1744_v11  ;;  %v1112_v35 = vmul.f32 %v1058_v17, %v791_v50  ;;  %v2668_v60 = vunpack.c.h.bf16 %v3960_v19  ;;  %v3966_v50 = vld [vmem:[%s4748_s20 + $0x208] sm:$0xff] }
  0xe9   : > { %v763_v43 = vrot.slane %v4842_v40, %v4803_v0  ;;  %v787_v47 = vrot.slane %v4846_v45, %v4803_v0  ;;  %v2716_v20 = vmul.f32 %v2662_v44, %v2382_v8  ;;  %3939 = vmatmul.mubr.msk.f32.vlgmr.msra.gmra.mrb[4].mxu1 %vm1746_vm0, %v5008_v56  ;;  %v2378_v62 = vrot.slane %v5140_v26, %v5014_v5  ;;  %v1029_v45 = vld [vmem:[%s4748_s20 + $0x38] sm:$0xff] }
  0xea   : > { %v2558_v46 = vrot.slane %v5255_v29, %v4765_v38  ;;  %v2554_v6 = vrot.slane %v5255_v29, %v4768_v39  ;;  %v4095_v28 = vpack.c.bf16 %v1112_v35, %v1106_v7  ;;  %v2722_v3 = vmul.f32 %v2668_v60, %v2406_v14  ;;  %2098 = vmatprep.mubr.f32.mxu1 %v4347_v31  ;;  %v1035_v60 = vld [vmem:[%s4748_s20 + $0x68] sm:$0xff] }
  0xeb   : > { %v1105_v40 = vmul.f32 %v1051_v15, %v763_v43  ;;  %v1111_v59 = vmul.f32 %v1057_v27, %v787_v47  ;;  %v2402_v53 = vrot.slane %v5142_v10, %v5014_v5  ;;  %v2715_v24 = vmul.f32 %v2661_v18, %v2378_v62 }
  0xec   : > { %v2760_v49 = vmul.f32 %v2706_v36, %v2558_v46  ;;  %v2759_v41 = vmul.f32 %v2705_v12, %v2554_v6  ;;  %4096 = vmatprep.subr.bf16.mxu1 %v4095_v28  ;;  %v4159_v48 = vpack.c.bf16 %v2722_v3, %v2716_v20  ;;  %v815_v52 = vrot.slane %v4854_v61, %v4792_v57 }
  0xed   : > { %v4097_v32 = vpack.c.bf16 %v1111_v59, %v1105_v40  ;;  %v839_v4 = vrot.slane %v4864_v9, %v4792_v57  ;;  %v2721_v15 = vmul.f32 %v2667_v54, %v2402_v53  ;;  %v1063_v19 = vunpack.c.l.bf16 %v1029_v45 }
  0xee   : > { %2781 = vmatprep.subr.mxu0 %v2760_v49  ;;  %v1064_v36 = vunpack.c.h.bf16 %v1029_v45  ;;  %v1069_v12 = vunpack.c.l.bf16 %v1032_v1  ;;  %v1070_v16 = vunpack.c.h.bf16 %v1032_v1  ;;  %v2430_v11 = vrot.slane %v5146_v21, %v4795_v58  ;;  %v3969_v45 = vld [vmem:[%s4748_s20 + $0x220] sm:$0xff]  ;;  %v3972_v1 = vld [vmem:[%s4748_s20 + $0x238] sm:$0xff] }
  0xef   : > { %2782 = vmatpush1.msra.mxu0 %v2759_v41  ;;  %4098 = vmatpush1.bf16.msra.mxu1 %v4097_v32  ;;  %v2454_v42 = vrot.slane %v5148_v34, %v4795_v58  ;;  %v2673_v27 = vunpack.c.l.bf16 %v3963_v13  ;;  %v4161_v17 = vpack.c.bf16 %v2721_v15, %v2715_v24  ;;  %v2674_v14 = vunpack.c.h.bf16 %v3963_v13 }
  0xf0   : > { %4160 = vmatprep.subr.bf16.mxu0 %v4159_v48  ;;  %3982 = vmatmul.mubr.msk.f32.vlgmr.msra.gmra.mrb[0].mxu0 %vm1746_vm0, %v5008_v56  ;;  %v1118_v8 = vmul.f32 %v1064_v36, %v815_v52  ;;  %v2679_v18 = vunpack.c.l.bf16 %v3966_v50  ;;  %v1124_v7 = vmul.f32 %v1070_v16, %v839_v4  ;;  %v2680_v44 = vunpack.c.h.bf16 %v3966_v50 }
  0xf1   : > { %v811_v54 = vrot.slane %v4854_v61, %v4803_v0  ;;  %v835_v35 = vrot.slane %v4864_v9, %v4803_v0  ;;  %2971 = vmatprep.mubr.f32.mxu0 %v4347_v31  ;;  %4162 = vmatpush1.bf16.msra.mxu0 %v4161_v17  ;;  %v2728_v56 = vmul.f32 %v2674_v14, %v2430_v11  ;;  %v1038_v61 = vld [vmem:[%s4748_s20 + $0x80] sm:$0xff]  ;;  %v1075_v59 = vunpack.c.l.bf16 %v1035_v60 }
  0xf2   : > { %v2426_v43 = vrot.slane %v5146_v21, %v5014_v5  ;;  %v2450_v47 = vrot.slane %v5148_v34, %v5014_v5  ;;  %v863_v46 = vrot.slane %v4918_v25, %v4792_v57  ;;  %v4099_v6 = vpack.c.bf16 %v1124_v7, %v1118_v8 }
  0xf3   : > { %v2734_v20 = vmul.f32 %v2680_v44, %v2454_v42  ;;  %v1117_v9 = vmul.f32 %v1063_v19, %v811_v54  ;;  %v1123_v62 = vmul.f32 %v1069_v12, %v835_v35  ;;  %v887_v40 = vrot.slane %v4920_v33, %v4792_v57  ;;  %v1041_v42 = vld [vmem:[%s4748_s20 + $0x98] sm:$0xff] }
  0xf4   : > { %v2727_v28 = vmul.f32 %v2673_v27, %v2426_v43  ;;  %v2733_v3 = vmul.f32 %v2679_v18, %v2450_v47  ;;  %4100 = vmatprep.subr.bf16.mxu1 %v4099_v6  ;;  %v1076_v53 = vunpack.c.h.bf16 %v1035_v60  ;;  %v1081_v24 = vunpack.c.l.bf16 %v1038_v61  ;;  %v1044_v18 = vld [vmem:[%s4748_s20 + $0xb0] sm:$0xff]  ;;  %v3978_v47 = vld [vmem:[%s4748_s20 + $0x268] sm:$0xff] }
  0xf5   : > { %v4163_v49 = vpack.c.bf16 %v2734_v20, %v2728_v56  ;;  %v4101_v41 = vpack.c.bf16 %v1123_v62, %v1117_v9  ;;  %v1082_v48 = vunpack.c.h.bf16 %v1038_v61  ;;  %v2478_v32 = vrot.slane %v5199_v22, %v4795_v58  ;;  %v3975_v43 = vld [vmem:[%s4748_s20 + $0x250] sm:$0xff] }
  0xf6   : > { %v4165_v13 = vpack.c.bf16 %v2733_v3, %v2727_v28  ;;  %v2502_v52 = vrot.slane %v5201_v30, %v4795_v58  ;;  %v1130_v4 = vmul.f32 %v1076_v53, %v863_v46  ;;  %v2685_v50 = vunpack.c.l.bf16 %v3969_v45 }
  0xf7   : > { %4164 = vmatprep.subr.bf16.mxu0 %v4163_v49  ;;  %4102 = vmatpush1.bf16.msra.mxu1 %v4101_v41  ;;  %v2686_v15 = vunpack.c.h.bf16 %v3969_v45  ;;  %v2691_v19 = vunpack.c.l.bf16 %v3972_v1  ;;  %v1136_v36 = vmul.f32 %v1082_v48, %v887_v40  ;;  %v2692_v12 = vunpack.c.h.bf16 %v3972_v1 }
  0xf8   : > { %4166 = vmatpush1.bf16.msra.mxu0 %v4165_v13  ;;  %v859_v16 = vrot.slane %v4918_v25, %v4803_v0  ;;  %v883_v11 = vrot.slane %v4920_v33, %v4803_v0  ;;  %v2474_v17 = vrot.slane %v5199_v22, %v5014_v5  ;;  %v2498_v8 = vrot.slane %v5201_v30, %v5014_v5  ;;  %v1047_v13 = vld [vmem:[%s4748_s20 + $0xc8] sm:$0xff] }
  0xf9   : > { %v2740_v27 = vmul.f32 %v2686_v15, %v2478_v32  ;;  %v911_v14 = vrot.slane %v4941_v2, %v4792_v57  ;;  %v4103_v7 = vpack.c.bf16 %v1136_v36, %v1130_v4  ;;  %v2746_v44 = vmul.f32 %v2692_v12, %v2502_v52 }
  0xfa   : > { %v1129_v25 = vmul.f32 %v1075_v59, %v859_v16  ;;  %v1135_v54 = vmul.f32 %v1081_v24, %v883_v11  ;;  %v2739_v35 = vmul.f32 %v2685_v50, %v2474_v17  ;;  %v2745_v60 = vmul.f32 %v2691_v19, %v2498_v8  ;;  %v3981_v50 = vld [vmem:[%s4748_s20 + $0x280] sm:$0xff] }
  0xfb   : > { %v935_v33 = vrot.slane %v4943_v63, %v4792_v57  ;;  %v1087_v56 = vunpack.c.l.bf16 %v1041_v42  ;;  %4104 = vmatprep.subr.bf16.mxu1 %v4103_v7  ;;  %v4167_v46 = vpack.c.bf16 %v2746_v44, %v2740_v27  ;;  %v1088_v6 = vunpack.c.h.bf16 %v1041_v42  ;;  %v3956_v42 = vld [vmem:[%s4748_s20 + $0x1b8] sm:$0xff]  ;;  %v4309_v7 = vld [vmem:[%s4762_s15 + $0x120] ss:$8 sps:$4 sm:$0xff]  }
  0xfc   : > { %v4105_v61 = vpack.c.bf16 %v1135_v54, %v1129_v25  ;;  %v1093_v20 = vunpack.c.l.bf16 %v1044_v18  ;;  %v4169_v9 = vpack.c.bf16 %v2745_v60, %v2739_v35  ;;  %v1094_v62 = vunpack.c.h.bf16 %v1044_v18  ;;  %v3959_v18 = vld [vmem:[%s4748_s20 + $0x1d0] sm:$0xff] }
  0xfd   : > { %v2526_v28 = vrot.slane %v5203_v55, %v4795_v58  ;;  %v2550_v3 = vrot.slane %v5205_v51, %v4795_v58  ;;  %4168 = vmatprep.subr.bf16.mxu0 %v4167_v46  ;;  %v1142_v40 = vmul.f32 %v1088_v6, %v911_v14  ;;  %v2697_v59 = vunpack.c.l.bf16 %v3975_v43  ;;  %v4311_v44 = vld [vmem:[%s4762_s15 + $0x130] ss:$8 sps:$4 sm:$0xff]  }
  0xfe   : > { %4106 = vmatpush1.bf16.msra.mxu1 %v4105_v61  ;;  %v2698_v45 = vunpack.c.h.bf16 %v3975_v43  ;;  %v2703_v1 = vunpack.c.l.bf16 %v3978_v47  ;;  %4170 = vmatpush1.bf16.msra.mxu0 %v4169_v9  ;;  %v1148_v49 = vmul.f32 %v1094_v62, %v935_v33  ;;  %v2704_v41 = vunpack.c.h.bf16 %v3978_v47  ;;  %v4313_v33 = vld [vmem:[%s4762_s15 + $0x140] ss:$8 sps:$4 sm:$0xff]  }
  0xff   : > { %v907_v53 = vrot.slane %v4941_v2, %v4803_v0  ;;  %v931_v24 = vrot.slane %v4943_v63, %v4803_v0  ;;  %v2522_v32 = vrot.slane %v5203_v55, %v5014_v5  ;;  %v2546_v52 = vrot.slane %v5205_v51, %v5014_v5  ;;  %v5355_v61 = vld [vmem:[%s4748_s20 + $0x288] sm:$0xff]  ;;  %v4000_v62 = vld [vmem:[%s4748_s20 + $0x2a0] sm:$0xff] }
 0x100   : > { %v2752_v48 = vmul.f32 %v2698_v45, %v2526_v28  ;;  %v959_v4 = vrot.slane %v4997_v23, %v4792_v57  ;;  %v4107_v15 = vpack.c.bf16 %v1148_v49, %v1142_v40  ;;  %v2758_v2 = vmul.f32 %v2704_v41, %v2550_v3 }
 0x101   : > { %v1141_v19 = vmul.f32 %v1087_v56, %v907_v53  ;;  %v1147_v36 = vmul.f32 %v1093_v20, %v931_v24  ;;  %v2751_v63 = vmul.f32 %v2697_v59, %v2522_v32  ;;  %v2757_v12 = vmul.f32 %v2703_v1, %v2546_v52 }
 0x102   : > { %v1099_v16 = vunpack.c.l.bf16 %v1047_v13  ;;  %v1100_v11 = vunpack.c.h.bf16 %v1047_v13  ;;  %4108 = vmatprep.subr.bf16.mxu1 %v4107_v15  ;;  %v4171_v27 = vpack.c.bf16 %v2758_v2, %v2752_v48  ;;  %v2574_v8 = vrot.slane %v5255_v29, %v4795_v58  ;;  %v3962_v2 = vld [vmem:[%s4748_s20 + $0x1e8] sm:$0xff] }
 0x103   : > { %v4109_v17 = vpack.c.bf16 %v1147_v36, %v1141_v19  ;;  %v2709_v14 = vunpack.c.l.bf16 %v3981_v50  ;;  %v4173_v25 = vpack.c.bf16 %v2757_v12, %v2751_v63  ;;  %v2710_v35 = vunpack.c.h.bf16 %v3981_v50  ;;  %v5367_v50 = vld [vmem:[%s5616_s2] sm:$0xff] }
 0x104   : > { %v1154_v54 = vmul.f32 %v1100_v11, %v959_v4  ;;  %v955_v60 = vrot.slane %v4997_v23, %v4803_v0  ;;  %4172 = vmatprep.subr.bf16.mxu0 %v4171_v27  ;;  %v2570_v56 = vrot.slane %v5255_v29, %v5014_v5  ;;  %v2374_v43 = vrot.slane %v5140_v26, %v4792_v57 }
 0x105   : > { %4110 = vmatpush1.bf16.msra.mxu1 %v4109_v17  ;;  %v2398_v47 = vrot.slane %v5142_v10, %v4792_v57  ;;  %v2659_v46 = vunpack.c.l.bf16 %v3956_v42  ;;  %4174 = vmatpush1.bf16.msra.mxu0 %v4173_v25  ;;  %v2764_v6 = vmul.f32 %v2710_v35, %v2574_v8  ;;  %v2660_v23 = vunpack.c.h.bf16 %v3956_v42 }
 0x106   : > { %2050 = vmatprep.subr.mxu1 %v1154_v54  ;;  %v1153_v20 = vmul.f32 %v1099_v16, %v955_v60  ;;  %v2665_v9 = vunpack.c.l.bf16 %v3959_v18  ;;  %v2763_v28 = vmul.f32 %v2709_v14, %v2570_v56  ;;  %v2666_v3 = vunpack.c.h.bf16 %v3959_v18  ;;  %v3965_v16 = vld [vmem:[%s4748_s20 + $0x200] sm:$0xff]  ;;  %v4003_v54 = vld [vmem:[%s4748_s20 + $0x2b8] sm:$0xff] }
 0x107   : > { %v3021_v40 = vrot.slane %v4309_v7, %v4760_v37  ;;  %v3035_v59 = vrot.slane %v4311_v44, %v4760_v37  ;;  %2923 = vmatprep.subr.mxu0 %v2764_v6  ;;  %v2714_v45 = vmul.f32 %v2660_v23, %v2374_v43  ;;  %v3049_v1 = vrot.slane %v4313_v33, %v4760_v37  ;;  %v4006_v6 = vld [vmem:[%s4748_s20 + $0x2d0] sm:$0xff] }
 0x108   : > { %v3465_v49 = vunpack.c.l.bf16 %v5355_v61  ;;  %v3466_v41 = vunpack.c.h.bf16 %v5355_v61  ;;  %v2720_v53 = vmul.f32 %v2666_v3, %v2398_v47  ;;  %v3471_v48 = vunpack.c.l.bf16 %v4000_v62 }
 0x109   : > { %2051 = vmatpush1.msra.mxu1 %v1153_v20  ;;  %v3057_v24 = vcombine.low %v3021_v40, %v3035_v59  ;;  %v3058_v13 = vcombine.high %v3021_v40, %v3035_v59  ;;  %2924 = vmatpush1.msra.mxu0 %v2763_v28  ;;  %v3061_v32 = vcombine.high %v3049_v1, %v3049_v1  ;;  %v3472_v4 = vunpack.c.h.bf16 %v4000_v62 }
 0x10a   : > { %v3097_v52 = vrot.slane %v3049_v1, %v4760_v37  ;;  %3941 = vmatmul.mubr.msk.f32.vlgmr.msra.gmra.mrb[2].mxu1 %vm1746_vm0, %v5367_v50  ;;  %v2370_v15 = vrot.slane %v5140_v26, %v4803_v0  ;;  %v4143_v19 = vpack.c.bf16 %v2720_v53, %v2714_v45  ;;  %v2394_v12 = vrot.slane %v5142_v10, %v4803_v0 }
 0x10b   : > { %v3069_v36 = vrot.slane %v3057_v24, %v4760_v37  ;;  %v3083_v63 = vrot.slane %v3058_v13, %v4760_v37  ;;  %3984 = vmatmul.mubr.msk.f32.vlgmr.msra.gmra.mrb[2].mxu0 %vm1746_vm0, %v5367_v50  ;;  %v3111_v11 = vrot.slane %v3061_v32, %v4760_v37  ;;  %v2422_v26 = vrot.slane %v5146_v21, %v4792_v57  ;;  %v3968_v32 = vld [vmem:[%s4748_s20 + $0x218] sm:$0xff] }
 0x10c   : > { %v2713_v42 = vmul.f32 %v2659_v46, %v2370_v15  ;;  %v2446_v27 = vrot.slane %v5148_v34, %v4792_v57  ;;  %3637 = vmatprep.mubr.f32.mxu0 %v4347_v31  ;;  %4144 = vmatprep.subr.bf16.mxu1 %v4143_v19  ;;  %v2719_v10 = vmul.f32 %v2665_v9, %v2394_v12  ;;  %v2671_v8 = vunpack.c.l.bf16 %v3962_v2 }
 0x10d   : > { %v5387_v17 = vcombine.low %v3069_v36, %v3097_v52  ;;  %v2672_v14 = vunpack.c.h.bf16 %v3962_v2  ;;  %2900 = vmatprep.mubr.f32.mxu1 %v4347_v31  ;;  %v5390_v18 = vcombine.low %v3083_v63, %v3111_v11  ;;  %v2677_v7 = vunpack.c.l.bf16 %v3965_v16 }
 0x10e   : > { %v2678_v44 = vunpack.c.h.bf16 %v3965_v16  ;;  %v5392_v25 = vcombine.high %v3069_v36, %v3097_v52  ;;  %v4145_v60 = vpack.c.bf16 %v2719_v10, %v2713_v42  ;;  %v5403_v61 = vcombine.high %v3083_v63, %v3111_v11  ;;  %v4315_v52 = vld [vmem:[%s4762_s15 + $0x124] ss:$8 sps:$4 sm:$0xff]   ;;  %v4316_v36 = vld [vmem:[%s4762_s15 + $0x134] ss:$8 sps:$4 sm:$0xff]  }
 0x10f   : > { %v3174_v35 = vrot.slane %v5387_v17, %v4765_v38  ;;  %v3170_v33 = vrot.slane %v5387_v17, %v4768_v39  ;;  %v2726_v56 = vmul.f32 %v2672_v14, %v2422_v26  ;;  %v3198_v43 = vrot.slane %v5390_v18, %v4765_v38  ;;  %v4317_v63 = vld [vmem:[%s4762_s15 + $0x144] ss:$8 sps:$4 sm:$0xff]  }
 0x110   : > { %v3194_v47 = vrot.slane %v5390_v18, %v4768_v39  ;;  %v2732_v46 = vmul.f32 %v2678_v44, %v2446_v27  ;;  %4146 = vmatpush1.bf16.msra.mxu1 %v4145_v60  ;;  %v3222_v9 = vrot.slane %v5392_v25, %v4765_v38  ;;  %v3477_v62 = vunpack.c.l.bf16 %v4003_v54  ;;  %v4012_v14 = vld [vmem:[%s4748_s20 + $0x300] sm:$0xff] }
 0x111   : > { %v3520_v20 = vmul.f32 %v3466_v41, %v3174_v35  ;;  %v3519_v23 = vmul.f32 %v3465_v49, %v3170_v33  ;;  %v3526_v28 = vmul.f32 %v3472_v4, %v3198_v43  ;;  %v3246_v59 = vrot.slane %v5403_v61, %v4765_v38 }
 0x112   : > { %v3525_v3 = vmul.f32 %v3471_v48, %v3194_v47  ;;  %v4147_v40 = vpack.c.bf16 %v2732_v46, %v2726_v56  ;;  %v3478_v45 = vunpack.c.h.bf16 %v4003_v54  ;;  %v3483_v1 = vunpack.c.l.bf16 %v4006_v6 }
 0x113   : > { %v3484_v41 = vunpack.c.h.bf16 %v4006_v6  ;;  %v2418_v49 = vrot.slane %v5146_v21, %v4803_v0  ;;  %v4175_v53 = vpack.c.bf16 %v3526_v28, %v3520_v20  ;;  %v2442_v13 = vrot.slane %v5148_v34, %v4803_v0  ;;  %v3971_v21 = vld [vmem:[%s4748_s20 + $0x230] sm:$0xff] }
 0x114   : > { %v4177_v24 = vpack.c.bf16 %v3525_v3, %v3519_v23  ;;  %4148 = vmatprep.subr.bf16.mxu1 %v4147_v40  ;;  %v3218_v48 = vrot.slane %v5392_v25, %v4768_v39  ;;  %v3532_v4 = vmul.f32 %v3478_v45, %v3222_v9  ;;  %v3242_v19 = vrot.slane %v5403_v61, %v4768_v39  ;;  %v3974_v3 = vld [vmem:[%s4748_s20 + $0x248] sm:$0xff] }
 0x115   : > { %v3538_v15 = vmul.f32 %v3484_v41, %v3246_v59  ;;  %v2725_v2 = vmul.f32 %v2671_v8, %v2418_v49  ;;  %4176 = vmatprep.subr.bf16.mxu0 %v4175_v53  ;;  %v2731_v12 = vmul.f32 %v2677_v7, %v2442_v13  ;;  %v2470_v34 = vrot.slane %v5199_v22, %v4792_v57  ;;  %v4009_v8 = vld [vmem:[%s4748_s20 + $0x2e8] sm:$0xff]  ;;  %v3977_v41 = vld [vmem:[%s4748_s20 + $0x260] sm:$0xff] }
 0x116   : > { %v3531_v16 = vmul.f32 %v3477_v62, %v3218_v48  ;;  %v2494_v11 = vrot.slane %v5201_v30, %v4792_v57  ;;  %4178 = vmatpush1.bf16.msra.mxu0 %v4177_v24  ;;  %v3537_v26 = vmul.f32 %v3483_v1, %v3242_v19  ;;  %v2683_v27 = vunpack.c.l.bf16 %v3968_v32 }
 0x117   : > { %v4179_v42 = vpack.c.bf16 %v3538_v15, %v3532_v4  ;;  %v2684_v10 = vunpack.c.h.bf16 %v3968_v32  ;;  %v4149_v44 = vpack.c.bf16 %v2731_v12, %v2725_v2  ;;  %v2689_v54 = vunpack.c.l.bf16 %v3971_v21 }
 0x118   : > { %v2690_v35 = vunpack.c.h.bf16 %v3971_v21  ;;  %v3028_v60 = vrot.slane %v4315_v52, %v4760_v37  ;;  %v4181_v7 = vpack.c.bf16 %v3537_v26, %v3531_v16  ;;  %v3042_v56 = vrot.slane %v4316_v36, %v4760_v37  ;;  %v4018_v26 = vld [vmem:[%s4748_s20 + $0x330] sm:$0xff] }
 0x119   : > { %4180 = vmatprep.subr.bf16.mxu0 %v4179_v42  ;;  %v2738_v33 = vmul.f32 %v2684_v10, %v2470_v34  ;;  %v3056_v43 = vrot.slane %v4317_v63, %v4760_v37  ;;  %4150 = vmatpush1.bf16.msra.mxu1 %v4149_v44  ;;  %v3489_v46 = vunpack.c.l.bf16 %v4009_v8  ;;  %v3490_v6 = vunpack.c.h.bf16 %v4009_v8  ;;  %v4015_v42 = vld [vmem:[%s4748_s20 + $0x318] sm:$0xff] }
 0x11a   : > { %v2744_v47 = vmul.f32 %v2690_v35, %v2494_v11  ;;  %v3495_v20 = vunpack.c.l.bf16 %v4012_v14  ;;  %4182 = vmatpush1.bf16.msra.mxu0 %v4181_v7  ;;  %v3059_v23 = vcombine.low %v3028_v60, %v3042_v56  ;;  %v3060_v9 = vcombine.high %v3028_v60, %v3042_v56 }
 0x11b   : > { %v3062_v62 = vcombine.high %v3056_v43, %v3056_v43  ;;  %v3104_v28 = vrot.slane %v3056_v43, %v4760_v37  ;;  %v3496_v59 = vunpack.c.h.bf16 %v4012_v14  ;;  %v2466_v45 = vrot.slane %v5199_v22, %v4803_v0 }
 0x11c   : > { %v4151_v40 = vpack.c.bf16 %v2744_v47, %v2738_v33  ;;  %v2490_v1 = vrot.slane %v5201_v30, %v4803_v0  ;;  %v3076_v49 = vrot.slane %v3059_v23, %v4760_v37  ;;  %v3090_v53 = vrot.slane %v3060_v9, %v4760_v37  ;;  %v3980_v47 = vld [vmem:[%s4748_s20 + $0x278] sm:$0xff] }
 0x11d   : > { %v3118_v24 = vrot.slane %v3062_v62, %v4760_v37  ;;  %v2518_v13 = vrot.slane %v5203_v55, %v4792_v57  ;;  %v2737_v48 = vmul.f32 %v2683_v27, %v2466_v45  ;;  %v2542_v22 = vrot.slane %v5205_v51, %v4792_v57  ;;  %v4318_v23 = vld [vmem:[%s4762_s15 + $0x150] ss:$8 sps:$4 sm:$0x11]  }
 0x11e   : > { %4152 = vmatprep.subr.bf16.mxu1 %v4151_v40  ;;  %v2743_v32 = vmul.f32 %v2689_v54, %v2490_v1  ;;  %v2695_v52 = vunpack.c.l.bf16 %v3974_v3  ;;  %v5446_v30 = vcombine.low %v3076_v49, %v3104_v28  ;;  %v2696_v15 = vunpack.c.h.bf16 %v3974_v3  ;;  %v4319_v40 = vld [vmem:[%s4762_s15 + $0x160] ss:$8 sps:$4 sm:$0x11]   ;;  %v4320_v45 = vld [vmem:[%s4762_s15 + $0x170] ss:$8 sps:$4 sm:$0x11]  }
 0x11f   : > { %v5448_v4 = vcombine.low %v3090_v53, %v3118_v24  ;;  %v2701_v2 = vunpack.c.l.bf16 %v3977_v41  ;;  %v2702_v21 = vunpack.c.h.bf16 %v3977_v41  ;;  %v5450_v36 = vcombine.high %v3076_v49, %v3104_v28 }
 0x120   : > { %v4153_v19 = vpack.c.bf16 %v2743_v32, %v2737_v48  ;;  %v5452_v63 = vcombine.high %v3090_v53, %v3118_v24  ;;  %v3270_v12 = vrot.slane %v5446_v30, %v4765_v38  ;;  %v3266_v34 = vrot.slane %v5446_v30, %v4768_v39  ;;  %v4021_v53 = vld [vmem:[%s4748_s20 + $0x348] sm:$0xff] }
 0x121   : > { %v3294_v16 = vrot.slane %v5448_v4, %v4765_v38  ;;  %v3290_v11 = vrot.slane %v5448_v4, %v4768_v39  ;;  %v2750_v27 = vmul.f32 %v2696_v15, %v2518_v13  ;;  %v2756_v10 = vmul.f32 %v2702_v21, %v2542_v22 }
 0x122   : > { %4154 = vmatpush1.bf16.msra.mxu1 %v4153_v19  ;;  %v3318_v8 = vrot.slane %v5450_v36, %v4765_v38  ;;  %v3342_v14 = vrot.slane %v5452_v63, %v4765_v38  ;;  %v3544_v44 = vmul.f32 %v3490_v6, %v3270_v12  ;;  %v3543_v35 = vmul.f32 %v3489_v46, %v3266_v34 }
 0x123   : > { %v3550_v54 = vmul.f32 %v3496_v59, %v3294_v16  ;;  %v3549_v60 = vmul.f32 %v3495_v20, %v3290_v11  ;;  %v4155_v7 = vpack.c.bf16 %v2756_v10, %v2750_v27  ;;  %v3501_v33 = vunpack.c.l.bf16 %v4015_v42  ;;  %v4001_v11 = vld [vmem:[%s4748_s20 + $0x2a8] sm:$0xff]  ;;  %v3999_v10 = vld [vmem:[%s4748_s20 + $0x298] sm:$0xff] }
 0x124   : > { %v3502_v56 = vunpack.c.h.bf16 %v4015_v42  ;;  %v3507_v43 = vunpack.c.l.bf16 %v4018_v26  ;;  %v3508_v28 = vunpack.c.h.bf16 %v4018_v26  ;;  %v2514_v3 = vrot.slane %v5203_v55, %v4803_v0 }
 0x125   : > { %v4183_v9 = vpack.c.bf16 %v3550_v54, %v3544_v44  ;;  %v4185_v62 = vpack.c.bf16 %v3549_v60, %v3543_v35  ;;  %4156 = vmatprep.subr.bf16.mxu1 %v4155_v7  ;;  %v2538_v46 = vrot.slane %v5205_v51, %v4803_v0  ;;  %v3314_v20 = vrot.slane %v5450_v36, %v4768_v39  ;;  %v4002_v35 = vld [vmem:[%s4748_s20 + $0x2b0] sm:$0xff] }
 0x126   : > { %v3556_v6 = vmul.f32 %v3502_v56, %v3318_v8  ;;  %v3338_v59 = vrot.slane %v5452_v63, %v4768_v39  ;;  %v3562_v1 = vmul.f32 %v3508_v28, %v3342_v14  ;;  %v2749_v41 = vmul.f32 %v2695_v52, %v2514_v3  ;;  %v3998_v52 = vld [vmem:[%s4748_s20 + $0x290] sm:$0xff] }
 0x127   : > { %4184 = vmatprep.subr.bf16.mxu0 %v4183_v9  ;;  %v2566_v55 = vrot.slane %v5255_v29, %v4792_v57  ;;  %v2707_v49 = vunpack.c.l.bf16 %v3980_v47  ;;  %v2755_v24 = vmul.f32 %v2701_v2, %v2538_v46  ;;  %v3555_v13 = vmul.f32 %v3501_v33, %v3314_v20 }
 0x128   : > { %4186 = vmatpush1.bf16.msra.mxu0 %v4185_v62  ;;  %v3561_v51 = vmul.f32 %v3507_v43, %v3338_v59  ;;  %v2708_v48 = vunpack.c.h.bf16 %v3980_v47  ;;  %v4187_v32 = vpack.c.bf16 %v3562_v1, %v3556_v6  ;;  %v3136_v22 = vrot.slane %v4318_v23, %v4760_v37 }
 0x129   : > { %v3143_v15 = vrot.slane %v4319_v40, %v4760_v37  ;;  %v3150_v19 = vrot.slane %v4320_v45, %v4760_v37  ;;  %v4157_v21 = vpack.c.bf16 %v2755_v24, %v2749_v41  ;;  %v3513_v34 = vunpack.c.l.bf16 %v4021_v53  ;;  %v4007_v24 = vld [vmem:[%s4748_s20 + $0x2d8] sm:$0xff] }
 0x12a   : > { %v4189_v12 = vpack.c.bf16 %v3561_v51, %v3555_v13  ;;  %v2762_v16 = vmul.f32 %v2708_v48, %v2566_v55  ;;  %4188 = vmatprep.subr.bf16.mxu0 %v4187_v32  ;;  %v3514_v26 = vunpack.c.h.bf16 %v4021_v53  ;;  %v2562_v27 = vrot.slane %v5255_v29, %v4803_v0  ;;  %v4005_v48 = vld [vmem:[%s4748_s20 + $0x2c8] sm:$0xff] }
 0x12b   : > { %v3151_v2 = vcombine.low %v3136_v22, %v3143_v15  ;;  %v3165_v42 = vrot.slane %v3150_v19, %v4760_v37  ;;  %4158 = vmatpush1.bf16.msra.mxu1 %v4157_v21  ;;  %v3182_v8 = vrot.slane %v5387_v17, %v4792_v57  ;;  %v3206_v14 = vrot.slane %v5390_v18, %v4792_v57 }
 0x12c   : > { %4190 = vmatpush1.bf16.msra.mxu0 %v4189_v12  ;;  %v3467_v44 = vunpack.c.l.bf16 %v3998_v52  ;;  %v3468_v54 = vunpack.c.h.bf16 %v3998_v52  ;;  %2852 = vmatprep.subr.mxu1 %v2762_v16  ;;  %v2761_v7 = vmul.f32 %v2707_v49, %v2562_v27  ;;  %v3473_v33 = vunpack.c.l.bf16 %v4001_v11  ;;  %v4008_v52 = vld [vmem:[%s4748_s20 + $0x2e0] sm:$0xff] }
 0x12d   : > { %v3158_v60 = vrot.slane %v3151_v2, %v4760_v37  ;;  %v3474_v56 = vunpack.c.h.bf16 %v4001_v11  ;;  %v3190_v29 = vrot.slane %v5387_v17, %v4795_v58  ;;  %v3214_v47 = vrot.slane %v5390_v18, %v4795_v58 }
 0x12e   : > { %v3522_v43 = vmul.f32 %v3468_v54, %v3182_v8  ;;  %v3469_v23 = vunpack.c.l.bf16 %v3999_v10  ;;  %v3470_v28 = vunpack.c.h.bf16 %v3999_v10  ;;  %v3475_v3 = vunpack.c.l.bf16 %v4002_v35 }
 0x12f   : > { %v5502_v9 = vcombine.low %v3158_v60, %v3165_v42  ;;  %v3528_v62 = vmul.f32 %v3474_v56, %v3206_v14  ;;  %2853 = vmatpush1.msra.mxu1 %v2761_v7  ;;  %v3476_v37 = vunpack.c.h.bf16 %v4002_v35  ;;  %v3178_v40 = vrot.slane %v5387_v17, %v4803_v0  ;;  %v4010_v60 = vld [vmem:[%s4748_s20 + $0x2f0] sm:$0xff] }
 0x130   : > { %v3202_v45 = vrot.slane %v5390_v18, %v4803_v0  ;;  %v3186_v6 = vrot.slane %v5387_v17, %v5014_v5  ;;  %v3524_v1 = vmul.f32 %v3470_v28, %v3190_v29  ;;  %3983 = vmatmul.mubr.msk.f32.vlgmr.msra.gmra.mrb[2].mxu1 %vm1746_vm0, %v5367_v50  ;;  %v3210_v53 = vrot.slane %v5390_v18, %v5014_v5  ;;  %v4004_v17 = vld [vmem:[%s4748_s20 + $0x2c0] sm:$0xff]  ;;  %v4013_v29 = vld [vmem:[%s4748_s20 + $0x308] sm:$0xff] }
 0x131   : > { %v3366_v46 = vrot.slane %v5502_v9, %v4765_v38  ;;  %v3362_v20 = vrot.slane %v5502_v9, %v4768_v39  ;;  %v4191_v59 = vpack.c.bf16 %v3528_v62, %v3522_v43  ;;  %v3530_v41 = vmul.f32 %v3476_v37, %v3214_v47  ;;  %3708 = vmatprep.mubr.f32.mxu1 %v4347_v31 }
 0x132   : > { %v3521_v55 = vmul.f32 %v3467_v44, %v3178_v40  ;;  %v3527_v49 = vmul.f32 %v3473_v33, %v3202_v45  ;;  %v3523_v39 = vmul.f32 %v3469_v23, %v3186_v6  ;;  %v3230_v51 = vrot.slane %v5392_v25, %v4792_v57  ;;  %v4011_v40 = vld [vmem:[%s4748_s20 + $0x2f8] sm:$0xff]  ;;  %v4014_v45 = vld [vmem:[%s4748_s20 + $0x310] sm:$0xff] }
 0x133   : > { %v3568_v38 = vmul.f32 %v3514_v26, %v3366_v46  ;;  %v3567_v13 = vmul.f32 %v3513_v34, %v3362_v20  ;;  %4192 = vmatprep.subr.bf16.mxu1 %v4191_v59  ;;  %v4207_v32 = vpack.c.bf16 %v3530_v41, %v3524_v1  ;;  %v3529_v15 = vmul.f32 %v3475_v3, %v3210_v53 }
 0x134   : > { %v4193_v22 = vpack.c.bf16 %v3527_v49, %v3521_v55  ;;  %v3254_v19 = vrot.slane %v5403_v61, %v4792_v57  ;;  %v3479_v18 = vunpack.c.l.bf16 %v4004_v17  ;;  %v3480_v21 = vunpack.c.h.bf16 %v4004_v17 }
 0x135   : > { %3589 = vmatprep.subr.mxu0 %v3568_v38  ;;  %v3485_v12 = vunpack.c.l.bf16 %v4007_v24  ;;  %v3486_v16 = vunpack.c.h.bf16 %v4007_v24  ;;  %v4209_v34 = vpack.c.bf16 %v3529_v15, %v3523_v39  ;;  %v3238_v11 = vrot.slane %v5392_v25, %v4795_v58 }
 0x136   : > { %3590 = vmatpush1.msra.mxu0 %v3567_v13  ;;  %4194 = vmatpush1.bf16.msra.mxu1 %v4193_v22  ;;  %v3262_v2 = vrot.slane %v5403_v61, %v4795_v58  ;;  %v3481_v42 = vunpack.c.l.bf16 %v4005_v48  ;;  %v3534_v26 = vmul.f32 %v3480_v21, %v3230_v51  ;;  %v3482_v10 = vunpack.c.h.bf16 %v4005_v48  ;;  %v4016_v48 = vld [vmem:[%s4748_s20 + $0x320] sm:$0xff] }
 0x137   : > { %4024 = vmatmul.mubr.msk.f32.vlgmr.msra.gmra.mrb[0].mxu0 %vm1746_vm0, %v5367_v50  ;;  %4208 = vmatprep.subr.bf16.mxu0 %v4207_v32  ;;  %v3540_v27 = vmul.f32 %v3486_v16, %v3254_v19  ;;  %v3487_v8 = vunpack.c.l.bf16 %v4008_v52  ;;  %v3488_v14 = vunpack.c.h.bf16 %v4008_v52  ;;  %v3226_v44 = vrot.slane %v5392_v25, %v4803_v0  ;;  %v4019_v52 = vld [vmem:[%s4748_s20 + $0x338] sm:$0xff] }
 0x138   : > { %4210 = vmatpush1.bf16.msra.mxu0 %v4209_v34  ;;  %v3250_v54 = vrot.slane %v5403_v61, %v4803_v0  ;;  %v3234_v35 = vrot.slane %v5392_v25, %v5014_v5  ;;  %3779 = vmatprep.mubr.f32.mxu0 %v4347_v31  ;;  %v3536_v33 = vmul.f32 %v3482_v10, %v3238_v11  ;;  %v3491_v31 = vunpack.c.l.bf16 %v4010_v60 }
 0x139   : > { %v4195_v7 = vpack.c.bf16 %v3540_v27, %v3534_v26  ;;  %v3258_v56 = vrot.slane %v5403_v61, %v5014_v5  ;;  %v3278_v43 = vrot.slane %v5446_v30, %v4792_v57  ;;  %v3542_v47 = vmul.f32 %v3488_v14, %v3262_v2  ;;  %v4020_v26 = vld [vmem:[%s4748_s20 + $0x340] sm:$0xff] }
 0x13a   : > { %v3533_v23 = vmul.f32 %v3479_v18, %v3226_v44  ;;  %v3539_v62 = vmul.f32 %v3485_v12, %v3250_v54  ;;  %v3535_v28 = vmul.f32 %v3481_v42, %v3234_v35  ;;  %v3302_v3 = vrot.slane %v5448_v4, %v4792_v57  ;;  %v4017_v42 = vld [vmem:[%s4748_s20 + $0x328] sm:$0xff] }
 0x13b   : > { %4196 = vmatprep.subr.bf16.mxu1 %v4195_v7  ;;  %v3541_v25 = vmul.f32 %v3487_v8, %v3258_v56  ;;  %v3492_v37 = vunpack.c.h.bf16 %v4010_v60  ;;  %v4211_v6 = vpack.c.bf16 %v3542_v47, %v3536_v33  ;;  %v3497_v61 = vunpack.c.l.bf16 %v4013_v29 }
 0x13c   : > { %v4197_v46 = vpack.c.bf16 %v3539_v62, %v3533_v23  ;;  %v3498_v20 = vunpack.c.h.bf16 %v4013_v29  ;;  %v3286_v41 = vrot.slane %v5446_v30, %v4795_v58  ;;  %v3310_v55 = vrot.slane %v5448_v4, %v4795_v58  ;;  %v4022_v62 = vld [vmem:[%s4748_s20 + $0x350] sm:$0xff] }
 0x13d   : > { %v4213_v59 = vpack.c.bf16 %v3541_v25, %v3535_v28  ;;  %v3546_v1 = vmul.f32 %v3492_v37, %v3278_v43  ;;  %4212 = vmatprep.subr.bf16.mxu0 %v4211_v6  ;;  %v3493_v53 = vunpack.c.l.bf16 %v4011_v40  ;;  %v3494_v17 = vunpack.c.h.bf16 %v4011_v40  ;;  %v4023_v37 = vld [vmem:[%s4748_s20 + $0x358] sm:$0xff] }
 0x13e   : > { %4198 = vmatpush1.bf16.msra.mxu1 %v4197_v46  ;;  %v3552_v49 = vmul.f32 %v3498_v20, %v3302_v3  ;;  %v3499_v24 = vunpack.c.l.bf16 %v4014_v45  ;;  %v3500_v38 = vunpack.c.h.bf16 %v4014_v45  ;;  %v3274_v13 = vrot.slane %v5446_v30, %v4803_v0 }
 0x13f   : > { %4214 = vmatpush1.bf16.msra.mxu0 %v4213_v59  ;;  %v3298_v39 = vrot.slane %v5448_v4, %v4803_v0  ;;  %v3282_v51 = vrot.slane %v5446_v30, %v5014_v5  ;;  %v3548_v22 = vmul.f32 %v3494_v17, %v3286_v41  ;;  %v3306_v15 = vrot.slane %v5448_v4, %v5014_v5 }
 0x140   : > { %v4199_v32 = vpack.c.bf16 %v3552_v49, %v3546_v1  ;;  %v3326_v19 = vrot.slane %v5450_v36, %v4792_v57  ;;  %v3554_v18 = vmul.f32 %v3500_v38, %v3310_v55  ;;  %v3545_v21 = vmul.f32 %v3491_v31, %v3274_v13  ;;  %v3792_v38 = vld [vmem:[%s5617_s3] sm:$0xff] }
 0x141   : > { %v3551_v12 = vmul.f32 %v3497_v61, %v3298_v39  ;;  %v3547_v16 = vmul.f32 %v3493_v53, %v3282_v51  ;;  %v3553_v34 = vmul.f32 %v3499_v24, %v3306_v15  ;;  %v3350_v30 = vrot.slane %v5452_v63, %v4792_v57 }
 0x142   : > { %4200 = vmatprep.subr.bf16.mxu1 %v4199_v32  ;;  %v3503_v11 = vunpack.c.l.bf16 %v4016_v48  ;;  %v3504_v2 = vunpack.c.h.bf16 %v4016_v48  ;;  %v4215_v27 = vpack.c.bf16 %v3554_v18, %v3548_v22  ;;  %v3509_v4 = vunpack.c.l.bf16 %v4019_v52 }
 0x143   : > { %v4201_v10 = vpack.c.bf16 %v3551_v12, %v3545_v21  ;;  %v3510_v8 = vunpack.c.h.bf16 %v4019_v52  ;;  %v4217_v14 = vpack.c.bf16 %v3553_v34, %v3547_v16  ;;  %v3334_v54 = vrot.slane %v5450_v36, %v4795_v58 }
 0x144   : > { %v3558_v44 = vmul.f32 %v3504_v2, %v3326_v19  ;;  %v3358_v35 = vrot.slane %v5452_v63, %v4795_v58  ;;  %4216 = vmatprep.subr.bf16.mxu0 %v4215_v27  ;;  %v3505_v7 = vunpack.c.l.bf16 %v4017_v42  ;;  %v3506_v33 = vunpack.c.h.bf16 %v4017_v42 }
 0x145   : > { %4202 = vmatpush1.bf16.msra.mxu1 %v4201_v10  ;;  %v3564_v60 = vmul.f32 %v3510_v8, %v3350_v30  ;;  %v3511_v56 = vunpack.c.l.bf16 %v4020_v26  ;;  %4218 = vmatpush1.bf16.msra.mxu0 %v4217_v14  ;;  %v3512_v43 = vunpack.c.h.bf16 %v4020_v26  ;;  %v3322_v29 = vrot.slane %v5450_v36, %v4803_v0 }
 0x146   : > { %v3346_v47 = vrot.slane %v5452_v63, %v4803_v0  ;;  %v3330_v23 = vrot.slane %v5450_v36, %v5014_v5  ;;  %v3560_v25 = vmul.f32 %v3506_v33, %v3334_v54  ;;  %v3354_v3 = vrot.slane %v5452_v63, %v5014_v5 }
 0x147   : > { %v4203_v28 = vpack.c.bf16 %v3564_v60, %v3558_v44  ;;  %v3374_v31 = vrot.slane %v5502_v9, %v4792_v57  ;;  %v3566_v40 = vmul.f32 %v3512_v43, %v3358_v35  ;;  %v3557_v45 = vmul.f32 %v3503_v11, %v3322_v29 }
 0x148   : > { %v3563_v6 = vmul.f32 %v3509_v4, %v3346_v47  ;;  %v3559_v46 = vmul.f32 %v3505_v7, %v3330_v23  ;;  %v3565_v61 = vmul.f32 %v3511_v56, %v3354_v3  ;;  %v3515_v20 = vunpack.c.l.bf16 %v4022_v62 }
 0x149   : > { %4204 = vmatprep.subr.bf16.mxu1 %v4203_v28  ;;  %v3516_v59 = vunpack.c.h.bf16 %v4022_v62  ;;  %v3382_v36 = vrot.slane %v5502_v9, %v4795_v58  ;;  %v4219_v1 = vpack.c.bf16 %v3566_v40, %v3560_v25  ;;  %v3517_v55 = vunpack.c.l.bf16 %v4023_v37 }
 0x14a   : > { %v4205_v41 = vpack.c.bf16 %v3563_v6, %v3557_v45  ;;  %v3518_v49 = vunpack.c.h.bf16 %v4023_v37  ;;  %v4221_v63 = vpack.c.bf16 %v3565_v61, %v3559_v46  ;;  %v3370_v57 = vrot.slane %v5502_v9, %v4803_v0 }
 0x14b   : > { %v3570_v53 = vmul.f32 %v3516_v59, %v3374_v31  ;;  %v3378_v17 = vrot.slane %v5502_v9, %v5014_v5  ;;  %4220 = vmatprep.subr.bf16.mxu0 %v4219_v1  ;;  %v4348_v39 = vmov 0  }
 0x14c   : > { %4206 = vmatpush1.bf16.msra.mxu1 %v4205_v41  ;;  %v3572_v24 = vmul.f32 %v3518_v49, %v3382_v36  ;;  %4222 = vmatpush1.bf16.msra.mxu0 %v4221_v63  ;;  %v3569_v58 = vmul.f32 %v3515_v20, %v3370_v57 }
 0x14d   : > { %3660 = vmatprep.subr.mxu1 %v3570_v53  ;;  %v3571_v13 = vmul.f32 %v3517_v55, %v3378_v17  ;;  %4272 = vset.pattern.permute.xlu0 %v4348_v39 }
 0x14e   : > { %3731 = vmatprep.subr.mxu0 %v3572_v24  ;;  %3795 = vperm.xlu0 %4272, %v3792_v38  }
 0x150   : > { %3661 = vmatpush1.msra.mxu1 %v3569_v58  ;;  %3732 = vmatpush1.msra.mxu0 %v3571_v13 }
 0x151   : > { %4025 = vmatmul.mubr.msk.f32.vlgmr.msra.gmra.mrb[2].mxu1 %vm1746_vm0, %v5367_v50  ;;  %4026 = vmatmul.mubr.msk.f32.vlgmr.msra.gmra.mrb[2].mxu0 %vm1746_vm0, %v5367_v50 }
 0x179   : > { %v1816_v0 = vpop.f32.mrb[0].mxu1 }
 0x17a   : > { %v1818_v5 = vpop.f32.mrb[1].mxu1 }
 0x1bc   : > { %v1958_v9 = vpop.f32.mrb[4].mxu1 }
 0x1bd   : > { %v1960_v51 = vpop.f32.mrb[5].mxu1 }
 0x1cd   : > { %v3796_v32 = vpop.permute.xlu0 %3795 }
 0x20a   : > { %v3639_v48 = vpop.f32.mrb[0].mxu0 }
 0x20b   : > { %v4223_v22 = vadd.f32 %v3639_v48, %v1816_v0  ;;  %v3641_v15 = vpop.f32.mrb[1].mxu0 }
 0x20c   : > { %v4224_v19 = vadd.f32 %v3641_v15, %v1818_v5 }
 0x20d   : > { %v3798_v52 = vadd.f32 %v4223_v22, %v3796_v32 }
 0x20e   : > { %v3799_v50 = vadd.f32 %v4224_v19, %v3796_v32 }
 0x20f   : > { %3804 = vst [vmem:[%s567_s6] sm:$0xff] %v3798_v52 }
 0x210   : > { %3805 = vst [vmem:[%s567_s6 + $0x8] sm:$0xff] %v3799_v50 }
 0x224   : > { %v3710_v18 = vpop.f32.mrb[2].mxu1  ;;  %v3781_v12 = vpop.f32.mrb[2].mxu0 }
 0x225   : > { %v3800_v21 = vadd.f32 %v3796_v32, %v3710_v18  ;;  %v3712_v16 = vpop.f32.mrb[3].mxu1  ;;  %v4225_v34 = vadd.f32 %v3781_v12, %v1958_v9  ;;  %v3783_v11 = vpop.f32.mrb[3].mxu0 }
 0x226   : > { %v3801_v30 = vadd.f32 %v3796_v32, %v3712_v16  ;;  %v4226_v2 = vadd.f32 %v3783_v11, %v1960_v51 }
 0x227   : > { %3806 = vst [vmem:[%s567_s6 + $0x10] sm:$0xff] %v3800_v21  ;;  %v3802_v42 = vadd.f32 %v4225_v34, %v3796_v32 }
 0x228   : > { %3807 = vst [vmem:[%s567_s6 + $0x18] sm:$0xff] %v3801_v30  ;;  %v3803_v26 = vadd.f32 %v4226_v2, %v3796_v32 }
 0x229   : > { %3808 = vst [vmem:[%s567_s6 + $0x20] sm:$0xff] %v3802_v42 }
 0x22a   : > { %3809 = vst [vmem:[%s567_s6 + $0x28] sm:$0xff] %v3803_v26 }
 0x22b PF: > { %p11_p9 = scmp.ge.s32.totalorder %s4391_s19, 4   ;;  %s5620_s15 = smov %s4340_s16 }
 0x22c   : > { %s5621_s16 = smov %s4400_s22  ;;  %s5622_s17 = smov %s4391_s19 }
 0x22d   :  { %13 = sbr.rel (!%p11_p9) target bundleno = 2 (0x2), region = 131 }

</bundles_post_ra>
